<compile_context>
chip_gen: v5e
topology: v5e:2x2
jax: 0.10.0
libtpu: 0.0.40
codegen_flags: <defaults>
</compile_context>

<pallas_src>
import functools

import numpy as np

import jax
import jax.numpy as jnp
from jax.experimental import pallas as pl
from jax.experimental.pallas import tpu as pltpu

BN_EPS = 1e-5


def _round_up(x, m):
    return (x + m - 1) // m * m


# ----------------------------- fused Pallas kernel -----------------------------

def _generator_fused_kernel(z_ref, w1_ref, sel1_ref, sel1t_ref, g1_ref, beta1_ref,
                            m2_ref, sel2_ref, sel2t_ref, g2_ref, beta2_ref,
                            m3_ref, bias3_ref, o_ref, *, count1, count2):
    """Whole generator forward, VMEM resident.

    z:     (N, Z)        bf16  latent
    w1:    (Z, P1)       bf16  ConvT1 as dense matmul (cols = (co,oh,ow), lane-padded)
    m2:    (P1, P2)      bf16  ConvT2 folded into one structured matrix
    m3:    (P2, P3)      bf16  ConvT3 folded into one structured matrix
    sel*:  (P, C)/(C, P) f32   one-hot channel selectors for BN stats / broadcast
    g/beta:(1, C)        f32   BatchNorm affine parameters
    bias3: (1, P3)       f32   ConvT3 bias broadcast over output columns
    o:     (N, P3)       f32   flattened (co, oh, ow) output, lane-dense
    """

    def bn_relu(y, sel, selt, gamma, beta, count):
        # Training-mode (biased) BatchNorm folded into a single FMA + ReLU.
        col_sum = jnp.sum(y, axis=0, keepdims=True)                     # (1, P)
        col_sq = jnp.sum(y * y, axis=0, keepdims=True)
        # Per-channel stats via one-hot selector matmuls (padded columns map to
        # all-zero selector rows, so they drop out of the statistics exactly).
        # NOTE: kept as 4 tiny dots rather than two stacked (2,*) dots -- a
        # sublane concat of 1-row operands is a Mosaic lowering risk, and the
        # stats chain is no longer a standalone-call latency tail once fused.
        ssum = jnp.dot(col_sum, sel, preferred_element_type=jnp.float32)   # (1, C)
        ssq = jnp.dot(col_sq, sel, preferred_element_type=jnp.float32)
        inv = 1.0 / count
        mean = ssum * inv
        var = jnp.maximum(ssq * inv - mean * mean, 0.0)                 # biased stats
        scale = gamma * jax.lax.rsqrt(var + BN_EPS)                     # (1, C)
        shift = beta - mean * scale
        scale_c = jnp.dot(scale, selt, preferred_element_type=jnp.float32)  # (1, P)
        shift_c = jnp.dot(shift, selt, preferred_element_type=jnp.float32)
        return jnp.maximum(y * scale_c + shift_c, 0.0)                  # fused BN+ReLU

    # Block 1: ConvT(k=7,s=1,p=0) on a 1x1 input is an exact dense matmul.
    y1 = jnp.dot(z_ref[...], w1_ref[...], preferred_element_type=jnp.float32)
    y1 = bn_relu(y1, sel1_ref[...], sel1t_ref[...], g1_ref[...], beta1_ref[...],
                 count1)

    # Block 2: ConvT(k=4,s=2,p=1) + BN + ReLU as one structured matmul (7x7->14x14).
    y2 = jnp.dot(y1.astype(jnp.bfloat16), m2_ref[...],
                 preferred_element_type=jnp.float32)
    y2 = bn_relu(y2, sel2_ref[...], sel2t_ref[...], g2_ref[...], beta2_ref[...],
                 count2)

    # Block 3: ConvT(k=4,s=2,p=1) + bias + Tanh (14x14 -> 28x28).
    y3 = jnp.dot(y2.astype(jnp.bfloat16), m3_ref[...],
                 preferred_element_type=jnp.float32)
    o_ref[...] = jnp.tanh(y3 + bias3_ref[...])


# ----------------------------- weight-only preprocessing -----------------------

def _convt_structure(h_in):
    """S[ih, oh, k] = 1 iff ConvT(k=4, s=2, p=1) maps input row ih with kernel
    row k onto output row oh (oh = 2*ih + k - 1).  Pure 0/1 constant."""
    h_out = 2 * h_in
    ih = np.arange(h_in)[:, None, None]
    oh = np.arange(h_out)[None, :, None]
    kk = np.arange(4)[None, None, :]
    return jnp.asarray((oh == 2 * ih + kk - 1).astype(np.float32))


def _channel_selector(cols, cols_pad, channels):
    """(cols_pad, channels) one-hot map from flattened (c, h, w) column index to
    its channel; all-zero rows for the lane-padding columns."""
    hw = cols // channels
    sel = np.zeros((cols_pad, channels), np.float32)
    j = np.arange(cols)
    sel[j, j // hw] = 1.0
    return jnp.asarray(sel), jnp.asarray(np.ascontiguousarray(sel.T))


# ----------------------------- parameters & forward ----------------------------

def init_generator_params(key, input_channels, features, output_channels):
    f2, f4 = features // 2, features // 4

    def uinit(k, shape, fan_in):
        bound = 1.0 / (float(fan_in) ** 0.5)
        return jax.random.uniform(k, shape, jnp.float32, -bound, bound)

    ks = jax.random.split(key, 6)
    return {
        # ConvTranspose2d weights in PyTorch layout (Cin, Cout, K, K)
        "w1": uinit(ks[0], (input_channels, f2, 7, 7), f2 * 49),
        "b1": uinit(ks[1], (f2,), f2 * 49),     # kept for module parity; exactly
        "g1": jnp.ones((f2,), jnp.float32),     # cancelled by BN mean subtraction
        "beta1": jnp.zeros((f2,), jnp.float32),
        "w2": uinit(ks[2], (f2, f4, 4, 4), f4 * 16),
        "b2": uinit(ks[3], (f4,), f4 * 16),     # kept for module parity (unused)
        "g2": jnp.ones((f4,), jnp.float32),
        "beta2": jnp.zeros((f4,), jnp.float32),
        "w3": uinit(ks[4], (f4, output_channels, 4, 4), output_channels * 16),
        "b3": uinit(ks[5], (output_channels,), output_channels * 16),
    }


def generator_forward(params, x_nchw):
    n, z_dim, hin, win = x_nchw.shape
    assert hin == 1 and win == 1, "Generator expects a (N, Z, 1, 1) latent"

    f2 = params["w1"].shape[1]
    f4 = params["w2"].shape[1]
    c_out = params["w3"].shape[1]

    cols1, cols2, cols3 = f2 * 49, f4 * 196, c_out * 784
    p1, p2, p3 = (_round_up(c, 128) for c in (cols1, cols2, cols3))

    z = x_nchw.reshape(n, z_dim).astype(jnp.bfloat16)

    # Layer 1: 1x1 input => output pixel == kernel tap; columns are (co, oh, ow).
    w1m = jnp.pad(params["w1"].reshape(z_dim, cols1),
                  ((0, 0), (0, p1 - cols1))).astype(jnp.bfloat16)

    # Layers 2/3: fold ConvT(k=4, s=2, p=1) into a structured matrix
    #   M[(ci,ih,iw),(co,oh,ow)] = W[ci,co,ky,kx]*[oh==2ih+ky-1]*[ow==2iw+kx-1]
    # (weight-only; each M entry is a single weight or 0, so exact).
    s7 = _convt_structure(7)        # 7x7   -> 14x14
    s14 = _convt_structure(14)      # 14x14 -> 28x28
    m2 = jnp.einsum("icyx,hoy,wpx->ihwcop", params["w2"], s7, s7)
    m2 = jnp.pad(m2.reshape(cols1, cols2),
                 ((0, p1 - cols1), (0, p2 - cols2))).astype(jnp.bfloat16)
    m3 = jnp.einsum("icyx,hoy,wpx->ihwcop", params["w3"], s14, s14)
    m3 = jnp.pad(m3.reshape(cols2, cols3),
                 ((0, p2 - cols2), (0, p3 - cols3))).astype(jnp.bfloat16)

    sel1, sel1t = _channel_selector(cols1, p1, f2)
    sel2, sel2t = _channel_selector(cols2, p2, f4)
    bias3 = jnp.pad(jnp.repeat(params["b3"].astype(jnp.float32), 784),
                    (0, p3 - cols3))[None, :]

    g1, beta1 = params["g1"][None, :], params["beta1"][None, :]
    g2, beta2 = params["g2"][None, :], params["beta2"][None, :]

    operands = (z, w1m, sel1, sel1t, g1, beta1,
                m2, sel2, sel2t, g2, beta2, m3, bias3)

    # Explicit scoped-VMEM budget (v5e default is only 16 MiB; v7x physical 64 MiB).
    in_bytes = sum(int(a.size) * int(a.dtype.itemsize) for a in operands)
    out_bytes = n * p3 * 4
    act_bytes = n * max(p1, p2, p3) * 4
    vmem_limit = int(min(max(2 * (in_bytes + out_bytes) + 8 * act_bytes, 32 << 20),
                         48 << 20))

    kernel = functools.partial(_generator_fused_kernel,
                               count1=float(n * 49), count2=float(n * 196))
    y = pl.pallas_call(
        kernel,
        out_shape=jax.ShapeDtypeStruct((n, p3), jnp.float32),
        in_specs=[pl.BlockSpec(memory_space=pltpu.MemorySpace.VMEM)] * len(operands),
        out_specs=pl.BlockSpec(memory_space=pltpu.MemorySpace.VMEM),
        compiler_params=pltpu.CompilerParams(vmem_limit_bytes=vmem_limit),
    )(*operands)

    # Columns are already (co, oh, ow)-major, so this is NCHW with no transpose.
    return y[:, :cols3].reshape(n, c_out, 28, 28)


if __name__ == "__main__":
    key = jax.random.PRNGKey(0)
    kp, kx = jax.random.split(key)

    N, Z, FEATURES, OUT_C = 2, 8, 16, 1
    params = init_generator_params(kp, Z, FEATURES, OUT_C)
    x = jax.random.normal(kx, (N, Z, 1, 1), jnp.float32)          # latent noise

    out = jax.jit(generator_forward)(params, x)
    out = jax.block_until_ready(out)

    assert out.shape == (N, OUT_C, 28, 28), out.shape
    assert bool(jnp.all(jnp.isfinite(out)))
    assert bool(jnp.all(jnp.abs(out) <= 1.0 + 1e-5))              # tanh range
    print("KERNEL_OK")
</pallas_src>

<mosaic_0001>
module attributes {stable_mosaic.version = 11 : i64} {
  func.func @_generator_fused_kernel(%arg0: memref<2x8xbf16, #tpu.memory_space<vmem>>, %arg1: memref<8x512xbf16, #tpu.memory_space<vmem>>, %arg2: memref<512x8xf32, #tpu.memory_space<vmem>>, %arg3: memref<8x512xf32, #tpu.memory_space<vmem>>, %arg4: memref<1x8xf32, #tpu.memory_space<vmem>>, %arg5: memref<1x8xf32, #tpu.memory_space<vmem>>, %arg6: memref<512x896xbf16, #tpu.memory_space<vmem>>, %arg7: memref<896x4xf32, #tpu.memory_space<vmem>>, %arg8: memref<4x896xf32, #tpu.memory_space<vmem>>, %arg9: memref<1x4xf32, #tpu.memory_space<vmem>>, %arg10: memref<1x4xf32, #tpu.memory_space<vmem>>, %arg11: memref<896x896xbf16, #tpu.memory_space<vmem>>, %arg12: memref<1x896xf32, #tpu.memory_space<vmem>>, %arg13: memref<2x896xf32, #tpu.memory_space<vmem>>) attributes {dimension_semantics = [], scalar_prefetch = 0 : i64, scratch_operands = 0 : i64, tpu.core_type = #tpu.core_type<tc>} {
    %c0 = arith.constant 0 : index
    %c0_0 = arith.constant 0 : index
    %0 = vector.load %arg0[%c0, %c0_0] : memref<2x8xbf16, #tpu.memory_space<vmem>>, vector<2x8xbf16>
    %c0_1 = arith.constant 0 : index
    %c0_2 = arith.constant 0 : index
    %1 = vector.load %arg1[%c0_1, %c0_2] : memref<8x512xbf16, #tpu.memory_space<vmem>>, vector<8x512xbf16>
    %cst = arith.constant dense<0.000000e+00> : vector<2x512xf32>
    %2 = tpu.matmul %0, %1, %cst {dimension_numbers = #tpu.dot_dimension_numbers<[1], [0], [0], [1], [0, 0, 1, 1], [], []>} : vector<2x8xbf16>, vector<8x512xbf16>, vector<2x512xf32> -> vector<2x512xf32>
    %c0_3 = arith.constant 0 : index
    %c0_4 = arith.constant 0 : index
    %3 = vector.load %arg2[%c0_3, %c0_4] : memref<512x8xf32, #tpu.memory_space<vmem>>, vector<512x8xf32>
    %c0_5 = arith.constant 0 : index
    %c0_6 = arith.constant 0 : index
    %4 = vector.load %arg3[%c0_5, %c0_6] : memref<8x512xf32, #tpu.memory_space<vmem>>, vector<8x512xf32>
    %c0_7 = arith.constant 0 : index
    %c0_8 = arith.constant 0 : index
    %5 = vector.load %arg4[%c0_7, %c0_8] : memref<1x8xf32, #tpu.memory_space<vmem>>, vector<1x8xf32>
    %c0_9 = arith.constant 0 : index
    %c0_10 = arith.constant 0 : index
    %6 = vector.load %arg5[%c0_9, %c0_10] : memref<1x8xf32, #tpu.memory_space<vmem>>, vector<1x8xf32>
    %cst_11 = arith.constant dense<0.000000e+00> : vector<512xf32>
    %7 = vector.multi_reduction <add>, %2, %cst_11 [0] : vector<2x512xf32> to vector<512xf32>
    %8 = vector.shape_cast %7 : vector<512xf32> to vector<1x512xf32>
    %9 = arith.mulf %2, %2 : vector<2x512xf32>
    %cst_12 = arith.constant dense<0.000000e+00> : vector<512xf32>
    %10 = vector.multi_reduction <add>, %9, %cst_12 [0] : vector<2x512xf32> to vector<512xf32>
    %11 = vector.shape_cast %10 : vector<512xf32> to vector<1x512xf32>
    %cst_13 = arith.constant dense<0.000000e+00> : vector<1x8xf32>
    %12 = tpu.matmul %8, %3, %cst_13 {dimension_numbers = #tpu.dot_dimension_numbers<[1], [0], [0], [1], [0, 0, 1, 1], [], []>} : vector<1x512xf32>, vector<512x8xf32>, vector<1x8xf32> -> vector<1x8xf32>
    %cst_14 = arith.constant dense<0.000000e+00> : vector<1x8xf32>
    %13 = tpu.matmul %11, %3, %cst_14 {dimension_numbers = #tpu.dot_dimension_numbers<[1], [0], [0], [1], [0, 0, 1, 1], [], []>} : vector<1x512xf32>, vector<512x8xf32>, vector<1x8xf32> -> vector<1x8xf32>
    %cst_15 = arith.constant 0.0102040814 : f32
    %14 = vector.broadcast %cst_15 : f32 to vector<1x8xf32>
    %15 = arith.mulf %12, %14 : vector<1x8xf32>
    %cst_16 = arith.constant 0.0102040814 : f32
    %16 = vector.broadcast %cst_16 : f32 to vector<1x8xf32>
    %17 = arith.mulf %13, %16 : vector<1x8xf32>
    %18 = arith.mulf %15, %15 : vector<1x8xf32>
    %19 = arith.subf %17, %18 : vector<1x8xf32>
    %cst_17 = arith.constant 0.000000e+00 : f32
    %20 = vector.broadcast %cst_17 : f32 to vector<1x8xf32>
    %21 = arith.maximumf %19, %20 : vector<1x8xf32>
    %cst_18 = arith.constant 9.99999974E-6 : f32
    %22 = vector.broadcast %cst_18 : f32 to vector<1x8xf32>
    %23 = arith.addf %21, %22 : vector<1x8xf32>
    %24 = math.rsqrt %23 : vector<1x8xf32>
    %25 = arith.mulf %5, %24 : vector<1x8xf32>
    %26 = arith.mulf %15, %25 : vector<1x8xf32>
    %27 = arith.subf %6, %26 : vector<1x8xf32>
    %cst_19 = arith.constant dense<0.000000e+00> : vector<1x512xf32>
    %28 = tpu.matmul %25, %4, %cst_19 {dimension_numbers = #tpu.dot_dimension_numbers<[1], [0], [0], [1], [0, 0, 1, 1], [], []>} : vector<1x8xf32>, vector<8x512xf32>, vector<1x512xf32> -> vector<1x512xf32>
    %cst_20 = arith.constant dense<0.000000e+00> : vector<1x512xf32>
    %29 = tpu.matmul %27, %4, %cst_20 {dimension_numbers = #tpu.dot_dimension_numbers<[1], [0], [0], [1], [0, 0, 1, 1], [], []>} : vector<1x8xf32>, vector<8x512xf32>, vector<1x512xf32> -> vector<1x512xf32>
    %30 = vector.broadcast %28 : vector<1x512xf32> to vector<2x512xf32>
    %31 = arith.mulf %2, %30 : vector<2x512xf32>
    %32 = vector.broadcast %29 : vector<1x512xf32> to vector<2x512xf32>
    %33 = arith.addf %31, %32 : vector<2x512xf32>
    %cst_21 = arith.constant 0.000000e+00 : f32
    %34 = vector.broadcast %cst_21 : f32 to vector<2x512xf32>
    %35 = arith.maximumf %33, %34 : vector<2x512xf32>
    %36 = arith.truncf %35 : vector<2x512xf32> to vector<2x512xbf16>
    %c0_22 = arith.constant 0 : index
    %c0_23 = arith.constant 0 : index
    %37 = vector.load %arg6[%c0_22, %c0_23] : memref<512x896xbf16, #tpu.memory_space<vmem>>, vector<512x896xbf16>
    %cst_24 = arith.constant dense<0.000000e+00> : vector<2x896xf32>
    %38 = tpu.matmul %36, %37, %cst_24 {dimension_numbers = #tpu.dot_dimension_numbers<[1], [0], [0], [1], [0, 0, 1, 1], [], []>} : vector<2x512xbf16>, vector<512x896xbf16>, vector<2x896xf32> -> vector<2x896xf32>
    %c0_25 = arith.constant 0 : index
    %c0_26 = arith.constant 0 : index
    %39 = vector.load %arg7[%c0_25, %c0_26] : memref<896x4xf32, #tpu.memory_space<vmem>>, vector<896x4xf32>
    %c0_27 = arith.constant 0 : index
    %c0_28 = arith.constant 0 : index
    %40 = vector.load %arg8[%c0_27, %c0_28] : memref<4x896xf32, #tpu.memory_space<vmem>>, vector<4x896xf32>
    %c0_29 = arith.constant 0 : index
    %c0_30 = arith.constant 0 : index
    %41 = vector.load %arg9[%c0_29, %c0_30] : memref<1x4xf32, #tpu.memory_space<vmem>>, vector<1x4xf32>
    %c0_31 = arith.constant 0 : index
    %c0_32 = arith.constant 0 : index
    %42 = vector.load %arg10[%c0_31, %c0_32] : memref<1x4xf32, #tpu.memory_space<vmem>>, vector<1x4xf32>
    %cst_33 = arith.constant dense<0.000000e+00> : vector<896xf32>
    %43 = vector.multi_reduction <add>, %38, %cst_33 [0] : vector<2x896xf32> to vector<896xf32>
    %44 = vector.shape_cast %43 : vector<896xf32> to vector<1x896xf32>
    %45 = arith.mulf %38, %38 : vector<2x896xf32>
    %cst_34 = arith.constant dense<0.000000e+00> : vector<896xf32>
    %46 = vector.multi_reduction <add>, %45, %cst_34 [0] : vector<2x896xf32> to vector<896xf32>
    %47 = vector.shape_cast %46 : vector<896xf32> to vector<1x896xf32>
    %cst_35 = arith.constant dense<0.000000e+00> : vector<1x4xf32>
    %48 = tpu.matmul %44, %39, %cst_35 {dimension_numbers = #tpu.dot_dimension_numbers<[1], [0], [0], [1], [0, 0, 1, 1], [], []>} : vector<1x896xf32>, vector<896x4xf32>, vector<1x4xf32> -> vector<1x4xf32>
    %cst_36 = arith.constant dense<0.000000e+00> : vector<1x4xf32>
    %49 = tpu.matmul %47, %39, %cst_36 {dimension_numbers = #tpu.dot_dimension_numbers<[1], [0], [0], [1], [0, 0, 1, 1], [], []>} : vector<1x896xf32>, vector<896x4xf32>, vector<1x4xf32> -> vector<1x4xf32>
    %cst_37 = arith.constant 0.00255102036 : f32
    %50 = vector.broadcast %cst_37 : f32 to vector<1x4xf32>
    %51 = arith.mulf %48, %50 : vector<1x4xf32>
    %cst_38 = arith.constant 0.00255102036 : f32
    %52 = vector.broadcast %cst_38 : f32 to vector<1x4xf32>
    %53 = arith.mulf %49, %52 : vector<1x4xf32>
    %54 = arith.mulf %51, %51 : vector<1x4xf32>
    %55 = arith.subf %53, %54 : vector<1x4xf32>
    %cst_39 = arith.constant 0.000000e+00 : f32
    %56 = vector.broadcast %cst_39 : f32 to vector<1x4xf32>
    %57 = arith.maximumf %55, %56 : vector<1x4xf32>
    %cst_40 = arith.constant 9.99999974E-6 : f32
    %58 = vector.broadcast %cst_40 : f32 to vector<1x4xf32>
    %59 = arith.addf %57, %58 : vector<1x4xf32>
    %60 = math.rsqrt %59 : vector<1x4xf32>
    %61 = arith.mulf %41, %60 : vector<1x4xf32>
    %62 = arith.mulf %51, %61 : vector<1x4xf32>
    %63 = arith.subf %42, %62 : vector<1x4xf32>
    %cst_41 = arith.constant dense<0.000000e+00> : vector<1x896xf32>
    %64 = tpu.matmul %61, %40, %cst_41 {dimension_numbers = #tpu.dot_dimension_numbers<[1], [0], [0], [1], [0, 0, 1, 1], [], []>} : vector<1x4xf32>, vector<4x896xf32>, vector<1x896xf32> -> vector<1x896xf32>
    %cst_42 = arith.constant dense<0.000000e+00> : vector<1x896xf32>
    %65 = tpu.matmul %63, %40, %cst_42 {dimension_numbers = #tpu.dot_dimension_numbers<[1], [0], [0], [1], [0, 0, 1, 1], [], []>} : vector<1x4xf32>, vector<4x896xf32>, vector<1x896xf32> -> vector<1x896xf32>
    %66 = vector.broadcast %64 : vector<1x896xf32> to vector<2x896xf32>
    %67 = arith.mulf %38, %66 : vector<2x896xf32>
    %68 = vector.broadcast %65 : vector<1x896xf32> to vector<2x896xf32>
    %69 = arith.addf %67, %68 : vector<2x896xf32>
    %cst_43 = arith.constant 0.000000e+00 : f32
    %70 = vector.broadcast %cst_43 : f32 to vector<2x896xf32>
    %71 = arith.maximumf %69, %70 : vector<2x896xf32>
    %72 = arith.truncf %71 : vector<2x896xf32> to vector<2x896xbf16>
    %c0_44 = arith.constant 0 : index
    %c0_45 = arith.constant 0 : index
    %73 = vector.load %arg11[%c0_44, %c0_45] : memref<896x896xbf16, #tpu.memory_space<vmem>>, vector<896x896xbf16>
    %cst_46 = arith.constant dense<0.000000e+00> : vector<2x896xf32>
    %74 = tpu.matmul %72, %73, %cst_46 {dimension_numbers = #tpu.dot_dimension_numbers<[1], [0], [0], [1], [0, 0, 1, 1], [], []>} : vector<2x896xbf16>, vector<896x896xbf16>, vector<2x896xf32> -> vector<2x896xf32>
    %c0_47 = arith.constant 0 : index
    %c0_48 = arith.constant 0 : index
    %75 = vector.load %arg12[%c0_47, %c0_48] : memref<1x896xf32, #tpu.memory_space<vmem>>, vector<1x896xf32>
    %76 = vector.broadcast %75 : vector<1x896xf32> to vector<2x896xf32>
    %77 = arith.addf %74, %76 : vector<2x896xf32>
    %78 = math.tanh %77 : vector<2x896xf32>
    %c0_49 = arith.constant 0 : index
    %c0_50 = arith.constant 0 : index
    %79 = vector.load %arg13[%c0_49, %c0_50] : memref<2x896xf32, #tpu.memory_space<vmem>>, vector<2x896xf32>
    tpu.vector_store %arg13[%c0_49, %c0_50], %78 {strides = array<i32>} : memref<2x896xf32, #tpu.memory_space<vmem>>, vector<2x896xf32>,
    return
  }
}

</mosaic_0001>

<bundles_post_ra>
// kernel: generator_forward.1
= control target key start
LH: loop header
LB: loop body
LE: loop exit
PB: predicated region body
PF: predicated region fallthrough
CT: control target
= control target key end

     0   :  { %vm62_vm0 = vcmask 1043456   ;;  %vm58_vm1 = vcmask 64512   ;;  %vm197_vm2 = vcmask 1041408   ;;  %vm2939_vm9 = vcmask 31744   ;;  %s15005_s1 = inlined_call_operand.vmem [shape: bf16[8,512], index: 1, kind: input, shape index: {}]   ;;  %s15006_s2 = inlined_call_operand.vmem [shape: f32[512,8], index: 2, kind: input, shape index: {}]   ;;  %s15007_s0 = inlined_call_operand.vmem [shape: bf16[2,8], index: 0, kind: input, shape index: {}]   ;;  %s15008_s3 = inlined_call_operand.vmem [shape: f32[8,512], index: 3, kind: input, shape index: {}]   ;;  %s15009_s6 = inlined_call_operand.vmem [shape: bf16[512,896], index: 6, kind: input, shape index: {}]   ;;  %s15010_s4 = inlined_call_operand.vmem [shape: f32[1,8], index: 4, kind: input, shape index: {}]   ;;  %s15011_s5 = inlined_call_operand.vmem [shape: f32[1,8], index: 5, kind: input, shape index: {}]   ;;  %s15012_s7 = inlined_call_operand.vmem [shape: f32[896,4], index: 7, kind: input, shape index: {}]   ;;  %s15013_s8 = inlined_call_operand.vmem [shape: f32[4,896], index: 8, kind: input, shape index: {}]   ;;  %s15014_s9 = inlined_call_operand.vmem [shape: f32[1,4], index: 9, kind: input, shape index: {}]   ;;  %s15015_s10 = inlined_call_operand.vmem [shape: f32[1,4], index: 10, kind: input, shape index: {}]   ;;  %s15016_s11 = inlined_call_operand.vmem [shape: bf16[896,896], index: 11, kind: input, shape index: {}]   ;;  %s15017_s12 = inlined_call_operand.vmem [shape: f32[1,896], index: 12, kind: input, shape index: {}]   ;;  %s15018_s13 = inlined_call_operand.vmem [shape: f32[2,896], index: 13, kind: output, shape index: {}]  }
   0x1   :  { %v46_v0 = vld [vmem:[%s15005_s1] sm:$0xff]  ;;  %v47_v1 = vld [vmem:[%s15005_s1 + $0x8] sm:$0xff]  ;;  %v9682_v14 = vld [vmem:[%s15006_s2 + $0x78] sm:$0xff]  ;;  %vm6447_vm10 = vcmask 1045508  }
   0x2   :  { %v50_v2 = vunpack.c.l.b16 %v46_v0  ;;  %v51_v3 = vunpack.c.h.b16 %v46_v0  ;;  %v52_v4 = vunpack.c.l.b16 %v47_v1  ;;  %v53_v5 = vunpack.c.h.b16 %v47_v1  ;;  %v9687_v15 = vld [vmem:[%s15006_s2 + $0xf8] sm:$0xff]  ;;  %v45_v16 = vld [vmem:[%s15007_s0] sm:$0x1]  ;;  %v9697_v17 = vld [vmem:[%s15006_s2 + $0x70] sm:$0xff] }
   0x3   :  { %v9702_v18 = vld [vmem:[%s15006_s2 + $0xf0] sm:$0xff]  ;;  %v9709_v19 = vld [vmem:[%s15006_s2 + $0x178] sm:$0xff]  ;;  %v9721_v21 = vld [vmem:[%s15006_s2 + $0x68] sm:$0xff] }
   0x4   :  { %v54_v6 = vpack.c.b16 %v50_v2, %v50_v2  ;;  %v55_v7 = vpack.c.b16 %v51_v3, %v51_v3  ;;  %v56_v8 = vpack.c.b16 %v52_v4, %v52_v4  ;;  %v57_v9 = vpack.c.b16 %v53_v5, %v53_v5  ;;  %v9714_v20 = vld [vmem:[%s15006_s2 + $0x1f8] sm:$0xff]  ;;  %v9726_v22 = vld [vmem:[%s15006_s2 + $0xe8] sm:$0xff]  ;;  %v9733_v23 = vld [vmem:[%s15006_s2 + $0x170] sm:$0xff] }
   0x5   :  { %v9738_v24 = vld [vmem:[%s15006_s2 + $0x1f0] sm:$0xff]  ;;  %v9743_v25 = vld [vmem:[%s15006_s2 + $0x60] sm:$0xff]  ;;  %v9757_v27 = vld [vmem:[%s15006_s2 + $0x168] sm:$0xff] }
   0x6   :  { %v64_v10 = vsel %vm62_vm0, %v54_v6, 0  ;;  %v67_v11 = vsel %vm62_vm0, %v55_v7, 0  ;;  %v70_v12 = vsel %vm62_vm0, %v56_v8, 0  ;;  %v73_v13 = vsel %vm62_vm0, %v57_v9, 0  ;;  %v9748_v26 = vld [vmem:[%s15006_s2 + $0xe0] sm:$0xff]  ;;  %v9762_v28 = vld [vmem:[%s15006_s2 + $0x1e8] sm:$0xff] }
   0x7   :  { %82 = vmatpush.bf16.msra.mxu0 %v64_v10  ;;  %95 = vmatpush.bf16.msra.mxu1 %v67_v11  ;;  %v9767_v29 = vld [vmem:[%s15006_s2 + $0x58] sm:$0xff]  ;;  %v9781_v31 = vld [vmem:[%s15006_s2 + $0x160] sm:$0xff]  ;;  %v9791_v33 = vld [vmem:[%s15006_s2 + $0x50] sm:$0xff] }
   0x8   :  { %108 = vmatpush.bf16.msra.mxu2 %v70_v12  ;;  %121 = vmatpush.bf16.msra.mxu3 %v73_v13  ;;  %v9772_v30 = vld [vmem:[%s15006_s2 + $0xd8] sm:$0xff]  ;;  %v9786_v32 = vld [vmem:[%s15006_s2 + $0x1e0] sm:$0xff]  ;;  %v9796_v34 = vld [vmem:[%s15006_s2 + $0xd0] sm:$0xff] }
   0x9   :  { %v9805_v35 = vld [vmem:[%s15006_s2 + $0x158] sm:$0xff]  ;;  %v9815_v37 = vld [vmem:[%s15006_s2 + $0x48] sm:$0xff]  ;;  %v9829_v39 = vld [vmem:[%s15006_s2 + $0x150] sm:$0xff] }
   0xa   :  { %6460 = vmatmul.msk.bf16.vlgmr.msra.gmra.mxu0 %vm58_vm1, %v45_v16  ;;  %6461 = vmatmul.msk.bf16.vlgmr.msra.gmra.mxu1 %vm58_vm1, %v45_v16  ;;  %v9810_v36 = vld [vmem:[%s15006_s2 + $0x1d8] sm:$0xff]  ;;  %v9820_v38 = vld [vmem:[%s15006_s2 + $0xc8] sm:$0xff]  ;;  %v9834_v40 = vld [vmem:[%s15006_s2 + $0x1d0] sm:$0xff] }
   0xb   :  { %258 = vmatpush.msrb.mxu0 %v9682_v14  ;;  %278 = vmatpush.msrb.mxu1 %v9687_v15  ;;  %v9839_v41 = vld [vmem:[%s15006_s2 + $0x40] sm:$0xff]  ;;  %v9853_v43 = vld [vmem:[%s15006_s2 + $0x148] sm:$0xff]  ;;  %v9863_v45 = vld [vmem:[%s15006_s2 + $0x38] sm:$0xff] }
   0xc   :  { %6462 = vmatmul.msk.bf16.vlgmr.msra.gmra.mxu2 %vm58_vm1, %v45_v16  ;;  %6463 = vmatmul.msk.bf16.vlgmr.msra.gmra.mxu3 %vm58_vm1, %v45_v16  ;;  %v9844_v42 = vld [vmem:[%s15006_s2 + $0xc0] sm:$0xff]  ;;  %v9858_v44 = vld [vmem:[%s15006_s2 + $0x1c8] sm:$0xff]  ;;  %v9868_v46 = vld [vmem:[%s15006_s2 + $0xb8] sm:$0xff] }
   0xd   :  { %259 = vmatpush.msrb.mxu0 %v9697_v17  ;;  %279 = vmatpush.msrb.mxu1 %v9702_v18  ;;  %v9877_v47 = vld [vmem:[%s15006_s2 + $0x140] sm:$0xff]  ;;  %v9887_v49 = vld [vmem:[%s15006_s2 + $0x30] sm:$0xff]  ;;  %v9901_v51 = vld [vmem:[%s15006_s2 + $0x138] sm:$0xff] }
   0xe   :  { %298 = vmatpush.msrb.mxu2 %v9709_v19  ;;  %318 = vmatpush.msrb.mxu3 %v9714_v20  ;;  %v9882_v48 = vld [vmem:[%s15006_s2 + $0x1c0] sm:$0xff]  ;;  %v9892_v50 = vld [vmem:[%s15006_s2 + $0xb0] sm:$0xff]  ;;  %v9906_v52 = vld [vmem:[%s15006_s2 + $0x1b8] sm:$0xff] }
   0xf   :  { %260 = vmatpush.msrb.mxu0 %v9721_v21  ;;  %280 = vmatpush.msrb.mxu1 %v9726_v22  ;;  %v9911_v53 = vld [vmem:[%s15006_s2 + $0x28] sm:$0xff]  ;;  %v9925_v55 = vld [vmem:[%s15006_s2 + $0x130] sm:$0xff]  ;;  %v9935_v57 = vld [vmem:[%s15006_s2 + $0x20] sm:$0xff] }
  0x10   :  { %299 = vmatpush.msrb.mxu2 %v9733_v23  ;;  %319 = vmatpush.msrb.mxu3 %v9738_v24  ;;  %v9916_v54 = vld [vmem:[%s15006_s2 + $0xa8] sm:$0xff]  ;;  %v9930_v56 = vld [vmem:[%s15006_s2 + $0x1b0] sm:$0xff]  ;;  %v9940_v58 = vld [vmem:[%s15006_s2 + $0xa0] sm:$0xff] }
  0x11   :  { %261 = vmatpush.msrb.mxu0 %v9743_v25  ;;  %281 = vmatpush.msrb.mxu1 %v9748_v26  ;;  %v9949_v59 = vld [vmem:[%s15006_s2 + $0x128] sm:$0xff]  ;;  %v9959_v61 = vld [vmem:[%s15006_s2 + $0x18] sm:$0xff]  ;;  %v9973_v63 = vld [vmem:[%s15006_s2 + $0x120] sm:$0xff] }
  0x12   :  { %300 = vmatpush.msrb.mxu2 %v9757_v27  ;;  %320 = vmatpush.msrb.mxu3 %v9762_v28  ;;  %v9954_v60 = vld [vmem:[%s15006_s2 + $0x1a8] sm:$0xff]  ;;  %v9964_v62 = vld [vmem:[%s15006_s2 + $0x98] sm:$0xff]  ;;  %v9978_v0 = vld [vmem:[%s15006_s2 + $0x1a0] sm:$0xff] }
  0x13   :  { %262 = vmatpush.msrb.mxu0 %v9767_v29  ;;  %282 = vmatpush.msrb.mxu1 %v9772_v30  ;;  %v9983_v1 = vld [vmem:[%s15006_s2 + $0x10] sm:$0xff]  ;;  %v9997_v3 = vld [vmem:[%s15006_s2 + $0x118] sm:$0xff]  ;;  %v10007_v5 = vld [vmem:[%s15006_s2 + $0x8] sm:$0xff] }
  0x14   :  { %301 = vmatpush.msrb.mxu2 %v9781_v31  ;;  %321 = vmatpush.msrb.mxu3 %v9786_v32  ;;  %v9988_v2 = vld [vmem:[%s15006_s2 + $0x90] sm:$0xff]  ;;  %v10002_v4 = vld [vmem:[%s15006_s2 + $0x198] sm:$0xff]  ;;  %v10012_v6 = vld [vmem:[%s15006_s2 + $0x88] sm:$0xff] }
  0x15   :  { %263 = vmatpush.msrb.mxu0 %v9791_v33  ;;  %283 = vmatpush.msrb.mxu1 %v9796_v34  ;;  %v10021_v7 = vld [vmem:[%s15006_s2 + $0x110] sm:$0xff]  ;;  %v10031_v9 = vld [vmem:[%s15006_s2] sm:$0xff]  ;;  %v10047_v11 = vld [vmem:[%s15006_s2 + $0x108] sm:$0xff] }
  0x16   :  { %302 = vmatpush.msrb.mxu2 %v9805_v35  ;;  %322 = vmatpush.msrb.mxu3 %v9810_v36  ;;  %v10026_v8 = vld [vmem:[%s15006_s2 + $0x190] sm:$0xff]  ;;  %v10036_v10 = vld [vmem:[%s15006_s2 + $0x80] sm:$0xff]  ;;  %v10052_v12 = vld [vmem:[%s15006_s2 + $0x188] sm:$0xff] }
  0x17   :  { %264 = vmatpush.msrb.mxu0 %v9815_v37  ;;  %284 = vmatpush.msrb.mxu1 %v9820_v38  ;;  %v10061_v13 = vld [vmem:[%s15006_s2 + $0x100] sm:$0xff] }
  0x18   :  { %303 = vmatpush.msrb.mxu2 %v9829_v39  ;;  %323 = vmatpush.msrb.mxu3 %v9834_v40  ;;  %v10066_v16 = vld [vmem:[%s15006_s2 + $0x180] sm:$0xff] }
  0x19   :  { %265 = vmatpush.msrb.mxu0 %v9839_v41  ;;  %285 = vmatpush.msrb.mxu1 %v9844_v42 }
  0x1a   :  { %304 = vmatpush.msrb.mxu2 %v9853_v43  ;;  %324 = vmatpush.msrb.mxu3 %v9858_v44 }
  0x1b   :  { %266 = vmatpush.msrb.mxu0 %v9863_v45  ;;  %286 = vmatpush.msrb.mxu1 %v9868_v46 }
  0x1c   :  { %305 = vmatpush.msrb.mxu2 %v9877_v47  ;;  %325 = vmatpush.msrb.mxu3 %v9882_v48 }
  0x1d   :  { %267 = vmatpush.msrb.mxu0 %v9887_v49  ;;  %287 = vmatpush.msrb.mxu1 %v9892_v50 }
  0x1e   :  { %306 = vmatpush.msrb.mxu2 %v9901_v51  ;;  %326 = vmatpush.msrb.mxu3 %v9906_v52 }
  0x1f   :  { %268 = vmatpush.msrb.mxu0 %v9911_v53  ;;  %288 = vmatpush.msrb.mxu1 %v9916_v54 }
  0x20   :  { %307 = vmatpush.msrb.mxu2 %v9925_v55  ;;  %327 = vmatpush.msrb.mxu3 %v9930_v56 }
  0x21   :  { %269 = vmatpush.msrb.mxu0 %v9935_v57  ;;  %289 = vmatpush.msrb.mxu1 %v9940_v58 }
  0x22   :  { %308 = vmatpush.msrb.mxu2 %v9949_v59  ;;  %328 = vmatpush.msrb.mxu3 %v9954_v60 }
  0x23   :  { %270 = vmatpush.msrb.mxu0 %v9959_v61  ;;  %290 = vmatpush.msrb.mxu1 %v9964_v62 }
  0x24   :  { %309 = vmatpush.msrb.mxu2 %v9973_v63  ;;  %329 = vmatpush.msrb.mxu3 %v9978_v0 }
  0x25   :  { %271 = vmatpush.msrb.mxu0 %v9983_v1  ;;  %291 = vmatpush.msrb.mxu1 %v9988_v2 }
  0x26   :  { %310 = vmatpush.msrb.mxu2 %v9997_v3  ;;  %330 = vmatpush.msrb.mxu3 %v10002_v4 }
  0x27   :  { %272 = vmatpush.msrb.mxu0 %v10007_v5  ;;  %292 = vmatpush.msrb.mxu1 %v10012_v6 }
  0x28   :  { %311 = vmatpush.msrb.mxu2 %v10021_v7  ;;  %331 = vmatpush.msrb.mxu3 %v10026_v8 }
  0x29   :  { %273 = vmatpush.msrb.mxu0 %v10031_v9  ;;  %293 = vmatpush.msrb.mxu1 %v10036_v10 }
  0x2a   :  { %312 = vmatpush.msrb.mxu2 %v10047_v11  ;;  %332 = vmatpush.msrb.mxu3 %v10052_v12 }
  0x2b   :  { %338 = vmatpush.msra.mxu0 %v9682_v14  ;;  %358 = vmatpush.msra.mxu1 %v9687_v15 }
  0x2c   :  { %313 = vmatpush.msrb.mxu2 %v10061_v13  ;;  %333 = vmatpush.msrb.mxu3 %v10066_v16 }
  0x2d   :  { %339 = vmatpush.msra.mxu0 %v9697_v17  ;;  %359 = vmatpush.msra.mxu1 %v9702_v18 }
  0x2e   :  { %378 = vmatpush.msra.mxu2 %v9709_v19  ;;  %398 = vmatpush.msra.mxu3 %v9714_v20 }
  0x2f   :  { %340 = vmatpush.msra.mxu0 %v9721_v21  ;;  %360 = vmatpush.msra.mxu1 %v9726_v22 }
  0x30   :  { %379 = vmatpush.msra.mxu2 %v9733_v23  ;;  %399 = vmatpush.msra.mxu3 %v9738_v24 }
  0x31   :  { %341 = vmatpush.msra.mxu0 %v9743_v25  ;;  %361 = vmatpush.msra.mxu1 %v9748_v26 }
  0x32   :  { %380 = vmatpush.msra.mxu2 %v9757_v27  ;;  %400 = vmatpush.msra.mxu3 %v9762_v28 }
  0x33   :  { %342 = vmatpush.msra.mxu0 %v9767_v29  ;;  %362 = vmatpush.msra.mxu1 %v9772_v30 }
  0x34   :  { %381 = vmatpush.msra.mxu2 %v9781_v31  ;;  %401 = vmatpush.msra.mxu3 %v9786_v32 }
  0x35   :  { %343 = vmatpush.msra.mxu0 %v9791_v33  ;;  %363 = vmatpush.msra.mxu1 %v9796_v34 }
  0x36   :  { %382 = vmatpush.msra.mxu2 %v9805_v35  ;;  %402 = vmatpush.msra.mxu3 %v9810_v36 }
  0x37   :  { %344 = vmatpush.msra.mxu0 %v9815_v37  ;;  %364 = vmatpush.msra.mxu1 %v9820_v38 }
  0x38   :  { %383 = vmatpush.msra.mxu2 %v9829_v39  ;;  %403 = vmatpush.msra.mxu3 %v9834_v40 }
  0x39   :  { %345 = vmatpush.msra.mxu0 %v9839_v41  ;;  %365 = vmatpush.msra.mxu1 %v9844_v42 }
  0x3a   :  { %384 = vmatpush.msra.mxu2 %v9853_v43  ;;  %404 = vmatpush.msra.mxu3 %v9858_v44 }
  0x3b   :  { %346 = vmatpush.msra.mxu0 %v9863_v45  ;;  %366 = vmatpush.msra.mxu1 %v9868_v46 }
  0x3c   :  { %385 = vmatpush.msra.mxu2 %v9877_v47  ;;  %405 = vmatpush.msra.mxu3 %v9882_v48 }
  0x3d   :  { %347 = vmatpush.msra.mxu0 %v9887_v49  ;;  %367 = vmatpush.msra.mxu1 %v9892_v50 }
  0x3e   :  { %386 = vmatpush.msra.mxu2 %v9901_v51  ;;  %406 = vmatpush.msra.mxu3 %v9906_v52 }
  0x3f   :  { %348 = vmatpush.msra.mxu0 %v9911_v53  ;;  %368 = vmatpush.msra.mxu1 %v9916_v54 }
  0x40   :  { %387 = vmatpush.msra.mxu2 %v9925_v55  ;;  %407 = vmatpush.msra.mxu3 %v9930_v56 }
  0x41   :  { %349 = vmatpush.msra.mxu0 %v9935_v57  ;;  %369 = vmatpush.msra.mxu1 %v9940_v58 }
  0x42   :  { %388 = vmatpush.msra.mxu2 %v9949_v59  ;;  %408 = vmatpush.msra.mxu3 %v9954_v60 }
  0x43   :  { %350 = vmatpush.msra.mxu0 %v9959_v61  ;;  %370 = vmatpush.msra.mxu1 %v9964_v62 }
  0x44   :  { %389 = vmatpush.msra.mxu2 %v9973_v63  ;;  %409 = vmatpush.msra.mxu3 %v9978_v0 }
  0x45   :  { %351 = vmatpush.msra.mxu0 %v9983_v1  ;;  %371 = vmatpush.msra.mxu1 %v9988_v2 }
  0x46   :  { %390 = vmatpush.msra.mxu2 %v9997_v3  ;;  %410 = vmatpush.msra.mxu3 %v10002_v4 }
  0x47   :  { %352 = vmatpush.msra.mxu0 %v10007_v5  ;;  %372 = vmatpush.msra.mxu1 %v10012_v6 }
  0x48   :  { %391 = vmatpush.msra.mxu2 %v10021_v7  ;;  %411 = vmatpush.msra.mxu3 %v10026_v8 }
  0x49   :  { %353 = vmatpush.msra.mxu0 %v10031_v9  ;;  %373 = vmatpush.msra.mxu1 %v10036_v10 }
  0x4a   :  { %392 = vmatpush.msra.mxu2 %v10047_v11  ;;  %412 = vmatpush.msra.mxu3 %v10052_v12 }
  0x4c   :  { %393 = vmatpush.msra.mxu2 %v10061_v13  ;;  %413 = vmatpush.msra.mxu3 %v10066_v16 }
  0x87   :  { %v10134_v14 = vpop.f32.mrf.mxu0  ;;  %v10136_v15 = vpop.f32.mrf.mxu1 }
  0x88   :  { %v198_v17 = vsel %vm197_vm2, %v10134_v14, 0.0  ;;  %v226_v18 = vmul.f32 %v10134_v14, %v10134_v14  ;;  %v205_v19 = vsel %vm197_vm2, %v10136_v15, 0.0  ;;  %v227_v20 = vmul.f32 %v10136_v15, %v10136_v15 }
  0x89   :  { %v199_v21 = vrot.slane %v198_v17, 4  ;;  %v206_v22 = vrot.slane %v205_v19, 4 }
  0x8a   :  { %v230_v23 = vsel %vm197_vm2, %v226_v18, 0.0  ;;  %v237_v24 = vsel %vm197_vm2, %v227_v20, 0.0 }
  0x8b   :  { %v200_v25 = vadd.f32 %v199_v21, %v198_v17  ;;  %v231_v26 = vrot.slane %v230_v23, 4  ;;  %v207_v27 = vadd.f32 %v206_v22, %v205_v19  ;;  %v238_v28 = vrot.slane %v237_v24, 4 }
  0x8d   :  { %v232_v29 = vadd.f32 %v231_v26, %v230_v23  ;;  %v239_v30 = vadd.f32 %v238_v28, %v237_v24  ;;  %v201_v31 = vrot.slane %v200_v25, 2  ;;  %v208_v32 = vrot.slane %v207_v27, 2 }
  0x8f   :  { %v10148_v33 = vpop.f32.mrf.mxu2  ;;  %v10150_v34 = vpop.f32.mrf.mxu3  ;;  %v233_v35 = vrot.slane %v232_v29, 2  ;;  %v202_v43 = vadd.f32 %v201_v31, %v200_v25  ;;  %v240_v44 = vrot.slane %v239_v30, 2  ;;  %v209_v47 = vadd.f32 %v208_v32, %v207_v27  ;;  %v193_v31 = vld [vmem:[%s15008_s3 + $0x10] sm:$0xff] }
  0x90   :  { %v212_v36 = vsel %vm197_vm2, %v10148_v33, 0.0  ;;  %v228_v37 = vmul.f32 %v10148_v33, %v10148_v33  ;;  %v86_v38 = vpop.f32.mrf.mxu0  ;;  %v99_v39 = vpop.f32.mrf.mxu1  ;;  %v219_v41 = vsel %vm197_vm2, %v10150_v34, 0.0  ;;  %v229_v42 = vmul.f32 %v10150_v34, %v10150_v34 }
  0x91   :  { %v213_v40 = vrot.slane %v212_v36, 4  ;;  %v220_v46 = vrot.slane %v219_v41, 4  ;;  %v203_v51 = vrot.slane %v202_v43, 1  ;;  %v210_v54 = vrot.slane %v209_v47, 1 }
  0x92   :  { %v244_v45 = vsel %vm197_vm2, %v228_v37, 0.0  ;;  %v251_v50 = vsel %vm197_vm2, %v229_v42, 0.0  ;;  %v234_v58 = vadd.f32 %v233_v35, %v232_v29  ;;  %v241_v62 = vadd.f32 %v240_v44, %v239_v30  ;;  %v191_v29 = vld [vmem:[%s15008_s3] sm:$0xff]  ;;  %v192_v30 = vld [vmem:[%s15008_s3 + $0x8] sm:$0xff] }
  0x93   :  { %v214_v48 = vadd.f32 %v213_v40, %v212_v36  ;;  %v245_v49 = vrot.slane %v244_v45, 4  ;;  %v221_v52 = vadd.f32 %v220_v46, %v219_v41  ;;  %v252_v53 = vrot.slane %v251_v50, 4  ;;  %v194_v40 = vld [vmem:[%s15008_s3 + $0x18] sm:$0xff] }
  0x94   :  { %v204_v56 = vadd.f32 %v203_v51, %v202_v43  ;;  %v211_v60 = vadd.f32 %v210_v54, %v209_v47  ;;  %v235_v6 = vrot.slane %v234_v58, 1  ;;  %v242_v8 = vrot.slane %v241_v62, 1  ;;  %v9128_v51 = vld [vmem:[%s15009_s6 + $0x520] sm:$0xf0]  ;;  %v7090_v54 = vld [vmem:[%s15009_s6 + $0x4d0] sm:$0xf] }
  0x95   :  { %v246_v55 = vadd.f32 %v245_v49, %v244_v45  ;;  %v215_v57 = vrot.slane %v214_v48, 2  ;;  %v253_v59 = vadd.f32 %v252_v53, %v251_v50  ;;  %v222_v61 = vrot.slane %v221_v52, 2  ;;  %v7118_v50 = vld [vmem:[%s15009_s6 + $0x508] sm:$0xf] }
  0x96   :  { %274 = vmatmul.f32.vlgmr.msrb.gmra.mxu0 %v204_v56  ;;  %294 = vmatmul.f32.vlgmr.msrb.gmra.mxu1 %v211_v60  ;;  %v236_v13 = vadd.f32 %v235_v6, %v234_v58  ;;  %v243_v16 = vadd.f32 %v242_v8, %v241_v62  ;;  %v6894_v60 = vld [vmem:[%s15009_s6 + $0x348] sm:$0xf]  ;;  %v7062_v62 = vld [vmem:[%s15009_s6 + $0x498] sm:$0xf]  ;;  %v7034_v6 = vld [vmem:[%s15009_s6 + $0x460] sm:$0xf] }
  0x97   :  { %v247_v63 = vrot.slane %v246_v55, 2  ;;  %v112_v0 = vpop.f32.mrf.mxu2  ;;  %v125_v1 = vpop.f32.mrf.mxu3  ;;  %v216_v2 = vadd.f32 %v215_v57, %v214_v48  ;;  %v254_v3 = vrot.slane %v253_v59, 2  ;;  %v223_v4 = vadd.f32 %v222_v61, %v221_v52  ;;  %455 = vmatpush.msrb.mxu0 %v191_v29  ;;  %475 = vmatpush.msrb.mxu1 %v192_v30  ;;  %v9072_v61 = vld [vmem:[%s15009_s6 + $0x360] sm:$0xf0]  ;;  %v196_v8 = vld [vmem:[%s15011_s5] sm:$0x1] }
  0x98   :  { %v7119_v52 = vor.u32 %v9128_v51, %v7118_v50  ;;  %v6586_v50 = vld [vmem:[%s15009_s6 + $0xe0] sm:$0xf]  ;;  %v8995_v51 = vld [vmem:[%s15009_s6 + $0xf8] sm:$0xf0] }
  0x99   :  { %v217_v5 = vrot.slane %v216_v2, 1  ;;  %v224_v7 = vrot.slane %v223_v4, 1  ;;  %v248_v10 = vadd.f32 %v247_v63, %v246_v55  ;;  %v255_v12 = vadd.f32 %v254_v3, %v253_v59  ;;  %v9121_v55 = vld [vmem:[%s15009_s6 + $0x4e8] sm:$0xf0]  ;;  %v195_v59 = vld [vmem:[%s15010_s4] sm:$0x1] }
  0x9a   :  { %v7091_v57 = vor.u32 %v9121_v55, %v7090_v54  ;;  %v9114_v63 = vld [vmem:[%s15009_s6 + $0x4b0] sm:$0xf0]  ;;  %v6866_v3 = vld [vmem:[%s15009_s6 + $0x310] sm:$0xf]  ;;  %v9037_v55 = vld [vmem:[%s15009_s6 + $0x248] sm:$0xf0] }
  0x9b   :  { %v218_v9 = vadd.f32 %v217_v5, %v216_v2  ;;  %v225_v11 = vadd.f32 %v224_v7, %v223_v4  ;;  %v249_v17 = vrot.slane %v248_v10, 1  ;;  %v256_v18 = vrot.slane %v255_v12, 1  ;;  %v9065_v4 = vld [vmem:[%s15009_s6 + $0x328] sm:$0xf0]  ;;  %v9107_v7 = vld [vmem:[%s15009_s6 + $0x478] sm:$0xf0] }
  0x9c   :  { %v6895_v2 = vor.u32 %v9072_v61, %v6894_v60  ;;  %v7063_v5 = vor.u32 %v9114_v63, %v7062_v62  ;;  %v9079_v60 = vld [vmem:[%s15009_s6 + $0x398] sm:$0xf0]  ;;  %v6587_v61 = vor.u32 %v8995_v51, %v6586_v50  ;;  %v9125_v62 = vld [vmem:[%s15009_s6 + $0x50c] sm:$0xf]  ;;  %v7120_v63 = vld [vmem:[%s15009_s6 + $0x524] sm:$0xf0] }
  0x9d   :  { %314 = vmatmul.f32.vlgmr.msrb.gmra.mxu2 %v218_v9  ;;  %334 = vmatmul.f32.vlgmr.msrb.gmra.mxu3 %v225_v11  ;;  %v250_v19 = vadd.f32 %v249_v17, %v248_v10  ;;  %v257_v20 = vadd.f32 %v256_v18, %v255_v12  ;;  %v6670_v10 = vld [vmem:[%s15009_s6 + $0x188] sm:$0xf]  ;;  %v9016_v11 = vld [vmem:[%s15009_s6 + $0x1a0] sm:$0xf0]  ;;  %v6867_v12 = vor.u32 %v9065_v4, %v6866_v3  ;;  %v6726_v3 = vld [vmem:[%s15009_s6 + $0x1f8] sm:$0xf] }
  0x9e   :  { %354 = vmatmul.f32.vlgmr.msra.gmra.mxu0 %v236_v13  ;;  %374 = vmatmul.f32.vlgmr.msra.gmra.mxu1 %v243_v16  ;;  %v6838_v13 = vld [vmem:[%s15009_s6 + $0x2d8] sm:$0xf]  ;;  %v9058_v16 = vld [vmem:[%s15009_s6 + $0x2f0] sm:$0xf0]  ;;  %v7342_v17 = vld [vmem:[%s15009_s6 + $0x6c8] sm:$0xf] }
  0x9f   :  { %495 = vmatpush.msrb.mxu3 %v193_v31  ;;  %538 = vmatpush.msra.mxu0 %v191_v29  ;;  %v9184_v18 = vld [vmem:[%s15009_s6 + $0x6e0] sm:$0xf0]  ;;  %v9051_v29 = vld [vmem:[%s15009_s6 + $0x2b8] sm:$0xf0]  ;;  %v6616_v51 = vld [vmem:[%s15009_s6 + $0x134] sm:$0xf0] }
  0xa0   :  { %558 = vmatpush.msra.mxu1 %v192_v30  ;;  %2061 = vmatpush.bf16.msrb.mxu2 %v7119_v52  ;;  %v7314_v30 = vld [vmem:[%s15009_s6 + $0x690] sm:$0xf]  ;;  %v8999_v50 = vld [vmem:[%s15009_s6 + $0x11c] sm:$0xf] }
  0xa4   :  { %2062 = vmatpush.bf16.msrb.mxu2 %v7091_v57  ;;  %v9163_v57 = vld [vmem:[%s15009_s6 + $0x638] sm:$0xf0] }
  0xa5   :  { %394 = vmatmul.f32.vlgmr.msra.gmra.mxu2 %v250_v19  ;;  %414 = vmatmul.f32.vlgmr.msra.gmra.mxu3 %v257_v20  ;;  %v7035_v19 = vor.u32 %v9107_v7, %v7034_v6  ;;  %v7006_v20 = vld [vmem:[%s15009_s6 + $0x428] sm:$0xf]  ;;  %v9156_v7 = vld [vmem:[%s15009_s6 + $0x600] sm:$0xf0] }
  0xa6   :  { %515 = vmatpush.msra.mxu3 %v194_v40  ;;  %v7230_v6 = vld [vmem:[%s15009_s6 + $0x5e8] sm:$0xf] }
  0xa8   :  { %2063 = vmatpush.bf16.msrb.mxu2 %v7063_v5  ;;  %v9030_v5 = vld [vmem:[%s15009_s6 + $0x210] sm:$0xf0] }
  0xac   :  { %2064 = vmatpush.bf16.msrb.mxu2 %v7035_v19  ;;  %v7202_v19 = vld [vmem:[%s15009_s6 + $0x5b0] sm:$0xf] }
 0x113   :  { %v275_v21 = vpop.f32.mrf.mxu0  ;;  %v295_v22 = vpop.f32.mrf.mxu1 }
 0x114   :  { %v296_v23 = vadd.f32 %v295_v22, %v275_v21  ;;  %v9100_v21 = vld [vmem:[%s15009_s6 + $0x440] sm:$0xf0]  ;;  %v6671_v22 = vor.u32 %v9016_v11, %v6670_v10  ;;  %v6530_v11 = vld [vmem:[%s15009_s6 + $0x70] sm:$0xf] }
 0x11b   :  { %v355_v27 = vpop.f32.mrf.mxu0  ;;  %v375_v28 = vpop.f32.mrf.mxu1 }
 0x11c   :  { %v376_v35 = vadd.f32 %v375_v28, %v355_v27  ;;  %v6810_v27 = vld [vmem:[%s15009_s6 + $0x2a0] sm:$0xf]  ;;  %v7343_v28 = vor.u32 %v9184_v18, %v7342_v17  ;;  %v7231_v17 = vor.u32 %v9156_v7, %v7230_v6  ;;  %v9023_v18 = vld [vmem:[%s15009_s6 + $0x1d8] sm:$0xf0]  ;;  %v9041_v6 = vld [vmem:[%s15009_s6 + $0x26c] sm:$0xf] }
 0x120   :  { %v315_v24 = vpop.f32.mrf.mxu2  ;;  %v335_v26 = vpop.f32.mrf.mxu3 }
 0x121   :  { %v316_v25 = vadd.f32 %v315_v24, %v296_v23  ;;  %v6642_v24 = vld [vmem:[%s15009_s6 + $0x150] sm:$0xf] }
 0x123   :  { %v336_v32 = vadd.f32 %v335_v26, %v316_v25  ;;  %v9009_v25 = vld [vmem:[%s15009_s6 + $0x168] sm:$0xf0]  ;;  %v6839_v26 = vor.u32 %v9058_v16, %v6838_v13  ;;  %v6727_v13 = vor.u32 %v9030_v5, %v6726_v3  ;;  %v6698_v16 = vld [vmem:[%s15009_s6 + $0x1c0] sm:$0xf]  ;;  %v6560_v5 = vld [vmem:[%s15009_s6 + $0xc4] sm:$0xf0] }
 0x125   :  { %v418_v37 = vmul.f32 0.010204081, %v336_v32  ;;  %v7007_v32 = vor.u32 %v9100_v21, %v7006_v20  ;;  %v9149_v20 = vld [vmem:[%s15009_s6 + $0x5c8] sm:$0xf0] }
 0x126   :  { %v9069_v21 = vld [vmem:[%s15009_s6 + $0x34c] sm:$0xf] }
 0x127   :  { %v420_v42 = vmul.f32 %v418_v37, %v418_v37  ;;  %2065 = vmatpush.bf16.msrb.mxu2 %v7007_v32  ;;  %v6868_v32 = vld [vmem:[%s15009_s6 + $0x32c] sm:$0xf0] }
 0x128   :  { %v395_v36 = vpop.f32.mrf.mxu2  ;;  %v415_v39 = vpop.f32.mrf.mxu3 }
 0x129   :  { %v396_v38 = vadd.f32 %v395_v36, %v376_v35  ;;  %v6978_v35 = vld [vmem:[%s15009_s6 + $0x3f0] sm:$0xf]  ;;  %v9093_v36 = vld [vmem:[%s15009_s6 + $0x408] sm:$0xf0] }
 0x12b   :  { %v416_v41 = vadd.f32 %v415_v39, %v396_v38  ;;  %v6614_v38 = vld [vmem:[%s15009_s6 + $0x118] sm:$0xf]  ;;  %v9002_v39 = vld [vmem:[%s15009_s6 + $0x130] sm:$0xf0] }
 0x12d   :  { %v419_v43 = vmul.f32 0.010204081, %v416_v41  ;;  %v6782_v41 = vld [vmem:[%s15009_s6 + $0x268] sm:$0xf] }
 0x12f   :  { %v421_v44 = vsub.f32 %v419_v43, %v420_v42  ;;  %v9044_v43 = vld [vmem:[%s15009_s6 + $0x280] sm:$0xf0] }
 0x130   :  { %v6783_v52 = vor.u32 %v9044_v43, %v6782_v41  ;;  %v6840_v43 = vld [vmem:[%s15009_s6 + $0x2f4] sm:$0xf0] }
 0x131   :  { %v422_v45 = vmax.f32 %v421_v44, 0.0  ;;  %v7286_v44 = vld [vmem:[%s15009_s6 + $0x658] sm:$0xf] }
 0x133   :  { %v423_v46 = vadd.f32 1e-05, %v422_v45  ;;  %v9170_v45 = vld [vmem:[%s15009_s6 + $0x670] sm:$0xf0] }
 0x134   :  { %v7287_v54 = vor.u32 %v9170_v45, %v7286_v44 }
 0x135   :  { %9580 = vrsqrt.f32 %v423_v46  ;;  %vm430_vm4 = vweird.f32 %v423_v46 }
 0x13b   :  { %v9581_v47 = vpop.eup %9580 }
 0x13c   :  { %v425_v48 = vmul.f32 %v9581_v47, %v423_v46  ;;  %vm431_vm3 = vweird.f32 %v9581_v47  ;;  %v6979_v46 = vor.u32 %v9093_v36, %v6978_v35  ;;  %v6474_v36 = vld [vmem:[%s15009_s6] sm:$0xf] }
 0x13d   :  { %vm432_vm5 = vmor %vm430_vm4, %vm431_vm3 }
 0x13e   :  { %v426_v49 = vmul.f32 %v9581_v47, %v425_v48  ;;  %v9086_v48 = vld [vmem:[%s15009_s6 + $0x3d0] sm:$0xf0]  ;;  %2066 = vmatpush.bf16.msrb.mxu2 %v6979_v46 }
 0x13f   :  { %v9006_v46 = vld [vmem:[%s15009_s6 + $0x154] sm:$0xf] }
 0x140   :  { %v427_v53 = vmul.f32 0.5, %v426_v49  ;;  %v6615_v49 = vor.u32 %v9002_v39, %v6614_v38  ;;  %v9013_v39 = vld [vmem:[%s15009_s6 + $0x18c] sm:$0xf] }
 0x142   :  { %v428_v56 = vsub.f32 1.5, %v427_v53  ;;  %v6754_v53 = vld [vmem:[%s15009_s6 + $0x230] sm:$0xf] }
 0x144   :  { %v429_v58 = vmul.f32 %v9581_v47, %v428_v56  ;;  %v7258_v56 = vld [vmem:[%s15009_s6 + $0x620] sm:$0xf] }
 0x145   :  { %v7259_v4 = vor.u32 %v9163_v57, %v7258_v56  ;;  %v6812_v57 = vld [vmem:[%s15009_s6 + $0x2bc] sm:$0xf0] }
 0x146   :  { %v433_v0 = vsel %vm432_vm5, %v9581_v47, %v429_v58  ;;  %v6950_v47 = vld [vmem:[%s15009_s6 + $0x3b8] sm:$0xf] }
 0x147   :  { %v434_v1 = vmul.f32 %v433_v0, %v195_v59  ;;  %v6951_v58 = vor.u32 %v9086_v48, %v6950_v47  ;;  %v6922_v59 = vld [vmem:[%s15009_s6 + $0x380] sm:$0xf]  ;;  %v6558_v0 = vld [vmem:[%s15009_s6 + $0xa8] sm:$0xf]  ;;  %v6644_v47 = vld [vmem:[%s15009_s6 + $0x16c] sm:$0xf0] }
 0x149   :  { %6464 = vmatmul.msk.f32.vlgmr.msrb.gmra.mxu0 %vm58_vm1, %v434_v1  ;;  %6465 = vmatmul.msk.f32.vlgmr.msrb.gmra.mxu1 %vm58_vm1, %v434_v1  ;;  %v435_v9 = vmul.f32 %v434_v1, %v418_v37  ;;  %v6643_v37 = vor.u32 %v9009_v25, %v6642_v24  ;;  %v6502_v24 = vld [vmem:[%s15009_s6 + $0x38] sm:$0xf]  ;;  %v8974_v25 = vld [vmem:[%s15009_s6 + $0x50] sm:$0xf0] }
 0x14a   :  { %6466 = vmatmul.msk.f32.vlgmr.msrb.gmra.mxu3 %vm58_vm1, %v434_v1  ;;  %578 = vmatpush.msrb.mxu0 %v193_v31  ;;  %v9177_v31 = vld [vmem:[%s15009_s6 + $0x6a8] sm:$0xf0]  ;;  %v6503_v35 = vor.u32 %v8974_v25, %v6502_v24  ;;  %v7036_v24 = vld [vmem:[%s15009_s6 + $0x47c] sm:$0xf0] }
 0x14b   :  { %598 = vmatpush.msrb.mxu3 %v194_v40  ;;  %2048 = vmatpush.bf16.msrb.mxu1 %v6895_v2  ;;  %v436_v23 = vsub.f32 %v196_v8, %v435_v9  ;;  %v6811_v40 = vor.u32 %v9051_v29, %v6810_v27  ;;  %v7315_v42 = vor.u32 %v9177_v31, %v7314_v30  ;;  %v7174_v29 = vld [vmem:[%s15009_s6 + $0x578] sm:$0xf]  ;;  %v9142_v30 = vld [vmem:[%s15009_s6 + $0x590] sm:$0xf0] }
 0x14c   :  { %v6755_v2 = vor.u32 %v9037_v55, %v6754_v53  ;;  %2067 = vmatpush.bf16.msrb.mxu2 %v6951_v58  ;;  %v6923_v8 = vor.u32 %v9079_v60, %v6922_v59  ;;  %v7123_v9 = vor.u32 %v9125_v62, %v7120_v63  ;;  %v7203_v27 = vor.u32 %v9149_v20, %v7202_v19  ;;  %v9062_v31 = vld [vmem:[%s15009_s6 + $0x314] sm:$0xf]  ;;  %v8992_v53 = vld [vmem:[%s15009_s6 + $0xe4] sm:$0xf]  ;;  %v7092_v59 = vld [vmem:[%s15009_s6 + $0x4ec] sm:$0xf0] }
 0x14d   :  { %v7175_v38 = vor.u32 %v9142_v30, %v7174_v29  ;;  %v6871_v41 = vor.u32 %v9062_v31, %v6868_v32  ;;  %v9048_v55 = vld [vmem:[%s15009_s6 + $0x2a4] sm:$0xf]  ;;  %v9118_v58 = vld [vmem:[%s15009_s6 + $0x4d4] sm:$0xf]  ;;  %v7146_v62 = vld [vmem:[%s15009_s6 + $0x540] sm:$0xf] }
 0x14e   :  { %v6815_v60 = vor.u32 %v9048_v55, %v6812_v57  ;;  %v9135_v63 = vld [vmem:[%s15009_s6 + $0x558] sm:$0xf0]  ;;  %v6532_v19 = vld [vmem:[%s15009_s6 + $0x8c] sm:$0xf0]  ;;  %v9034_v20 = vld [vmem:[%s15009_s6 + $0x234] sm:$0xf] }
 0x14f   :  { %2049 = vmatpush.bf16.msrb.mxu1 %v6867_v12  ;;  %v8981_v12 = vld [vmem:[%s15009_s6 + $0x88] sm:$0xf0]  ;;  %v8971_v30 = vld [vmem:[%s15009_s6 + $0x3c] sm:$0xf]  ;;  %v6504_v31 = vld [vmem:[%s15009_s6 + $0x54] sm:$0xf0] }
 0x150   :  { %2068 = vmatpush.bf16.msrb.mxu2 %v6923_v8  ;;  %v6784_v8 = vld [vmem:[%s15009_s6 + $0x284] sm:$0xf0]  ;;  %v9027_v32 = vld [vmem:[%s15009_s6 + $0x1fc] sm:$0xf]  ;;  %v6952_v57 = vld [vmem:[%s15009_s6 + $0x3d4] sm:$0xf0] }
 0x151   :  { %6468 = vmatmul.msk.f32.vlgmr.msra.gmra.mxu0 %vm58_vm1, %v436_v23  ;;  %6469 = vmatmul.msk.f32.vlgmr.msra.gmra.mxu1 %vm58_vm1, %v436_v23 }
 0x152   :  { %6467 = vmatmul.msk.f32.vlgmr.msra.gmra.mxu3 %vm58_vm1, %v434_v1  ;;  %2035 = vmatpush.bf16.msra.mxu0 %v6671_v22  ;;  %v8988_v1 = vld [vmem:[%s15009_s6 + $0xc0] sm:$0xf0]  ;;  %v6896_v22 = vld [vmem:[%s15009_s6 + $0x364] sm:$0xf0] }
 0x153   :  { %2050 = vmatpush.bf16.msrb.mxu1 %v6839_v26  ;;  %2074 = vmatpush.bf16.msra.mxu3 %v7343_v28  ;;  %v6559_v10 = vor.u32 %v8988_v1, %v6558_v0  ;;  %v6699_v26 = vor.u32 %v9023_v18, %v6698_v16  ;;  %v6899_v28 = vor.u32 %v9069_v21, %v6896_v22  ;;  %v9181_v0 = vld [vmem:[%s15009_s6 + $0x6cc] sm:$0xf]  ;;  %v7316_v16 = vld [vmem:[%s15009_s6 + $0x6ac] sm:$0xf0]  ;;  %v8978_v18 = vld [vmem:[%s15009_s6 + $0x74] sm:$0xf] }
 0x154   :  { %2113 = vmatpush.bf16.msra.mxu2 %v7123_v9  ;;  %v7147_v1 = vor.u32 %v9135_v63, %v7146_v62  ;;  %v9111_v9 = vld [vmem:[%s15009_s6 + $0x49c] sm:$0xf]  ;;  %v6535_v21 = vor.u32 %v8978_v18, %v6532_v19  ;;  %v6756_v22 = vld [vmem:[%s15009_s6 + $0x24c] sm:$0xf0]  ;;  %v9076_v62 = vld [vmem:[%s15009_s6 + $0x384] sm:$0xf] }
 0x155   :  { %v6759_v25 = vor.u32 %v9034_v20, %v6756_v22  ;;  %v6924_v63 = vld [vmem:[%s15009_s6 + $0x39c] sm:$0xf0]  ;;  %v6678_v20 = vld [vmem:[%s15009_s6 + $0x190] sm:$0xf] }
 0x156   :  { %2036 = vmatpush.bf16.msra.mxu0 %v6643_v37  ;;  %v8967_v37 = vld [vmem:[%s15009_s6 + $0x18] sm:$0xf0] }
 0x157   :  { %2051 = vmatpush.bf16.msrb.mxu1 %v6811_v40  ;;  %2075 = vmatpush.bf16.msra.mxu3 %v7315_v42  ;;  %v6672_v40 = vld [vmem:[%s15009_s6 + $0x1a4] sm:$0xf0]  ;;  %v9055_v42 = vld [vmem:[%s15009_s6 + $0x2dc] sm:$0xf]  ;;  %v6475_v44 = vor.u32 %v8967_v37, %v6474_v36  ;;  %v6728_v36 = vld [vmem:[%s15009_s6 + $0x214] sm:$0xf0] }
 0x158   :  { %v6675_v45 = vor.u32 %v9013_v39, %v6672_v40  ;;  %v6843_v48 = vor.u32 %v9055_v42, %v6840_v43  ;;  %v9097_v37 = vld [vmem:[%s15009_s6 + $0x42c] sm:$0xf]  ;;  %v6731_v39 = vor.u32 %v9027_v32, %v6728_v36  ;;  %v7260_v42 = vld [vmem:[%s15009_s6 + $0x63c] sm:$0xf0]  ;;  %v6874_v36 = vld [vmem:[%s15009_s6 + $0x318] sm:$0xf] }
 0x159   :  { %6470 = vmatmul.msk.f32.vlgmr.msrb.gmra.mxu0 %vm58_vm1, %v436_v23 }
 0x15a   :  { %6471 = vmatmul.msk.f32.vlgmr.msrb.gmra.mxu3 %vm58_vm1, %v436_v23  ;;  %2037 = vmatpush.bf16.msra.mxu0 %v6615_v49  ;;  %v6531_v23 = vor.u32 %v8981_v12, %v6530_v11  ;;  %v6647_v49 = vor.u32 %v9006_v46, %v6644_v47  ;;  %v6787_v11 = vor.u32 %v9041_v6, %v6784_v8  ;;  %v9020_v46 = vld [vmem:[%s15009_s6 + $0x1c4] sm:$0xf] }
 0x15b   :  { %2052 = vmatpush.bf16.msrb.mxu1 %v6783_v52  ;;  %2076 = vmatpush.bf16.msra.mxu3 %v7287_v54  ;;  %v6619_v52 = vor.u32 %v8999_v50, %v6616_v51  ;;  %v6588_v54 = vld [vmem:[%s15009_s6 + $0xfc] sm:$0xf0]  ;;  %v6980_v50 = vld [vmem:[%s15009_s6 + $0x40c] sm:$0xf0] }
 0x15c   :  { %v6591_v56 = vor.u32 %v8992_v53, %v6588_v54  ;;  %v9153_v53 = vld [vmem:[%s15009_s6 + $0x5ec] sm:$0xf]  ;;  %v7232_v54 = vld [vmem:[%s15009_s6 + $0x604] sm:$0xf0] }
 0x15d   :  { %v7235_v55 = vor.u32 %v9153_v53, %v7232_v54  ;;  %v6594_v53 = vld [vmem:[%s15009_s6 + $0xe8] sm:$0xf] }
 0x15e   :  { %2038 = vmatpush.bf16.msra.mxu0 %v6587_v61  ;;  %v7095_v61 = vor.u32 %v9118_v58, %v7092_v59  ;;  %v9146_v59 = vld [vmem:[%s15009_s6 + $0x5b4] sm:$0xf] }
 0x15f   :  { %2053 = vmatpush.bf16.msrb.mxu1 %v6755_v2  ;;  %2077 = vmatpush.bf16.msra.mxu3 %v7259_v4  ;;  %v7344_v2 = vld [vmem:[%s15009_s6 + $0x6e4] sm:$0xf0]  ;;  %v8985_v4 = vld [vmem:[%s15009_s6 + $0xac] sm:$0xf] }
 0x160   :  { %2114 = vmatpush.bf16.msra.mxu2 %v7095_v61  ;;  %v7347_v3 = vor.u32 %v9181_v0, %v7344_v2  ;;  %v6563_v7 = vor.u32 %v8985_v4, %v6560_v5  ;;  %v6927_v0 = vor.u32 %v9076_v62, %v6924_v63  ;;  %v7176_v2 = vld [vmem:[%s15009_s6 + $0x594] sm:$0xf0]  ;;  %v9132_v4 = vld [vmem:[%s15009_s6 + $0x544] sm:$0xf]  ;;  %v7148_v5 = vld [vmem:[%s15009_s6 + $0x55c] sm:$0xf0] }
 0x161   :  { %v7151_v6 = vor.u32 %v9132_v4, %v7148_v5  ;;  %v7098_v62 = vld [vmem:[%s15009_s6 + $0x4d8] sm:$0xf]  ;;  %v9122_v63 = vld [vmem:[%s15009_s6 + $0x4f0] sm:$0xf0]  ;;  %v6566_v4 = vld [vmem:[%s15009_s6 + $0xb0] sm:$0xf] }
 0x162   :  { %2039 = vmatpush.bf16.msra.mxu0 %v6559_v10  ;;  %v7064_v10 = vld [vmem:[%s15009_s6 + $0x4b4] sm:$0xf0]  ;;  %v7099_v5 = vor.u32 %v9122_v63, %v7098_v62  ;;  %v9157_v62 = vld [vmem:[%s15009_s6 + $0x608] sm:$0xf0] }
 0x163   :  { %2054 = vmatpush.bf16.msrb.mxu1 %v6727_v13  ;;  %2078 = vmatpush.bf16.msra.mxu3 %v7231_v17  ;;  %v7067_v12 = vor.u32 %v9111_v9, %v7064_v10  ;;  %v9174_v13 = vld [vmem:[%s15009_s6 + $0x694] sm:$0xf] }
 0x164   :  { %v7319_v17 = vor.u32 %v9174_v13, %v7316_v16 }
 0x165   :  { %2115 = vmatpush.bf16.msra.mxu2 %v7067_v12 }
 0x166   :  { %2040 = vmatpush.bf16.msra.mxu0 %v6531_v23  ;;  %v9104_v23 = vld [vmem:[%s15009_s6 + $0x464] sm:$0xf] }
 0x167   :  { %2055 = vmatpush.bf16.msrb.mxu1 %v6699_v26  ;;  %2079 = vmatpush.bf16.msra.mxu3 %v7203_v27  ;;  %v7039_v26 = vor.u32 %v9104_v23, %v7036_v24  ;;  %v9167_v27 = vld [vmem:[%s15009_s6 + $0x65c] sm:$0xf]  ;;  %v9017_v23 = vld [vmem:[%s15009_s6 + $0x1a8] sm:$0xf0]  ;;  %v6902_v24 = vld [vmem:[%s15009_s6 + $0x350] sm:$0xf] }
 0x169   :  { %2116 = vmatpush.bf16.msra.mxu2 %v7039_v26 }
 0x16a   :  { %2041 = vmatpush.bf16.msra.mxu0 %v6503_v35  ;;  %v6507_v35 = vor.u32 %v8971_v30, %v6504_v31 }
 0x16b   :  { %2100 = vmatpush.bf16.msra.mxu1 %v6899_v28  ;;  %2080 = vmatpush.bf16.msra.mxu3 %v7175_v38  ;;  %v7288_v28 = vld [vmem:[%s15009_s6 + $0x674] sm:$0xf0]  ;;  %v7008_v38 = vld [vmem:[%s15009_s6 + $0x444] sm:$0xf0] }
 0x16c   :  { %v7291_v29 = vor.u32 %v9167_v27, %v7288_v28  ;;  %v7011_v40 = vor.u32 %v9097_v37, %v7008_v38  ;;  %v6679_v27 = vor.u32 %v9017_v23, %v6678_v20  ;;  %v9066_v37 = vld [vmem:[%s15009_s6 + $0x330] sm:$0xf0]  ;;  %v6762_v23 = vld [vmem:[%s15009_s6 + $0x238] sm:$0xf] }
 0x16e   :  { %2042 = vmatpush.bf16.msra.mxu0 %v6475_v44  ;;  %2117 = vmatpush.bf16.msra.mxu2 %v7011_v40  ;;  %v8964_v44 = vld [vmem:[%s15009_s6 + $0x4] sm:$0xf] }
 0x16f   :  { %2101 = vmatpush.bf16.msra.mxu1 %v6871_v41  ;;  %2081 = vmatpush.bf16.msra.mxu3 %v7147_v1  ;;  %v9160_v41 = vld [vmem:[%s15009_s6 + $0x624] sm:$0xf]  ;;  %v9139_v1 = vld [vmem:[%s15009_s6 + $0x57c] sm:$0xf] }
 0x170   :  { %v7263_v43 = vor.u32 %v9160_v41, %v7260_v42  ;;  %v6875_v42 = vor.u32 %v9066_v37, %v6874_v36  ;;  %v8975_v36 = vld [vmem:[%s15009_s6 + $0x58] sm:$0xf0]  ;;  %v6734_v37 = vld [vmem:[%s15009_s6 + $0x200] sm:$0xf] }
 0x172   :  { %2087 = vmatpush.bf16.msrb.mxu0 %v6675_v45  ;;  %v6476_v45 = vld [vmem:[%s15009_s6 + $0x1c] sm:$0xf0] }
 0x173   :  { %2102 = vmatpush.bf16.msra.mxu1 %v6843_v48  ;;  %2126 = vmatpush.bf16.msrb.mxu3 %v7347_v3  ;;  %v6479_v47 = vor.u32 %v8964_v44, %v6476_v45  ;;  %v6700_v48 = vld [vmem:[%s15009_s6 + $0x1dc] sm:$0xf0]  ;;  %v7179_v3 = vor.u32 %v9139_v1, %v7176_v2  ;;  %v9003_v45 = vld [vmem:[%s15009_s6 + $0x138] sm:$0xf0] }
 0x174   :  { %v6703_v51 = vor.u32 %v9020_v46, %v6700_v48  ;;  %v9059_v46 = vld [vmem:[%s15009_s6 + $0x2f8] sm:$0xf0]  ;;  %v7126_v48 = vld [vmem:[%s15009_s6 + $0x510] sm:$0xf] }
 0x176   :  { %2088 = vmatpush.bf16.msrb.mxu0 %v6647_v49  ;;  %v9090_v49 = vld [vmem:[%s15009_s6 + $0x3f4] sm:$0xf] }
 0x177   :  { %2103 = vmatpush.bf16.msra.mxu1 %v6815_v60  ;;  %2127 = vmatpush.bf16.msrb.mxu3 %v7319_v17  ;;  %v7204_v60 = vld [vmem:[%s15009_s6 + $0x5cc] sm:$0xf0] }
 0x178   :  { %v7207_v61 = vor.u32 %v9146_v59, %v7204_v60  ;;  %v9052_v59 = vld [vmem:[%s15009_s6 + $0x2c0] sm:$0xf0] }
 0x17a   :  { %2089 = vmatpush.bf16.msrb.mxu0 %v6619_v52  ;;  %v6983_v52 = vor.u32 %v9090_v49, %v6980_v50  ;;  %v9129_v49 = vld [vmem:[%s15009_s6 + $0x528] sm:$0xf0] }
 0x17b   :  { %2104 = vmatpush.bf16.msra.mxu1 %v6787_v11  ;;  %2128 = vmatpush.bf16.msrb.mxu3 %v7291_v29  ;;  %v6650_v29 = vld [vmem:[%s15009_s6 + $0x158] sm:$0xf] }
 0x17c   :  { %2118 = vmatpush.bf16.msra.mxu2 %v6983_v52 }
 0x17e   :  { %2090 = vmatpush.bf16.msrb.mxu0 %v6591_v56  ;;  %v9083_v56 = vld [vmem:[%s15009_s6 + $0x3bc] sm:$0xf] }
 0x17f   :  { %2105 = vmatpush.bf16.msra.mxu1 %v6759_v25  ;;  %2129 = vmatpush.bf16.msrb.mxu3 %v7263_v43  ;;  %v6955_v58 = vor.u32 %v9083_v56, %v6952_v57  ;;  %v6622_v43 = vld [vmem:[%s15009_s6 + $0x120] sm:$0xf]  ;;  %v7127_v56 = vor.u32 %v9129_v49, %v7126_v48  ;;  %v8996_v57 = vld [vmem:[%s15009_s6 + $0x100] sm:$0xf0]  ;;  %v6706_v48 = vld [vmem:[%s15009_s6 + $0x1c8] sm:$0xf] }
 0x180   :  { %v6595_v1 = vor.u32 %v8996_v57, %v6594_v53  ;;  %v9024_v49 = vld [vmem:[%s15009_s6 + $0x1e0] sm:$0xf0]  ;;  %v6904_v57 = vld [vmem:[%s15009_s6 + $0x36c] sm:$0xf0] }
 0x181   :  { %2119 = vmatpush.bf16.msra.mxu2 %v6955_v58  ;;  %v6818_v58 = vld [vmem:[%s15009_s6 + $0x2a8] sm:$0xf] }
 0x182   :  { %2091 = vmatpush.bf16.msrb.mxu0 %v6563_v7  ;;  %v6819_v2 = vor.u32 %v9052_v59, %v6818_v58  ;;  %v6707_v59 = vor.u32 %v9024_v49, %v6706_v48  ;;  %v6792_v48 = vld [vmem:[%s15009_s6 + $0x28c] sm:$0xf0] }
 0x183   :  { %2106 = vmatpush.bf16.msra.mxu1 %v6731_v39  ;;  %2130 = vmatpush.bf16.msrb.mxu3 %v7235_v55 }
 0x185   :  { %2120 = vmatpush.bf16.msra.mxu2 %v6927_v0 }
 0x186   :  { %2092 = vmatpush.bf16.msrb.mxu0 %v6535_v21 }
 0x187   :  { %2107 = vmatpush.bf16.msra.mxu1 %v6703_v51  ;;  %2131 = vmatpush.bf16.msrb.mxu3 %v7207_v61  ;;  %v6623_v51 = vor.u32 %v9003_v45, %v6622_v43  ;;  %v7266_v43 = vld [vmem:[%s15009_s6 + $0x628] sm:$0xf] }
 0x188   :  { %v6482_v45 = vld [vmem:[%s15009_s6 + $0x8] sm:$0xf] }
 0x18a   :  { %2093 = vmatpush.bf16.msrb.mxu0 %v6507_v35  ;;  %v9010_v35 = vld [vmem:[%s15009_s6 + $0x170] sm:$0xf0] }
 0x18b   :  { %2132 = vmatpush.bf16.msrb.mxu3 %v7179_v3  ;;  %v6651_v41 = vor.u32 %v9010_v35, %v6650_v29  ;;  %v9185_v3 = vld [vmem:[%s15009_s6 + $0x6e8] sm:$0xf0]  ;;  %v6510_v35 = vld [vmem:[%s15009_s6 + $0x40] sm:$0xf] }
 0x18e   :  { %2094 = vmatpush.bf16.msrb.mxu0 %v6479_v47 }
 0x18f   :  { %2133 = vmatpush.bf16.msrb.mxu3 %v7151_v6  ;;  %v8989_v6 = vld [vmem:[%s15009_s6 + $0xc8] sm:$0xf0] }
 0x1c6   :  { %v457_v7 = vpop.f32.mrf.mxu0  ;;  %v477_v8 = vpop.f32.mrf.mxu1 }
 0x1c7   :  { %v603_v9 = vperm.slane %v457_v7, 0  ;;  %v604_v10 = vperm.slane %v477_v8, 0  ;;  %v6790_v7 = vld [vmem:[%s15009_s6 + $0x270] sm:$0xf]  ;;  %v9045_v8 = vld [vmem:[%s15009_s6 + $0x288] sm:$0xf0] }
 0x1c9   :  { %v607_v16 = vmul.f32 %v603_v9, %v10134_v14  ;;  %v608_v17 = vmul.f32 %v604_v10, %v10136_v15  ;;  %v9073_v14 = vld [vmem:[%s15009_s6 + $0x368] sm:$0xf0]  ;;  %v7070_v10 = vld [vmem:[%s15009_s6 + $0x4a0] sm:$0xf] }
 0x1ca   :  { %v6903_v28 = vor.u32 %v9073_v14, %v6902_v24  ;;  %v9038_v24 = vld [vmem:[%s15009_s6 + $0x250] sm:$0xf0]  ;;  %v7042_v14 = vld [vmem:[%s15009_s6 + $0x468] sm:$0xf] }
 0x1cb   :  { %v6763_v29 = vor.u32 %v9038_v24, %v6762_v23  ;;  %v7128_v23 = vld [vmem:[%s15009_s6 + $0x52c] sm:$0xf0] }
 0x1cd   :  { %v497_v11 = vpop.f32.mrf.mxu3 }
 0x1ce   :  { %v540_v12 = vpop.f32.mrf.mxu0  ;;  %v560_v13 = vpop.f32.mrf.mxu1  ;;  %v605_v15 = vperm.slane %v497_v11, 0  ;;  %v9115_v11 = vld [vmem:[%s15009_s6 + $0x4b8] sm:$0xf0] }
 0x1cf   :  { %v611_v18 = vperm.slane %v540_v12, 0  ;;  %v612_v19 = vperm.slane %v560_v13, 0  ;;  %v7071_v20 = vor.u32 %v9115_v11, %v7070_v10 }
 0x1d0   :  { %v609_v39 = vmul.f32 %v605_v15, %v10148_v33  ;;  %v6846_v33 = vld [vmem:[%s15009_s6 + $0x2e0] sm:$0xf]  ;;  %v9108_v15 = vld [vmem:[%s15009_s6 + $0x480] sm:$0xf0] }
 0x1d1   :  { %v615_v21 = vadd.f32 %v611_v18, %v607_v16  ;;  %v616_v22 = vadd.f32 %v612_v19, %v608_v17  ;;  %v6847_v52 = vor.u32 %v9059_v46, %v6846_v33  ;;  %v6567_v16 = vor.u32 %v8989_v6, %v6566_v4  ;;  %v7322_v17 = vld [vmem:[%s15009_s6 + $0x698] sm:$0xf]  ;;  %v9178_v18 = vld [vmem:[%s15009_s6 + $0x6b0] sm:$0xf0]  ;;  %v9063_v4 = vld [vmem:[%s15009_s6 + $0x31c] sm:$0xf] }
 0x1d2   :  { %v6791_v19 = vor.u32 %v9045_v8, %v6790_v7  ;;  %v7210_v8 = vld [vmem:[%s15009_s6 + $0x5b8] sm:$0xf] }
 0x1d3   :  { %v619_v25 = vmax.f32 %v615_v21, 0.0  ;;  %v620_v26 = vmax.f32 %v616_v22, 0.0  ;;  %v6538_v21 = vld [vmem:[%s15009_s6 + $0x78] sm:$0xf]  ;;  %v8982_v22 = vld [vmem:[%s15009_s6 + $0x90] sm:$0xf0] }
 0x1d5   :  { %v10589_v30 = vpack.c.bf16 %v619_v25, %v619_v25  ;;  %v10591_v31 = vpack.c.bf16 %v620_v26, %v620_v26  ;;  %v517_v32 = vpop.f32.mrf.mxu3  ;;  %v7323_v25 = vor.u32 %v9178_v18, %v7322_v17  ;;  %v6539_v26 = vor.u32 %v8982_v22, %v6538_v21  ;;  %v9000_v17 = vld [vmem:[%s15009_s6 + $0x124] sm:$0xf]  ;;  %v6624_v18 = vld [vmem:[%s15009_s6 + $0x13c] sm:$0xf0]  ;;  %v9126_v22 = vld [vmem:[%s15009_s6 + $0x514] sm:$0xf] }
 0x1d6   :  { %v580_v38 = vpop.f32.mrf.mxu0  ;;  %v606_v47 = vperm.slane %v517_v32, 0  ;;  %v7043_v32 = vor.u32 %v9108_v15, %v7042_v14  ;;  %v7182_v14 = vld [vmem:[%s15009_s6 + $0x580] sm:$0xf]  ;;  %v9143_v15 = vld [vmem:[%s15009_s6 + $0x598] sm:$0xf0] }
 0x1d7   :  { %v613_v40 = vperm.slane %v580_v38, 0  ;;  %2043 = vmatmul.bf16.vlgmr.msra.gmra.mxu0 %v10589_v30  ;;  %2056 = vmatmul.bf16.vlgmr.msrb.gmra.mxu1 %v10591_v31  ;;  %v9031_v38 = vld [vmem:[%s15009_s6 + $0x218] sm:$0xf0] }
 0x1d8   :  { %2139 = vmatpush.bf16.msra.mxu0 %v6679_v27  ;;  %2152 = vmatpush.bf16.msrb.mxu1 %v6903_v28  ;;  %v610_v60 = vmul.f32 %v606_v47, %v10150_v34  ;;  %v7350_v34 = vld [vmem:[%s15009_s6 + $0x6d0] sm:$0xf]  ;;  %v7294_v27 = vld [vmem:[%s15009_s6 + $0x660] sm:$0xf]  ;;  %v9171_v28 = vld [vmem:[%s15009_s6 + $0x678] sm:$0xf0]  ;;  %v6735_v33 = vor.u32 %v9031_v38, %v6734_v37 }
 0x1d9   :  { %v617_v44 = vadd.f32 %v613_v40, %v609_v39  ;;  %v7351_v12 = vor.u32 %v9185_v3, %v7350_v34  ;;  %v7014_v39 = vld [vmem:[%s15009_s6 + $0x430] sm:$0xf]  ;;  %v9101_v40 = vld [vmem:[%s15009_s6 + $0x448] sm:$0xf0]  ;;  %v8968_v47 = vld [vmem:[%s15009_s6 + $0x20] sm:$0xf0] }
 0x1da   :  { %v7015_v46 = vor.u32 %v9101_v40, %v7014_v39  ;;  %v6483_v58 = vor.u32 %v8968_v47, %v6482_v45  ;;  %v9007_v34 = vld [vmem:[%s15009_s6 + $0x15c] sm:$0xf]  ;;  %v6652_v3 = vld [vmem:[%s15009_s6 + $0x174] sm:$0xf0]  ;;  %v7154_v39 = vld [vmem:[%s15009_s6 + $0x548] sm:$0xf] }
 0x1db   :  { %v621_v50 = vmax.f32 %v617_v44, 0.0  ;;  %v9164_v44 = vld [vmem:[%s15009_s6 + $0x640] sm:$0xf0]  ;;  %v6655_v10 = vor.u32 %v9007_v34, %v6652_v3  ;;  %v9119_v37 = vld [vmem:[%s15009_s6 + $0x4dc] sm:$0xf] }
 0x1dc   :  { %2140 = vmatpush.bf16.msra.mxu0 %v6651_v41  ;;  %2153 = vmatpush.bf16.msrb.mxu1 %v6875_v42  ;;  %v7295_v41 = vor.u32 %v9171_v28, %v7294_v27  ;;  %v6511_v42 = vor.u32 %v8975_v36, %v6510_v35  ;;  %v7267_v53 = vor.u32 %v9164_v44, %v7266_v43  ;;  %v8993_v27 = vld [vmem:[%s15009_s6 + $0xec] sm:$0xf]  ;;  %v6820_v35 = vld [vmem:[%s15009_s6 + $0x2c4] sm:$0xf0]  ;;  %v7100_v38 = vld [vmem:[%s15009_s6 + $0x4f4] sm:$0xf0] }
 0x1dd   :  { %v10626_v54 = vpack.c.bf16 %v621_v50, %v621_v50  ;;  %v600_v55 = vpop.f32.mrf.mxu3  ;;  %v6986_v50 = vld [vmem:[%s15009_s6 + $0x3f8] sm:$0xf]  ;;  %v7131_v28 = vor.u32 %v9126_v22, %v7128_v23  ;;  %v7183_v36 = vor.u32 %v9143_v15, %v7182_v14  ;;  %v9136_v40 = vld [vmem:[%s15009_s6 + $0x560] sm:$0xf0]  ;;  %v9182_v43 = vld [vmem:[%s15009_s6 + $0x6d4] sm:$0xf] }
 0x1de   :  { %v614_v61 = vperm.slane %v600_v55, 0  ;;  %v6680_v55 = vld [vmem:[%s15009_s6 + $0x1ac] sm:$0xf0]  ;;  %v8986_v45 = vld [vmem:[%s15009_s6 + $0xb4] sm:$0xf]  ;;  %v7155_v49 = vor.u32 %v9136_v40, %v7154_v39 }
 0x1df   :  { %2069 = vmatmul.bf16.vlgmr.msrb.gmra.mxu2 %v10626_v54  ;;  %v7352_v44 = vld [vmem:[%s15009_s6 + $0x6ec] sm:$0xf0]  ;;  %v9042_v47 = vld [vmem:[%s15009_s6 + $0x274] sm:$0xf]  ;;  %v9168_v3 = vld [vmem:[%s15009_s6 + $0x664] sm:$0xf] }
 0x1e0   :  { %v618_v0 = vadd.f32 %v614_v61, %v610_v60  ;;  %2141 = vmatpush.bf16.msra.mxu0 %v6623_v51  ;;  %2154 = vmatpush.bf16.msrb.mxu1 %v6847_v52  ;;  %v9094_v51 = vld [vmem:[%s15009_s6 + $0x410] sm:$0xf0]  ;;  %v7238_v61 = vld [vmem:[%s15009_s6 + $0x5f0] sm:$0xf]  ;;  %v9021_v23 = vld [vmem:[%s15009_s6 + $0x1cc] sm:$0xf] }
 0x1e1   :  { %2165 = vmatpush.bf16.msrb.mxu2 %v7127_v56  ;;  %v9014_v52 = vld [vmem:[%s15009_s6 + $0x194] sm:$0xf]  ;;  %v6987_v60 = vor.u32 %v9094_v51, %v6986_v50  ;;  %v7239_v6 = vor.u32 %v9157_v62, %v7238_v61  ;;  %v9112_v50 = vld [vmem:[%s15009_s6 + $0x4a4] sm:$0xf]  ;;  %v7072_v51 = vld [vmem:[%s15009_s6 + $0x4bc] sm:$0xf0] }
 0x1e2   :  { %v622_v9 = vmax.f32 %v618_v0, 0.0  ;;  %v9070_v56 = vld [vmem:[%s15009_s6 + $0x354] sm:$0xf]  ;;  %v6683_v63 = vor.u32 %v9014_v52, %v6680_v55  ;;  %v7355_v52 = vor.u32 %v9182_v43, %v7352_v44  ;;  %v6795_v55 = vor.u32 %v9042_v47, %v6792_v48  ;;  %v9035_v61 = vld [vmem:[%s15009_s6 + $0x23c] sm:$0xf] }
 0x1e3   :  { %v6907_v0 = vor.u32 %v9070_v56, %v6904_v57  ;;  %v9175_v56 = vld [vmem:[%s15009_s6 + $0x69c] sm:$0xf]  ;;  %v7324_v57 = vld [vmem:[%s15009_s6 + $0x6b4] sm:$0xf0]  ;;  %v9084_v40 = vld [vmem:[%s15009_s6 + $0x3c4] sm:$0xf] }
 0x1e4   :  { %v10669_v13 = vpack.c.bf16 %v622_v9, %v622_v9  ;;  %2142 = vmatpush.bf16.msra.mxu0 %v6595_v1  ;;  %2155 = vmatpush.bf16.msrb.mxu1 %v6819_v2  ;;  %v6958_v1 = vld [vmem:[%s15009_s6 + $0x3c0] sm:$0xf]  ;;  %v9087_v2 = vld [vmem:[%s15009_s6 + $0x3d8] sm:$0xf0]  ;;  %v9150_v9 = vld [vmem:[%s15009_s6 + $0x5d0] sm:$0xf0] }
 0x1e5   :  { %2166 = vmatpush.bf16.msrb.mxu2 %v7099_v5  ;;  %v6876_v5 = vld [vmem:[%s15009_s6 + $0x334] sm:$0xf0]  ;;  %v6959_v7 = vor.u32 %v9087_v2, %v6958_v1  ;;  %v7211_v21 = vor.u32 %v9150_v9, %v7210_v8  ;;  %v7327_v1 = vor.u32 %v9175_v56, %v7324_v57  ;;  %v9028_v8 = vld [vmem:[%s15009_s6 + $0x204] sm:$0xf]  ;;  %v6736_v9 = vld [vmem:[%s15009_s6 + $0x21c] sm:$0xf0] }
 0x1e6   :  { %2082 = vmatmul.bf16.vlgmr.msra.gmra.mxu3 %v10669_v13  ;;  %v6879_v11 = vor.u32 %v9063_v4, %v6876_v5  ;;  %v6764_v62 = vld [vmem:[%s15009_s6 + $0x254] sm:$0xf0]  ;;  %v7296_v4 = vld [vmem:[%s15009_s6 + $0x67c] sm:$0xf0]  ;;  %v8972_v5 = vld [vmem:[%s15009_s6 + $0x44] sm:$0xf] }
 0x1e7   :  { %2178 = vmatpush.bf16.msra.mxu3 %v7351_v12  ;;  %2095 = vmatmul.bf16.vlgmr.msrb.gmra.mxu0 %v10589_v30  ;;  %v6930_v12 = vld [vmem:[%s15009_s6 + $0x388] sm:$0xf]  ;;  %v6767_v34 = vor.u32 %v9035_v61, %v6764_v62  ;;  %v9091_v14 = vld [vmem:[%s15009_s6 + $0x3fc] sm:$0xf]  ;;  %v6988_v15 = vld [vmem:[%s15009_s6 + $0x414] sm:$0xf0] }
 0x1e8   :  { %2108 = vmatmul.bf16.vlgmr.msra.gmra.mxu1 %v10591_v31  ;;  %2143 = vmatpush.bf16.msra.mxu0 %v6567_v16  ;;  %v9080_v16 = vld [vmem:[%s15009_s6 + $0x3a0] sm:$0xf0]  ;;  %v6658_v43 = vld [vmem:[%s15009_s6 + $0x160] sm:$0xf]  ;;  %v9011_v44 = vld [vmem:[%s15009_s6 + $0x178] sm:$0xf0] }
 0x1e9   :  { %2156 = vmatpush.bf16.msrb.mxu1 %v6791_v19  ;;  %2167 = vmatpush.bf16.msrb.mxu2 %v7071_v20  ;;  %v9056_v19 = vld [vmem:[%s15009_s6 + $0x2e4] sm:$0xf]  ;;  %v6848_v20 = vld [vmem:[%s15009_s6 + $0x2fc] sm:$0xf0]  ;;  %v6931_v24 = vor.u32 %v9080_v16, %v6930_v12  ;;  %v7299_v12 = vor.u32 %v9168_v3, %v7296_v4  ;;  %v9161_v16 = vld [vmem:[%s15009_s6 + $0x62c] sm:$0xf] }
 0x1ea   :  { %v9147_v47 = vld [vmem:[%s15009_s6 + $0x5bc] sm:$0xf]  ;;  %v7212_v48 = vld [vmem:[%s15009_s6 + $0x5d4] sm:$0xf0]  ;;  %v9004_v56 = vld [vmem:[%s15009_s6 + $0x140] sm:$0xf0] }
 0x1eb   :  { %2179 = vmatpush.bf16.msra.mxu3 %v7323_v25  ;;  %v6627_v25 = vor.u32 %v9000_v17, %v6624_v18  ;;  %v6739_v18 = vor.u32 %v9028_v8, %v6736_v9  ;;  %v6854_v57 = vld [vmem:[%s15009_s6 + $0x2e8] sm:$0xf]  ;;  %v9130_v61 = vld [vmem:[%s15009_s6 + $0x530] sm:$0xf0]  ;;  %v9140_v62 = vld [vmem:[%s15009_s6 + $0x584] sm:$0xf] }
 0x1ec   :  { %2144 = vmatpush.bf16.msra.mxu0 %v6539_v26  ;;  %v6851_v26 = vor.u32 %v9056_v19, %v6848_v20  ;;  %v7268_v19 = vld [vmem:[%s15009_s6 + $0x644] sm:$0xf0]  ;;  %v8965_v20 = vld [vmem:[%s15009_s6 + $0xc] sm:$0xf]  ;;  %v6602_v3 = vld [vmem:[%s15009_s6 + $0xf0] sm:$0xf] }
 0x1ed   :  { %2157 = vmatpush.bf16.msrb.mxu1 %v6763_v29  ;;  %2168 = vmatpush.bf16.msrb.mxu2 %v7043_v32  ;;  %v6596_v29 = vld [vmem:[%s15009_s6 + $0x104] sm:$0xf0]  ;;  %v9049_v32 = vld [vmem:[%s15009_s6 + $0x2ac] sm:$0xf]  ;;  %v7106_v8 = vld [vmem:[%s15009_s6 + $0x4e0] sm:$0xf] }
 0x1ee   :  { %v8997_v4 = vld [vmem:[%s15009_s6 + $0x108] sm:$0xf0]  ;;  %v9123_v9 = vld [vmem:[%s15009_s6 + $0x4f8] sm:$0xf0] }
 0x1ef   :  { %2180 = vmatpush.bf16.msra.mxu3 %v7295_v41  ;;  %2121 = vmatmul.bf16.vlgmr.msra.gmra.mxu2 %v10626_v54  ;;  %v6599_v41 = vor.u32 %v8993_v27, %v6596_v29  ;;  %v7271_v27 = vor.u32 %v9161_v16, %v7268_v19  ;;  %v9074_v29 = vld [vmem:[%s15009_s6 + $0x370] sm:$0xf0]  ;;  %v7358_v16 = vld [vmem:[%s15009_s6 + $0x6d8] sm:$0xf]  ;;  %v7107_v19 = vor.u32 %v9123_v9, %v7106_v8 }
 0x1f0   :  { %2145 = vmatpush.bf16.msra.mxu0 %v6511_v42  ;;  %v6823_v42 = vor.u32 %v9049_v32, %v6820_v35 }
 0x1f1   :  { %2158 = vmatpush.bf16.msrb.mxu1 %v6735_v33  ;;  %2169 = vmatpush.bf16.msrb.mxu2 %v7015_v46  ;;  %v7103_v33 = vor.u32 %v9119_v37, %v7100_v38  ;;  %v6568_v46 = vld [vmem:[%s15009_s6 + $0xcc] sm:$0xf0]  ;;  %v6991_v38 = vor.u32 %v9091_v14, %v6988_v15  ;;  %v7078_v15 = vld [vmem:[%s15009_s6 + $0x4a8] sm:$0xf] }
 0x1f2   :  { %v7240_v37 = vld [vmem:[%s15009_s6 + $0x60c] sm:$0xf0] }
 0x1f3   :  { %2181 = vmatpush.bf16.msra.mxu3 %v7267_v53  ;;  %v6571_v53 = vor.u32 %v8986_v45, %v6568_v46  ;;  %v9067_v46 = vld [vmem:[%s15009_s6 + $0x338] sm:$0xf0] }
 0x1f4   :  { %2146 = vmatpush.bf16.msra.mxu0 %v6483_v58  ;;  %v8979_v58 = vld [vmem:[%s15009_s6 + $0x7c] sm:$0xf] }
 0x1f5   :  { %2159 = vmatpush.bf16.msrb.mxu1 %v6707_v59  ;;  %2170 = vmatpush.bf16.msrb.mxu2 %v6987_v60  ;;  %v7075_v59 = vor.u32 %v9112_v50, %v7072_v51  ;;  %v6540_v60 = vld [vmem:[%s15009_s6 + $0x94] sm:$0xf0]  ;;  %v6659_v50 = vor.u32 %v9011_v44, %v6658_v43  ;;  %v9077_v51 = vld [vmem:[%s15009_s6 + $0x38c] sm:$0xf]  ;;  %v7302_v43 = vld [vmem:[%s15009_s6 + $0x668] sm:$0xf] }
 0x1f6   :  { %2134 = vmatmul.bf16.vlgmr.msrb.gmra.mxu3 %v10669_v13  ;;  %v6543_v2 = vor.u32 %v8979_v58, %v6540_v60  ;;  %v7215_v58 = vor.u32 %v9147_v47, %v7212_v48  ;;  %v7134_v60 = vld [vmem:[%s15009_s6 + $0x518] sm:$0xf]  ;;  %v9172_v44 = vld [vmem:[%s15009_s6 + $0x680] sm:$0xf0]  ;;  %v6742_v48 = vld [vmem:[%s15009_s6 + $0x208] sm:$0xf] }
 0x1f7   :  { %2147 = vmatmul.bf16.vlgmr.msra.gmra.mxu0 %v10589_v30  ;;  %2182 = vmatpush.bf16.msra.mxu3 %v7239_v6 }
 0x1f8   :  { %2191 = vmatpush.bf16.msrb.mxu0 %v6683_v63  ;;  %2160 = vmatmul.bf16.vlgmr.msrb.gmra.mxu1 %v10591_v31  ;;  %v9105_v63 = vld [vmem:[%s15009_s6 + $0x46c] sm:$0xf] }
 0x1f9   :  { %2204 = vmatpush.bf16.msra.mxu1 %v6907_v0  ;;  %2171 = vmatpush.bf16.msrb.mxu2 %v6959_v7  ;;  %v7044_v0 = vld [vmem:[%s15009_s6 + $0x484] sm:$0xf0]  ;;  %v6512_v7 = vld [vmem:[%s15009_s6 + $0x5c] sm:$0xf0] }
 0x1fa   :  { %v7047_v6 = vor.u32 %v9105_v63, %v7044_v0  ;;  %v6515_v17 = vor.u32 %v8972_v5, %v6512_v7  ;;  %v7184_v63 = vld [vmem:[%s15009_s6 + $0x59c] sm:$0xf0]  ;;  %v6826_v5 = vld [vmem:[%s15009_s6 + $0x2b0] sm:$0xf]  ;;  %v9053_v7 = vld [vmem:[%s15009_s6 + $0x2c8] sm:$0xf0] }
 0x1fb   :  { %2183 = vmatpush.bf16.msra.mxu3 %v7211_v21  ;;  %v6484_v21 = vld [vmem:[%s15009_s6 + $0x24] sm:$0xf0] }
 0x1fc   :  { %2192 = vmatpush.bf16.msrb.mxu0 %v6655_v10  ;;  %v9098_v10 = vld [vmem:[%s15009_s6 + $0x434] sm:$0xf]  ;;  %v6487_v32 = vor.u32 %v8965_v20, %v6484_v21  ;;  %v6574_v20 = vld [vmem:[%s15009_s6 + $0xb8] sm:$0xf] }
 0x1fd   :  { %2205 = vmatpush.bf16.msra.mxu1 %v6879_v11  ;;  %2172 = vmatpush.bf16.msrb.mxu2 %v6931_v24  ;;  %v7016_v11 = vld [vmem:[%s15009_s6 + $0x44c] sm:$0xf0]  ;;  %v6708_v24 = vld [vmem:[%s15009_s6 + $0x1e4] sm:$0xf0]  ;;  %v8990_v21 = vld [vmem:[%s15009_s6 + $0xd0] sm:$0xf0] }
 0x1fe   :  { %v7019_v22 = vor.u32 %v9098_v10, %v7016_v11  ;;  %v6711_v35 = vor.u32 %v9021_v23, %v6708_v24  ;;  %v9133_v10 = vld [vmem:[%s15009_s6 + $0x54c] sm:$0xf]  ;;  %v7156_v11 = vld [vmem:[%s15009_s6 + $0x564] sm:$0xf0]  ;;  %v6798_v23 = vld [vmem:[%s15009_s6 + $0x278] sm:$0xf] }
 0x1ff   :  { %2184 = vmatpush.bf16.msra.mxu3 %v7183_v36  ;;  %v9154_v36 = vld [vmem:[%s15009_s6 + $0x5f4] sm:$0xf] }
 0x200   :  { %2193 = vmatpush.bf16.msrb.mxu0 %v6627_v25  ;;  %2173 = vmatmul.bf16.vlgmr.msrb.gmra.mxu2 %v10626_v54  ;;  %v6686_v25 = vld [vmem:[%s15009_s6 + $0x198] sm:$0xf]  ;;  %v7243_v45 = vor.u32 %v9154_v36, %v7240_v37  ;;  %v9046_v24 = vld [vmem:[%s15009_s6 + $0x290] sm:$0xf0]  ;;  %v6770_v37 = vld [vmem:[%s15009_s6 + $0x240] sm:$0xf] }
 0x201   :  { %2206 = vmatpush.bf16.msra.mxu1 %v6851_v26  ;;  %2217 = vmatpush.bf16.msra.mxu2 %v7131_v28  ;;  %v9018_v26 = vld [vmem:[%s15009_s6 + $0x1b0] sm:$0xf0]  ;;  %v6910_v28 = vld [vmem:[%s15009_s6 + $0x358] sm:$0xf] }
 0x202   :  { %v6687_v39 = vor.u32 %v9018_v26, %v6686_v25  ;;  %v9116_v25 = vld [vmem:[%s15009_s6 + $0x4c0] sm:$0xf0]  ;;  %v6575_v26 = vor.u32 %v8990_v21, %v6574_v20  ;;  %v6884_v21 = vld [vmem:[%s15009_s6 + $0x33c] sm:$0xf0] }
 0x203   :  { %2185 = vmatpush.bf16.msra.mxu3 %v7155_v49  ;;  %v7079_v36 = vor.u32 %v9116_v25, %v7078_v15  ;;  %v9064_v20 = vld [vmem:[%s15009_s6 + $0x324] sm:$0xf] }
 0x204   :  { %2194 = vmatpush.bf16.msrb.mxu0 %v6599_v41  ;;  %v6911_v41 = vor.u32 %v9074_v29, %v6910_v28  ;;  %v9179_v28 = vld [vmem:[%s15009_s6 + $0x6b8] sm:$0xf0]  ;;  %v6799_v29 = vor.u32 %v9046_v24, %v6798_v23  ;;  %v6887_v25 = vor.u32 %v9064_v20, %v6884_v21  ;;  %v8973_v20 = vld [vmem:[%s15009_s6 + $0x4c] sm:$0xf]  ;;  %v6520_v21 = vld [vmem:[%s15009_s6 + $0x64] sm:$0xf0] }
 0x205   :  { %2207 = vmatpush.bf16.msra.mxu1 %v6823_v42  ;;  %2218 = vmatpush.bf16.msra.mxu2 %v7103_v33  ;;  %v6960_v42 = vld [vmem:[%s15009_s6 + $0x3dc] sm:$0xf0]  ;;  %v9151_v23 = vld [vmem:[%s15009_s6 + $0x5d8] sm:$0xf0] }
 0x206   :  { %2186 = vmatmul.bf16.vlgmr.msra.gmra.mxu3 %v10669_v13  ;;  %v6882_v33 = vld [vmem:[%s15009_s6 + $0x320] sm:$0xf]  ;;  %v6963_v49 = vor.u32 %v9084_v40, %v6960_v42  ;;  %v7050_v40 = vld [vmem:[%s15009_s6 + $0x470] sm:$0xf] }
 0x207   :  { %2230 = vmatpush.bf16.msrb.mxu3 %v7355_v52  ;;  %v6932_v52 = vld [vmem:[%s15009_s6 + $0x3a4] sm:$0xf0] }
 0x208   :  { %2195 = vmatpush.bf16.msrb.mxu0 %v6571_v53  ;;  %v6883_v53 = vor.u32 %v9067_v46, %v6882_v33  ;;  %v6935_v0 = vor.u32 %v9077_v51, %v6932_v52  ;;  %v6518_v33 = vld [vmem:[%s15009_s6 + $0x48] sm:$0xf]  ;;  %v8976_v46 = vld [vmem:[%s15009_s6 + $0x60] sm:$0xf0]  ;;  %v7022_v51 = vld [vmem:[%s15009_s6 + $0x438] sm:$0xf] }
 0x209   :  { %2208 = vmatpush.bf16.msra.mxu1 %v6795_v55  ;;  %2219 = vmatpush.bf16.msra.mxu2 %v7075_v59  ;;  %v6630_v55 = vld [vmem:[%s15009_s6 + $0x128] sm:$0xf]  ;;  %v9060_v59 = vld [vmem:[%s15009_s6 + $0x300] sm:$0xf0]  ;;  %v9102_v52 = vld [vmem:[%s15009_s6 + $0x450] sm:$0xf0] }
 0x20b   :  { %2231 = vmatpush.bf16.msrb.mxu3 %v7327_v1  ;;  %v6631_v1 = vor.u32 %v9004_v56, %v6630_v55  ;;  %v7274_v55 = vld [vmem:[%s15009_s6 + $0x630] sm:$0xf]  ;;  %v9165_v56 = vld [vmem:[%s15009_s6 + $0x648] sm:$0xf0] }
 0x20c   :  { %2196 = vmatpush.bf16.msrb.mxu0 %v6543_v2  ;;  %v6855_v2 = vor.u32 %v9060_v59, %v6854_v57  ;;  %v6490_v57 = vld [vmem:[%s15009_s6 + $0x10] sm:$0xf]  ;;  %v8969_v59 = vld [vmem:[%s15009_s6 + $0x28] sm:$0xf0] }
 0x20d   :  { %2209 = vmatpush.bf16.msra.mxu1 %v6767_v34  ;;  %2220 = vmatpush.bf16.msra.mxu2 %v7047_v6  ;;  %v7135_v34 = vor.u32 %v9130_v61, %v7134_v60  ;;  %v7187_v6 = vor.u32 %v9140_v62, %v7184_v63  ;;  %v6714_v60 = vld [vmem:[%s15009_s6 + $0x1d0] sm:$0xf]  ;;  %v9025_v61 = vld [vmem:[%s15009_s6 + $0x1e8] sm:$0xf0]  ;;  %v7023_v62 = vor.u32 %v9102_v52, %v7022_v51  ;;  %v6994_v63 = vld [vmem:[%s15009_s6 + $0x400] sm:$0xf] }
 0x20e   :  { %v6715_v8 = vor.u32 %v9025_v61, %v6714_v60  ;;  %v9137_v51 = vld [vmem:[%s15009_s6 + $0x568] sm:$0xf0]  ;;  %v9043_v61 = vld [vmem:[%s15009_s6 + $0x27c] sm:$0xf] }
 0x20f   :  { %2232 = vmatpush.bf16.msrb.mxu3 %v7299_v12  ;;  %v6603_v12 = vor.u32 %v8997_v4, %v6602_v3  ;;  %v9071_v3 = vld [vmem:[%s15009_s6 + $0x35c] sm:$0xf]  ;;  %v6912_v4 = vld [vmem:[%s15009_s6 + $0x374] sm:$0xf0] }
 0x210   :  { %2197 = vmatpush.bf16.msrb.mxu0 %v6515_v17  ;;  %v9186_v17 = vld [vmem:[%s15009_s6 + $0x6f0] sm:$0xf0] }
 0x211   :  { %2210 = vmatpush.bf16.msra.mxu1 %v6739_v18  ;;  %2221 = vmatpush.bf16.msra.mxu2 %v7019_v22  ;;  %v6827_v18 = vor.u32 %v9053_v7, %v6826_v5  ;;  %v7159_v22 = vor.u32 %v9133_v10, %v7156_v11  ;;  %v7359_v14 = vor.u32 %v9186_v17, %v7358_v16  ;;  %v9158_v7 = vld [vmem:[%s15009_s6 + $0x610] sm:$0xf0]  ;;  %v9008_v16 = vld [vmem:[%s15009_s6 + $0x164] sm:$0xf]  ;;  %v6660_v17 = vld [vmem:[%s15009_s6 + $0x17c] sm:$0xf0] }
 0x212   :  { %v6491_v5 = vor.u32 %v8969_v59, %v6490_v57  ;;  %v6915_v11 = vor.u32 %v9071_v3, %v6912_v4  ;;  %v6663_v24 = vor.u32 %v9008_v16, %v6660_v17  ;;  %v8987_v57 = vld [vmem:[%s15009_s6 + $0xbc] sm:$0xf]  ;;  %v7332_v3 = vld [vmem:[%s15009_s6 + $0x6bc] sm:$0xf0]  ;;  %v9169_v17 = vld [vmem:[%s15009_s6 + $0x66c] sm:$0xf] }
 0x213   :  { %2233 = vmatpush.bf16.msrb.mxu3 %v7271_v27  ;;  %v7330_v27 = vld [vmem:[%s15009_s6 + $0x6a0] sm:$0xf] }
 0x214   :  { %2198 = vmatpush.bf16.msrb.mxu0 %v6487_v32  ;;  %v6546_v32 = vld [vmem:[%s15009_s6 + $0x80] sm:$0xf] }
 0x215   :  { %2211 = vmatpush.bf16.msra.mxu1 %v6711_v35  ;;  %2222 = vmatpush.bf16.msra.mxu2 %v6991_v38  ;;  %v8983_v35 = vld [vmem:[%s15009_s6 + $0x98] sm:$0xf0] }
 0x216   :  { %v9039_v38 = vld [vmem:[%s15009_s6 + $0x258] sm:$0xf0]  ;;  %v6547_v42 = vor.u32 %v8983_v35, %v6546_v32  ;;  %v9057_v32 = vld [vmem:[%s15009_s6 + $0x2ec] sm:$0xf]  ;;  %v6856_v35 = vld [vmem:[%s15009_s6 + $0x304] sm:$0xf0] }
 0x217   :  { %2234 = vmatpush.bf16.msrb.mxu3 %v7243_v45  ;;  %2199 = vmatmul.bf16.vlgmr.msrb.gmra.mxu0 %v10589_v30  ;;  %v6771_v45 = vor.u32 %v9039_v38, %v6770_v37  ;;  %v7136_v37 = vld [vmem:[%s15009_s6 + $0x534] sm:$0xf0]  ;;  %v7190_v38 = vld [vmem:[%s15009_s6 + $0x588] sm:$0xf] }
 0x218   :  { %2243 = vmatpush.bf16.msra.mxu0 %v6687_v39  ;;  %2212 = vmatmul.bf16.vlgmr.msra.gmra.mxu1 %v10591_v31  ;;  %v7331_v39 = vor.u32 %v9179_v28, %v7330_v27  ;;  %v9001_v27 = vld [vmem:[%s15009_s6 + $0x12c] sm:$0xf]  ;;  %v6632_v28 = vld [vmem:[%s15009_s6 + $0x144] sm:$0xf0] }
 0x219   :  { %2256 = vmatpush.bf16.msrb.mxu1 %v6911_v41  ;;  %2223 = vmatpush.bf16.msra.mxu2 %v6963_v49  ;;  %v9109_v41 = vld [vmem:[%s15009_s6 + $0x488] sm:$0xf0]  ;;  %v9032_v49 = vld [vmem:[%s15009_s6 + $0x220] sm:$0xf0] }
 0x21a   :  { %v7051_v47 = vor.u32 %v9109_v41, %v7050_v40  ;;  %v6635_v40 = vor.u32 %v9001_v27, %v6632_v28  ;;  %v9162_v27 = vld [vmem:[%s15009_s6 + $0x634] sm:$0xf]  ;;  %v7276_v28 = vld [vmem:[%s15009_s6 + $0x64c] sm:$0xf0] }
 0x21b   :  { %2235 = vmatpush.bf16.msrb.mxu3 %v7215_v58  ;;  %v6743_v58 = vor.u32 %v9032_v49, %v6742_v48  ;;  %v9120_v48 = vld [vmem:[%s15009_s6 + $0x4e4] sm:$0xf]  ;;  %v7108_v49 = vld [vmem:[%s15009_s6 + $0x4fc] sm:$0xf0] }
 0x21c   :  { %2244 = vmatpush.bf16.msra.mxu0 %v6659_v50  ;;  %v7303_v50 = vor.u32 %v9172_v44, %v7302_v43  ;;  %v8994_v43 = vld [vmem:[%s15009_s6 + $0xf4] sm:$0xf]  ;;  %v6604_v44 = vld [vmem:[%s15009_s6 + $0x10c] sm:$0xf0]  ;;  %v7111_v59 = vor.u32 %v9120_v48, %v7108_v49 }
 0x21d   :  { %2257 = vmatpush.bf16.msrb.mxu1 %v6883_v53  ;;  %2224 = vmatpush.bf16.msra.mxu2 %v6935_v0  ;;  %v6519_v53 = vor.u32 %v8976_v46, %v6518_v33  ;;  %v9015_v0 = vld [vmem:[%s15009_s6 + $0x19c] sm:$0xf]  ;;  %v9050_v46 = vld [vmem:[%s15009_s6 + $0x2b4] sm:$0xf]  ;;  %v6607_v52 = vor.u32 %v8994_v43, %v6604_v44  ;;  %v6996_v43 = vld [vmem:[%s15009_s6 + $0x41c] sm:$0xf0] }
 0x21e   :  { %v6918_v44 = vld [vmem:[%s15009_s6 + $0x360] sm:$0xf] }
 0x21f   :  { %2236 = vmatpush.bf16.msrb.mxu3 %v7187_v6  ;;  %v7246_v6 = vld [vmem:[%s15009_s6 + $0x5f8] sm:$0xf] }
 0x220   :  { %2245 = vmatpush.bf16.msra.mxu0 %v6631_v1  ;;  %2225 = vmatmul.bf16.vlgmr.msra.gmra.mxu2 %v10626_v54  ;;  %v6688_v1 = vld [vmem:[%s15009_s6 + $0x1b4] sm:$0xf0] }
 0x221   :  { %2258 = vmatpush.bf16.msrb.mxu1 %v6855_v2  ;;  %2269 = vmatpush.bf16.msrb.mxu2 %v7135_v34  ;;  %v7275_v2 = vor.u32 %v9165_v56, %v7274_v55  ;;  %v9095_v34 = vld [vmem:[%s15009_s6 + $0x418] sm:$0xf0]  ;;  %v6691_v9 = vor.u32 %v9015_v0, %v6688_v1  ;;  %v7360_v55 = vld [vmem:[%s15009_s6 + $0x6f4] sm:$0xf0]  ;;  %v9113_v0 = vld [vmem:[%s15009_s6 + $0x4ac] sm:$0xf] }
 0x222   :  { %v6995_v10 = vor.u32 %v9095_v34, %v6994_v63  ;;  %v7080_v1 = vld [vmem:[%s15009_s6 + $0x4c4] sm:$0xf0]  ;;  %v9176_v34 = vld [vmem:[%s15009_s6 + $0x6a4] sm:$0xf] }
 0x223   :  { %2237 = vmatpush.bf16.msrb.mxu3 %v7159_v22  ;;  %v7218_v22 = vld [vmem:[%s15009_s6 + $0x5c0] sm:$0xf] }
 0x224   :  { %2246 = vmatpush.bf16.msra.mxu0 %v6603_v12  ;;  %v6966_v12 = vld [vmem:[%s15009_s6 + $0x3c8] sm:$0xf] }
 0x225   :  { %2259 = vmatpush.bf16.msrb.mxu1 %v6827_v18  ;;  %2270 = vmatpush.bf16.msrb.mxu2 %v7107_v19  ;;  %v7247_v18 = vor.u32 %v9158_v7, %v7246_v6  ;;  %v9088_v19 = vld [vmem:[%s15009_s6 + $0x3e0] sm:$0xf0]  ;;  %v6548_v6 = vld [vmem:[%s15009_s6 + $0x9c] sm:$0xf0]  ;;  %v7083_v7 = vor.u32 %v9113_v0, %v7080_v1 }
 0x226   :  { %2238 = vmatmul.bf16.vlgmr.msrb.gmra.mxu3 %v10669_v13  ;;  %v6967_v15 = vor.u32 %v9088_v19, %v6966_v12  ;;  %v7052_v12 = vld [vmem:[%s15009_s6 + $0x48c] sm:$0xf0] }
 0x227   :  { %2282 = vmatpush.bf16.msra.mxu3 %v7359_v14  ;;  %v6938_v14 = vld [vmem:[%s15009_s6 + $0x390] sm:$0xf] }
 0x228   :  { %2247 = vmatpush.bf16.msra.mxu0 %v6575_v26  ;;  %v9081_v26 = vld [vmem:[%s15009_s6 + $0x3a8] sm:$0xf0] }
 0x229   :  { %2260 = vmatpush.bf16.msrb.mxu1 %v6799_v29  ;;  %2271 = vmatpush.bf16.msrb.mxu2 %v7079_v36  ;;  %v7219_v29 = vor.u32 %v9151_v23, %v7218_v22  ;;  %v9127_v36 = vld [vmem:[%s15009_s6 + $0x51c] sm:$0xf]  ;;  %v6939_v41 = vor.u32 %v9081_v26, %v6938_v14  ;;  %v9029_v23 = vld [vmem:[%s15009_s6 + $0x20c] sm:$0xf]  ;;  %v6523_v26 = vor.u32 %v8973_v20, %v6520_v21  ;;  %v6834_v21 = vld [vmem:[%s15009_s6 + $0x2b8] sm:$0xf] }
 0x22b   :  { %2283 = vmatpush.bf16.msra.mxu3 %v7331_v39  ;;  %v9144_v39 = vld [vmem:[%s15009_s6 + $0x5a0] sm:$0xf0] }
 0x22c   :  { %2248 = vmatpush.bf16.msra.mxu0 %v6547_v42  ;;  %v6859_v42 = vor.u32 %v9057_v32, %v6856_v35  ;;  %v7191_v33 = vor.u32 %v9144_v39, %v7190_v38  ;;  %v6492_v35 = vld [vmem:[%s15009_s6 + $0x2c] sm:$0xf0]  ;;  %v9092_v39 = vld [vmem:[%s15009_s6 + $0x404] sm:$0xf] }
 0x22d   :  { %2261 = vmatpush.bf16.msrb.mxu1 %v6771_v45  ;;  %2272 = vmatpush.bf16.msrb.mxu2 %v7051_v47  ;;  %v7139_v45 = vor.u32 %v9127_v36, %v7136_v37  ;;  %v6828_v47 = vld [vmem:[%s15009_s6 + $0x2cc] sm:$0xf0]  ;;  %v9022_v36 = vld [vmem:[%s15009_s6 + $0x1d4] sm:$0xf] }
 0x22e   :  { %v6831_v56 = vor.u32 %v9050_v46, %v6828_v47  ;;  %v6716_v37 = vld [vmem:[%s15009_s6 + $0x1ec] sm:$0xf0]  ;;  %v9155_v46 = vld [vmem:[%s15009_s6 + $0x5fc] sm:$0xf]  ;;  %v7248_v47 = vld [vmem:[%s15009_s6 + $0x614] sm:$0xf0] }
 0x22f   :  { %2284 = vmatpush.bf16.msra.mxu3 %v7303_v50  ;;  %v7162_v50 = vld [vmem:[%s15009_s6 + $0x550] sm:$0xf]  ;;  %v6719_v48 = vor.u32 %v9022_v36, %v6716_v37  ;;  %v8991_v36 = vld [vmem:[%s15009_s6 + $0xd8] sm:$0xf0] }
 0x230   :  { %2249 = vmatpush.bf16.msra.mxu0 %v6519_v53  ;;  %v9183_v53 = vld [vmem:[%s15009_s6 + $0x6dc] sm:$0xf]  ;;  %v7163_v60 = vor.u32 %v9137_v51, %v7162_v50  ;;  %v6999_v50 = vor.u32 %v9092_v39, %v6996_v43  ;;  %v6806_v39 = vld [vmem:[%s15009_s6 + $0x280] sm:$0xf]  ;;  %v9117_v43 = vld [vmem:[%s15009_s6 + $0x4c8] sm:$0xf0] }
 0x231   :  { %2262 = vmatpush.bf16.msrb.mxu1 %v6743_v58  ;;  %2273 = vmatpush.bf16.msrb.mxu2 %v7023_v62  ;;  %v6576_v58 = vld [vmem:[%s15009_s6 + $0xd4] sm:$0xf0]  ;;  %v7363_v63 = vor.u32 %v9183_v53, %v7360_v55  ;;  %v6666_v53 = vld [vmem:[%s15009_s6 + $0x168] sm:$0xf]  ;;  %v9012_v55 = vld [vmem:[%s15009_s6 + $0x180] sm:$0xf0] }
 0x232   :  { %v6800_v62 = vld [vmem:[%s15009_s6 + $0x294] sm:$0xf0] }
 0x233   :  { %2285 = vmatpush.bf16.msra.mxu3 %v7275_v2  ;;  %v6579_v2 = vor.u32 %v8987_v57, %v6576_v58  ;;  %v6803_v4 = vor.u32 %v9043_v61, %v6800_v62  ;;  %v6968_v57 = vld [vmem:[%s15009_s6 + $0x3e4] sm:$0xf0]  ;;  %v7220_v61 = vld [vmem:[%s15009_s6 + $0x5dc] sm:$0xf0]  ;;  %v6667_v62 = vor.u32 %v9012_v55, %v6666_v53 }
 0x234   :  { %2250 = vmatpush.bf16.msra.mxu0 %v6491_v5  ;;  %v8980_v5 = vld [vmem:[%s15009_s6 + $0x84] sm:$0xf]  ;;  %v6890_v58 = vld [vmem:[%s15009_s6 + $0x328] sm:$0xf] }
 0x235   :  { %2263 = vmatpush.bf16.msrb.mxu1 %v6715_v8  ;;  %2274 = vmatpush.bf16.msrb.mxu2 %v6995_v10  ;;  %v9036_v8 = vld [vmem:[%s15009_s6 + $0x244] sm:$0xf]  ;;  %v7335_v10 = vor.u32 %v9176_v34, %v7332_v3  ;;  %v6551_v16 = vor.u32 %v8980_v5, %v6548_v6  ;;  %v6638_v34 = vld [vmem:[%s15009_s6 + $0x130] sm:$0xf]  ;;  %v9005_v3 = vld [vmem:[%s15009_s6 + $0x148] sm:$0xf0] }
 0x236   :  { %v6862_v5 = vld [vmem:[%s15009_s6 + $0x2f0] sm:$0xf]  ;;  %v9061_v6 = vld [vmem:[%s15009_s6 + $0x308] sm:$0xf0] }
 0x237   :  { %2286 = vmatpush.bf16.msra.mxu3 %v7247_v18  ;;  %2251 = vmatmul.bf16.vlgmr.msra.gmra.mxu0 %v10589_v30  ;;  %v7304_v18 = vld [vmem:[%s15009_s6 + $0x684] sm:$0xf0] }
 0x238   :  { %2295 = vmatpush.bf16.msrb.mxu0 %v6691_v9  ;;  %2264 = vmatmul.bf16.vlgmr.msrb.gmra.mxu1 %v10591_v31  ;;  %v6772_v9 = vld [vmem:[%s15009_s6 + $0x25c] sm:$0xf0]  ;;  %v7307_v14 = vor.u32 %v9169_v17, %v7304_v18  ;;  %v6610_v17 = vld [vmem:[%s15009_s6 + $0xf8] sm:$0xf]  ;;  %v8998_v18 = vld [vmem:[%s15009_s6 + $0x110] sm:$0xf0] }
 0x239   :  { %2308 = vmatpush.bf16.msra.mxu1 %v6915_v11  ;;  %2275 = vmatpush.bf16.msrb.mxu2 %v6967_v15  ;;  %v9106_v11 = vld [vmem:[%s15009_s6 + $0x474] sm:$0xf]  ;;  %v6775_v19 = vor.u32 %v9036_v8, %v6772_v9  ;;  %v9099_v15 = vld [vmem:[%s15009_s6 + $0x43c] sm:$0xf]  ;;  %v9141_v9 = vld [vmem:[%s15009_s6 + $0x58c] sm:$0xf] }
 0x23a   :  { %v7055_v22 = vor.u32 %v9106_v11, %v7052_v12  ;;  %v9131_v8 = vld [vmem:[%s15009_s6 + $0x538] sm:$0xf0]  ;;  %v6639_v11 = vor.u32 %v9005_v3, %v6638_v34  ;;  %v7030_v3 = vld [vmem:[%s15009_s6 + $0x440] sm:$0xf] }
 0x23b   :  { %2287 = vmatpush.bf16.msra.mxu3 %v7219_v29  ;;  %v8966_v29 = vld [vmem:[%s15009_s6 + $0x14] sm:$0xf] }
 0x23c   :  { %2296 = vmatpush.bf16.msrb.mxu0 %v6663_v24  ;;  %v6744_v24 = vld [vmem:[%s15009_s6 + $0x224] sm:$0xf0] }
 0x23d   :  { %2309 = vmatpush.bf16.msra.mxu1 %v6887_v25  ;;  %2276 = vmatpush.bf16.msrb.mxu2 %v6939_v41  ;;  %v7024_v25 = vld [vmem:[%s15009_s6 + $0x454] sm:$0xf0]  ;;  %v6747_v32 = vor.u32 %v9029_v23, %v6744_v24  ;;  %v9019_v41 = vld [vmem:[%s15009_s6 + $0x1b8] sm:$0xf0]  ;;  %v7114_v23 = vld [vmem:[%s15009_s6 + $0x4e8] sm:$0xf] }
 0x23e   :  { %v7027_v38 = vor.u32 %v9099_v15, %v7024_v25  ;;  %v9124_v15 = vld [vmem:[%s15009_s6 + $0x500] sm:$0xf0]  ;;  %v9134_v25 = vld [vmem:[%s15009_s6 + $0x554] sm:$0xf] }
 0x23f   :  { %2288 = vmatpush.bf16.msra.mxu3 %v7191_v33  ;;  %v6495_v33 = vor.u32 %v8966_v29, %v6492_v35  ;;  %v9187_v29 = vld [vmem:[%s15009_s6 + $0x6f8] sm:$0xf0]  ;;  %v6582_v35 = vld [vmem:[%s15009_s6 + $0xc0] sm:$0xf]  ;;  %v7115_v37 = vor.u32 %v9124_v15, %v7114_v23 }
 0x240   :  { %2297 = vmatpush.bf16.msrb.mxu0 %v6635_v40  ;;  %2277 = vmatmul.bf16.vlgmr.msrb.gmra.mxu2 %v10626_v54  ;;  %v6694_v40 = vld [vmem:[%s15009_s6 + $0x1a0] sm:$0xf] }
 0x241   :  { %2310 = vmatpush.bf16.msra.mxu1 %v6859_v42  ;;  %2321 = vmatpush.bf16.msra.mxu2 %v7139_v45  ;;  %v7279_v42 = vor.u32 %v9162_v27, %v7276_v28  ;;  %v9075_v45 = vld [vmem:[%s15009_s6 + $0x378] sm:$0xf0]  ;;  %v6695_v49 = vor.u32 %v9019_v41, %v6694_v40  ;;  %v6611_v27 = vor.u32 %v8998_v18, %v6610_v17  ;;  %v7366_v28 = vld [vmem:[%s15009_s6 + $0x6e0] sm:$0xf]  ;;  %v9026_v17 = vld [vmem:[%s15009_s6 + $0x1f0] sm:$0xf0] }
 0x242   :  { %v6919_v51 = vor.u32 %v9075_v45, %v6918_v44  ;;  %v9047_v40 = vld [vmem:[%s15009_s6 + $0x298] sm:$0xf0]  ;;  %v7367_v41 = vor.u32 %v9187_v29, %v7366_v28  ;;  %v6583_v44 = vor.u32 %v8991_v36, %v6582_v35  ;;  %v7338_v45 = vld [vmem:[%s15009_s6 + $0x6a8] sm:$0xf]  ;;  %v7254_v15 = vld [vmem:[%s15009_s6 + $0x600] sm:$0xf] }
 0x243   :  { %2289 = vmatpush.bf16.msra.mxu3 %v7163_v60  ;;  %v9148_v60 = vld [vmem:[%s15009_s6 + $0x5c4] sm:$0xf]  ;;  %v11549_v28 = vld [vmem:[%s15012_s7 + $0x78] sm:$0xff]  ;;  %v6974_v35 = vld [vmem:[%s15009_s6 + $0x3d0] sm:$0xf] }
 0x244   :  { %2298 = vmatpush.bf16.msrb.mxu0 %v6607_v52  ;;  %v9085_v52 = vld [vmem:[%s15009_s6 + $0x3cc] sm:$0xf] }
 0x245   :  { %2311 = vmatpush.bf16.msra.mxu1 %v6831_v56  ;;  %2322 = vmatpush.bf16.msra.mxu2 %v7111_v59  ;;  %v7251_v56 = vor.u32 %v9155_v46, %v7248_v47  ;;  %v9068_v59 = vld [vmem:[%s15009_s6 + $0x340] sm:$0xf0]  ;;  %v6971_v0 = vor.u32 %v9085_v52, %v6968_v57  ;;  %v6807_v46 = vor.u32 %v9047_v40, %v6806_v39  ;;  %v6554_v47 = vld [vmem:[%s15009_s6 + $0x88] sm:$0xf]  ;;  %v9110_v57 = vld [vmem:[%s15009_s6 + $0x490] sm:$0xf0] }
 0x246   :  { %2290 = vmatmul.bf16.vlgmr.msra.gmra.mxu3 %v10669_v13  ;;  %v6891_v1 = vor.u32 %v9068_v59, %v6890_v58  ;;  %v7310_v59 = vld [vmem:[%s15009_s6 + $0x670] sm:$0xf]  ;;  %v9089_v36 = vld [vmem:[%s15009_s6 + $0x3e8] sm:$0xf0]  ;;  %v7226_v39 = vld [vmem:[%s15009_s6 + $0x5c8] sm:$0xf] }
 0x247   :  { %2334 = vmatpush.bf16.msrb.mxu3 %v7363_v63  ;;  %v9078_v63 = vld [vmem:[%s15009_s6 + $0x394] sm:$0xf]  ;;  %v9152_v40 = vld [vmem:[%s15009_s6 + $0x5e0] sm:$0xf0] }
 0x248   :  { %2299 = vmatpush.bf16.msrb.mxu0 %v6579_v2  ;;  %v6940_v2 = vld [vmem:[%s15009_s6 + $0x3ac] sm:$0xf0] }
 0x249   :  { %2312 = vmatpush.bf16.msra.mxu1 %v6803_v4  ;;  %2323 = vmatpush.bf16.msra.mxu2 %v7083_v7  ;;  %v7223_v4 = vor.u32 %v9148_v60, %v7220_v61  ;;  %v7142_v7 = vld [vmem:[%s15009_s6 + $0x520] sm:$0xf]  ;;  %v6943_v12 = vor.u32 %v9078_v63, %v6940_v2  ;;  %v9173_v60 = vld [vmem:[%s15009_s6 + $0x688] sm:$0xf0] }
 0x24a   :  { %v8977_v63 = vld [vmem:[%s15009_s6 + $0x68] sm:$0xf0]  ;;  %v7311_v34 = vor.u32 %v9173_v60, %v7310_v59  ;;  %v11633_v59 = vld [vmem:[%s15012_s7 + $0xd8] sm:$0xff] }
 0x24b   :  { %2335 = vmatpush.bf16.msrb.mxu3 %v7335_v10  ;;  %v7192_v10 = vld [vmem:[%s15009_s6 + $0x5a4] sm:$0xf0]  ;;  %v9033_v2 = vld [vmem:[%s15009_s6 + $0x228] sm:$0xf0]  ;;  %v7170_v60 = vld [vmem:[%s15009_s6 + $0x558] sm:$0xf] }
 0x24c   :  { %2300 = vmatpush.bf16.msrb.mxu0 %v6551_v16  ;;  %v6863_v16 = vor.u32 %v9061_v6, %v6862_v5  ;;  %v7195_v20 = vor.u32 %v9141_v9, %v7192_v10  ;;  %v7282_v6 = vld [vmem:[%s15009_s6 + $0x638] sm:$0xf] }
 0x24d   :  { %2313 = vmatpush.bf16.msra.mxu1 %v6775_v19  ;;  %2324 = vmatpush.bf16.msra.mxu2 %v7055_v22  ;;  %v7143_v19 = vor.u32 %v9131_v8, %v7142_v7  ;;  %v9054_v22 = vld [vmem:[%s15009_s6 + $0x2d0] sm:$0xf0]  ;;  %v6498_v10 = vld [vmem:[%s15009_s6 + $0x18] sm:$0xf] }
 0x24e   :  { %v9166_v7 = vld [vmem:[%s15009_s6 + $0x650] sm:$0xf0] }
 0x24f   :  { %2336 = vmatpush.bf16.msrb.mxu3 %v7307_v14 }
 0x250   :  { %2301 = vmatpush.bf16.msrb.mxu0 %v6523_v26  ;;  %v7164_v26 = vld [vmem:[%s15009_s6 + $0x56c] sm:$0xf0] }
 0x251   :  { %2314 = vmatpush.bf16.msra.mxu1 %v6747_v32  ;;  %2325 = vmatpush.bf16.msra.mxu2 %v7027_v38  ;;  %v6835_v32 = vor.u32 %v9054_v22, %v6834_v21  ;;  %v7167_v38 = vor.u32 %v9134_v25, %v7164_v26  ;;  %v9096_v21 = vld [vmem:[%s15009_s6 + $0x420] sm:$0xf0]  ;;  %v9159_v25 = vld [vmem:[%s15009_s6 + $0x618] sm:$0xf0] }
 0x252   :  { %v7255_v29 = vor.u32 %v9159_v25, %v7254_v15  ;;  %v11743_v25 = vld [vmem:[%s15012_s7 + $0x1e8] sm:$0xff] }
 0x253   :  { %2337 = vmatpush.bf16.msrb.mxu3 %v7279_v42  ;;  %v7086_v42 = vld [vmem:[%s15009_s6 + $0x4b0] sm:$0xf]  ;;  %15056 = vst [vmem:[#allocation5_spill] sm:$0xff] %v11743_v25 }
 0x254   :  { %2302 = vmatpush.bf16.msrb.mxu0 %v6495_v33  ;;  %v11425_v24 = vpop.f32.mrf.mxu0  ;;  %v11427_v14 = vpop.f32.mrf.mxu1  ;;  %v9180_v33 = vld [vmem:[%s15009_s6 + $0x6c0] sm:$0xf0] }
 0x255   :  { %2315 = vmatpush.bf16.msra.mxu1 %v6719_v48  ;;  %2326 = vmatpush.bf16.msra.mxu2 %v6999_v50  ;;  %v8984_v48 = vld [vmem:[%s15009_s6 + $0xa0] sm:$0xf0]  ;;  %v6778_v50 = vld [vmem:[%s15009_s6 + $0x248] sm:$0xf]  ;;  %v7339_v55 = vor.u32 %v9180_v33, %v7338_v45  ;;  %v7227_v33 = vor.u32 %v9152_v40, %v7226_v39 }
 0x256   :  { %v6555_v58 = vor.u32 %v8984_v48, %v6554_v47  ;;  %v11586_v45 = vld [vmem:[%s15012_s7 + $0x68] sm:$0xff]  ;;  %v9082_v47 = vld [vmem:[%s15009_s6 + $0x3b0] sm:$0xf0] }
 0x257   :  { %2338 = vmatpush.bf16.msrb.mxu3 %v7251_v56  ;;  %2303 = vmatmul.bf16.vlgmr.msrb.gmra.mxu0 %v10589_v30  ;;  %v7058_v56 = vld [vmem:[%s15009_s6 + $0x478] sm:$0xf]  ;;  %v11773_v39 = vld [vmem:[%s15012_s7 + $0xa8] sm:$0xff] }
 0x258   :  { %2347 = vmatpush.bf16.msra.mxu0 %v6695_v49  ;;  %2316 = vmatmul.bf16.vlgmr.msra.gmra.mxu1 %v10591_v31  ;;  %v7087_v49 = vor.u32 %v9117_v43, %v7086_v42  ;;  %v11574_v42 = vld [vmem:[%s15012_s7 + $0x70] sm:$0xff] }
 0x259   :  { %2360 = vmatpush.bf16.msrb.mxu1 %v6919_v51  ;;  %2327 = vmatpush.bf16.msra.mxu2 %v6971_v0  ;;  %v9040_v51 = vld [vmem:[%s15009_s6 + $0x260] sm:$0xf0]  ;;  %v7059_v0 = vor.u32 %v9110_v57, %v7058_v56  ;;  %v11580_v43 = vld [vmem:[%s15012_s7 + $0xf0] sm:$0xff] }
 0x25a   :  { %v6779_v61 = vor.u32 %v9040_v51, %v6778_v50  ;;  %v7198_v50 = vld [vmem:[%s15009_s6 + $0x590] sm:$0xf]  ;;  %v9145_v51 = vld [vmem:[%s15009_s6 + $0x5a8] sm:$0xf0] }
 0x25b   :  { %2339 = vmatpush.bf16.msrb.mxu3 %v7223_v4  ;;  %v9103_v4 = vld [vmem:[%s15009_s6 + $0x458] sm:$0xf0]  ;;  %v7199_v56 = vor.u32 %v9145_v51, %v7198_v50  ;;  %v11816_v50 = vld [vmem:[%s15012_s7 + $0x1d0] sm:$0xff] }
 0x25c   :  { %2348 = vmatpush.bf16.msra.mxu0 %v6667_v62  ;;  %v2046_v52 = vpop.f32.mrf.mxu0  ;;  %v2059_v53 = vpop.f32.mrf.mxu1  ;;  %v6526_v62 = vld [vmem:[%s15009_s6 + $0x50] sm:$0xf]  ;;  %15059 = vst [vmem:[#allocation8_spill] sm:$0xff] %v11816_v50  ;;  %v11821_v51 = vld [vmem:[%s15012_s7 + $0x98] sm:$0xff] }
 0x25d   :  { %2361 = vmatpush.bf16.msrb.mxu1 %v6891_v1  ;;  %2328 = vmatpush.bf16.msra.mxu2 %v6943_v12  ;;  %v6750_v1 = vld [vmem:[%s15009_s6 + $0x210] sm:$0xf]  ;;  %v6527_v5 = vor.u32 %v8977_v63, %v6526_v62  ;;  %v7031_v12 = vor.u32 %v9103_v4, %v7030_v3  ;;  %v11619_v53 = vld [vmem:[%s15012_s7 + $0xe0] sm:$0xff]  ;;  %v11664_v3 = vld [vmem:[%s15012_s7 + $0x48] sm:$0xff] }
 0x25e   :  { %v6751_v9 = vor.u32 %v9033_v2, %v6750_v1  ;;  %v11645_v63 = vld [vmem:[%s15012_s7 + $0x50] sm:$0xff] }
 0x25f   :  { %2340 = vmatpush.bf16.msrb.mxu3 %v7195_v20  ;;  %v7002_v20 = vld [vmem:[%s15009_s6 + $0x408] sm:$0xf]  ;;  %v11656_v1 = vld [vmem:[%s15012_s7 + $0xd0] sm:$0xff] }
 0x260   :  { %2349 = vmatpush.bf16.msra.mxu0 %v6639_v11  ;;  %2329 = vmatmul.bf16.vlgmr.msra.gmra.mxu2 %v10626_v54  ;;  %v8970_v11 = vld [vmem:[%s15009_s6 + $0x30] sm:$0xf0] }
 0x261   :  { %2362 = vmatpush.bf16.msrb.mxu1 %v6863_v16  ;;  %2373 = vmatpush.bf16.msrb.mxu2 %v7143_v19  ;;  %v6722_v16 = vld [vmem:[%s15009_s6 + $0x1d8] sm:$0xf]  ;;  %v7283_v19 = vor.u32 %v9166_v7, %v7282_v6  ;;  %v6499_v23 = vor.u32 %v8970_v11, %v6498_v10  ;;  %v11677_v7 = vld [vmem:[%s15012_s7 + $0xc8] sm:$0xff] }
 0x262   :  { %v2070_v8 = vpop.f32.mrf.mxu2  ;;  %v6723_v26 = vor.u32 %v9026_v17, %v6722_v16  ;;  %v11704_v11 = vld [vmem:[%s15012_s7 + $0x168] sm:$0xff]  ;;  %v11710_v16 = vld [vmem:[%s15012_s7 + $0x38] sm:$0xff] }
 0x263   :  { %2341 = vmatpush.bf16.msrb.mxu3 %v7167_v38 }
 0x264   :  { %2350 = vmatpush.bf16.msra.mxu0 %v6611_v27  ;;  %v11530_v18 = vpop.f32.mrf.mxu0  ;;  %v7003_v27 = vor.u32 %v9096_v21, %v7002_v20 }
 0x265   :  { %2363 = vmatpush.bf16.msrb.mxu1 %v6835_v32  ;;  %2374 = vmatpush.bf16.msrb.mxu2 %v7115_v37  ;;  %v11538_v22 = vpop.f32.mrf.mxu1  ;;  %v11554_v32 = vld [vmem:[%s15012_s7 + $0xf8] sm:$0xff]  ;;  %v2058_v37 = vadd.f32 %v11427_v14, %v11425_v24  ;;  %v6975_v14 = vor.u32 %v9089_v36, %v6974_v35 }
 0x266   :  { %2342 = vmatmul.bf16.vlgmr.msrb.gmra.mxu3 %v10669_v13  ;;  %v2110_v10 = vadd.f32 %v11538_v22, %v11530_v18  ;;  %v11717_v18 = vld [vmem:[%s15012_s7 + $0x1f0] sm:$0xff]  ;;  %v11760_v35 = vld [vmem:[%s15012_s7 + $0x158] sm:$0xff] }
 0x267   :  { %2386 = vmatpush.bf16.msra.mxu3 %v7367_v41  ;;  %v2071_v24 = vadd.f32 %v2070_v8, %v2058_v37  ;;  %v11685_v8 = vld [vmem:[%s15012_s7 + $0x40] sm:$0xff]  ;;  %15055 = vst [vmem:[#allocation4_spill] sm:$0xff] %v11717_v18  ;;  %v11728_v22 = vld [vmem:[%s15012_s7 + $0x30] sm:$0xff] }
 0x268   :  { %2351 = vmatpush.bf16.msra.mxu0 %v6583_v44 }
 0x269   :  { %2364 = vmatpush.bf16.msrb.mxu1 %v6807_v46  ;;  %2375 = vmatpush.bf16.msrb.mxu2 %v7087_v49  ;;  %v2083_v38 = vpop.f32.mrf.mxu3  ;;  %v6946_v46 = vld [vmem:[%s15009_s6 + $0x398] sm:$0xf]  ;;  %v11601_v49 = vld [vmem:[%s15012_s7 + $0xe8] sm:$0xff] }
 0x26a   :  { %v2072_v41 = vpop.f32.mrf.mxu2  ;;  %v11594_v48 = vadd.f32 %v2083_v38, %v2071_v24  ;;  %v6947_v52 = vor.u32 %v9082_v47, %v6946_v46  ;;  %v11768_v38 = vld [vmem:[%s15012_s7 + $0x1e0] sm:$0xff]  ;;  %v11786_v24 = vld [vmem:[%s15012_s7 + $0x150] sm:$0xff]  ;;  %v11805_v47 = vld [vmem:[%s15012_s7 + $0x18] sm:$0xff] }
 0x26b   :  { %2387 = vmatpush.bf16.msra.mxu3 %v7339_v55  ;;  %v11625_v55 = vld [vmem:[%s15012_s7 + $0x58] sm:$0xff]  ;;  %15057 = vst [vmem:[#allocation6_spill] sm:$0xff] %v11768_v38  ;;  %v11781_v41 = vld [vmem:[%s15012_s7 + $0x20] sm:$0xff] }
 0x26c   :  { %2352 = vmatpush.bf16.msra.mxu0 %v6555_v58  ;;  %v2098_v44 = vpop.f32.mrf.mxu0  ;;  %15053 = vst [vmem:[#allocation2_spill] sm:$0xff] %v11594_v48  ;;  %v2517_v57 = vsel %vm197_vm2, %v11594_v48, 0.0 }
 0x26d   :  { %2365 = vmatpush.bf16.msrb.mxu1 %v6779_v61  ;;  %2376 = vmatpush.bf16.msrb.mxu2 %v7059_v0  ;;  %v9138_v61 = vld [vmem:[%s15009_s6 + $0x570] sm:$0xf0]  ;;  %v11650_v0 = vld [vmem:[%s15012_s7 + $0x178] sm:$0xff]  ;;  %v2518_v2 = vrot.slane %v2517_v57, 4  ;;  %v11797_v44 = vld [vmem:[%s15012_s7 + $0xa0] sm:$0xff] }
 0x26e   :  { %v7171_v4 = vor.u32 %v9138_v61, %v7170_v60  ;;  %v11840_v61 = vld [vmem:[%s15012_s7 + $0x1c8] sm:$0xff] }
 0x26f   :  { %2388 = vmatpush.bf16.msra.mxu3 %v7311_v34  ;;  %15060 = vst [vmem:[#allocation9_spill] sm:$0xff] %v11840_v61 }
 0x270   :  { %2353 = vmatpush.bf16.msra.mxu0 %v6527_v5  ;;  %v11669_v5 = vld [vmem:[%s15012_s7 + $0x170] sm:$0xff] }
 0x271   :  { %2366 = vmatpush.bf16.msrb.mxu1 %v6751_v9  ;;  %2377 = vmatpush.bf16.msrb.mxu2 %v7031_v12  ;;  %v2085_v58 = vpop.f32.mrf.mxu3  ;;  %v11690_v9 = vld [vmem:[%s15012_s7 + $0x1f8] sm:$0xff]  ;;  %v2519_v12 = vadd.f32 %v2518_v2, %v2517_v57  ;;  %v11829_v57 = vld [vmem:[%s15012_s7 + $0x10] sm:$0xff] }
 0x272   :  { %v2122_v62 = vpop.f32.mrf.mxu2  ;;  %15054 = vst [vmem:[#allocation3_spill] sm:$0xff] %v11690_v9  ;;  %v11834_v58 = vld [vmem:[%s15012_s7 + $0x140] sm:$0xff] }
 0x273   :  { %2389 = vmatpush.bf16.msra.mxu3 %v7283_v19  ;;  %v2123_v17 = vadd.f32 %v2122_v62, %v2110_v10  ;;  %v11722_v19 = vld [vmem:[%s15012_s7 + $0xb8] sm:$0xff]  ;;  %v11845_v62 = vld [vmem:[%s15012_s7 + $0x90] sm:$0xff] }
 0x274   :  { %2354 = vmatpush.bf16.msra.mxu0 %v6499_v23  ;;  %v11659_v34 = vpop.f32.mrf.mxu0  ;;  %v11734_v23 = vld [vmem:[%s15012_s7 + $0x160] sm:$0xff] }
 0x275   :  { %2367 = vmatpush.bf16.msrb.mxu1 %v6723_v26  ;;  %2378 = vmatpush.bf16.msrb.mxu2 %v7003_v27  ;;  %v11748_v26 = vld [vmem:[%s15012_s7 + $0xb0] sm:$0xff]  ;;  %v2520_v27 = vrot.slane %v2519_v12, 2 }
 0x277   :  { %2390 = vmatpush.bf16.msra.mxu3 %v7255_v29  ;;  %2355 = vmatmul.bf16.vlgmr.msra.gmra.mxu0 %v10589_v30  ;;  %v2111_v30 = vpop.f32.mrf.mxu1 }
 0x278   :  { %2622 = vmatpush.msrb.mxu0 %v11549_v28  ;;  %2368 = vmatmul.bf16.vlgmr.msrb.gmra.mxu1 %v10591_v31  ;;  %v11613_v31 = vld [vmem:[%s15012_s7 + $0x60] sm:$0xff]  ;;  %v11810_v30 = vld [vmem:[%s15012_s7 + $0x148] sm:$0xff] }
 0x279   :  { %2642 = vmatpush.msra.mxu1 %v11554_v32  ;;  %2379 = vmatpush.bf16.msrb.mxu2 %v6975_v14  ;;  %v2135_v20 = vpop.f32.mrf.mxu3  ;;  %v11792_v14 = vld [vmem:[%s15012_s7 + $0x1d8] sm:$0xff] }
 0x27a   :  { %2623 = vmatpush.msrb.mxu0 %v11574_v42  ;;  %v2124_v21 = vpop.f32.mrf.mxu2  ;;  %v11736_v15 = vadd.f32 %v2135_v20, %v2123_v17  ;;  %15058 = vst [vmem:[#allocation7_spill] sm:$0xff] %v11792_v14  ;;  %v11864_v17 = vld [vmem:[%s15012_s7 + $0x1c0] sm:$0xff]  ;;  %v11869_v20 = vld [vmem:[%s15012_s7 + $0x88] sm:$0xff] }
 0x27b   :  { %2643 = vmatpush.msra.mxu1 %v11580_v43  ;;  %2391 = vmatpush.bf16.msra.mxu3 %v7227_v33  ;;  %v2521_v33 = vadd.f32 %v2520_v27, %v2519_v12  ;;  %v11858_v12 = vld [vmem:[%s15012_s7 + $0x138] sm:$0xff]  ;;  %15061 = vst [vmem:[#allocation10_spill] sm:$0xff] %v11864_v17  ;;  %v11877_v21 = vld [vmem:[%s15012_s7] sm:$0xff] }
 0x27c   :  { %2624 = vmatpush.msrb.mxu0 %v11586_v45  ;;  %v2150_v29 = vpop.f32.mrf.mxu0  ;;  %v2524_v36 = vsel %vm197_vm2, %v11736_v15, 0.0 }
 0x27d   :  { %2644 = vmatpush.msra.mxu1 %v11601_v49  ;;  %2380 = vmatpush.bf16.msrb.mxu2 %v6947_v52  ;;  %v2525_v40 = vrot.slane %v2524_v36, 4  ;;  %v2522_v10 = vrot.slane %v2521_v33, 1  ;;  %v11882_v29 = vld [vmem:[%s15012_s7 + $0x130] sm:$0xff] }
 0x27e   :  { %2625 = vmatpush.msrb.mxu0 %v11613_v31 }
 0x27f   :  { %2645 = vmatpush.msra.mxu1 %v11619_v53  ;;  %2392 = vmatpush.bf16.msra.mxu3 %v7199_v56  ;;  %v11672_v6 = vpop.f32.mrf.mxu1  ;;  %v2526_v46 = vadd.f32 %v2525_v40, %v2524_v36  ;;  %v2523_v40 = vadd.f32 %v2522_v10, %v2521_v33 }
 0x280   :  { %2626 = vmatpush.msrb.mxu0 %v11625_v55  ;;  %2381 = vmatmul.bf16.vlgmr.msrb.gmra.mxu2 %v10626_v54  ;;  %v11698_v54 = vld [vmem:[%s15012_s7 + $0xc0] sm:$0xff]  ;;  %v2162_v36 = vadd.f32 %v11672_v6, %v11659_v34  ;;  %v11903_v6 = vld [vmem:[%s15012_s7 + $0x128] sm:$0xff] }
 0x281   :  { %2646 = vmatpush.msra.mxu1 %v11633_v59  ;;  %2662 = vmatpush.msra.mxu2 %v11650_v0  ;;  %v2527_v52 = vrot.slane %v2526_v46, 2  ;;  %v2137_v56 = vpop.f32.mrf.mxu3 }
 0x282   :  { %2627 = vmatpush.msrb.mxu0 %v11645_v63  ;;  %v11909_v56 = vld [vmem:[%s15012_s7 + $0x1b0] sm:$0xff] }
 0x283   :  { %2647 = vmatpush.msra.mxu1 %v11656_v1  ;;  %2663 = vmatpush.msra.mxu2 %v11669_v5  ;;  %v2174_v60 = vpop.f32.mrf.mxu2  ;;  %v2528_v2 = vadd.f32 %v2527_v52, %v2526_v46  ;;  %v11898_v46 = vld [vmem:[%s15012_s7 + $0x80] sm:$0xff]  ;;  %15063 = vst [vmem:[#allocation12_spill] sm:$0xff] %v11909_v56 }
 0x284   :  { %2628 = vmatpush.msrb.mxu0 %v11664_v3  ;;  %2393 = vmatpush.bf16.msra.mxu3 %v7171_v4  ;;  %v11853_v4 = vld [vmem:[%s15012_s7 + $0x8] sm:$0xff]  ;;  %v2175_v52 = vadd.f32 %v2174_v60, %v2162_v36  ;;  %v11921_v60 = vld [vmem:[%s15012_s7 + $0x278] sm:$0xff] }
 0x285   :  { %2648 = vmatpush.msra.mxu1 %v11677_v7  ;;  %2664 = vmatpush.msra.mxu2 %v11704_v11  ;;  %v2529_v27 = vrot.slane %v2528_v2, 1  ;;  %v11929_v36 = vld [vmem:[%s15012_s7 + $0x1a8] sm:$0xff] }
 0x286   :  { %2629 = vmatpush.msrb.mxu0 %v11685_v8  ;;  %15065 = vst [vmem:[#allocation14_spill] sm:$0xff] %v11929_v36 }
 0x287   :  { %2649 = vmatpush.msra.mxu1 %v11698_v54  ;;  %2394 = vmatmul.bf16.vlgmr.msra.gmra.mxu3 %v10669_v13  ;;  %v11755_v13 = vld [vmem:[%s15012_s7 + $0x28] sm:$0xff]  ;;  %v2163_v37 = vpop.f32.mrf.mxu1  ;;  %v2530_v34 = vadd.f32 %v2529_v27, %v2528_v2  ;;  %v11916_v2 = vld [vmem:[%s15012_s7 + $0x120] sm:$0xff] }
 0x288   :  { %2682 = vmatpush.msrb.mxu3 %v11690_v9  ;;  %2630 = vmatpush.msrb.mxu0 %v11710_v16  ;;  %v11890_v37 = vld [vmem:[%s15012_s7 + $0x1b8] sm:$0xff]  ;;  %v12015_v9 = vld [vmem:[%s15012_s7 + $0x250] sm:$0xff] }
 0x289   :  { %2650 = vmatpush.msra.mxu1 %v11722_v19  ;;  %2665 = vmatpush.msra.mxu2 %v11734_v23  ;;  %15062 = vst [vmem:[#allocation11_spill] sm:$0xff] %v11890_v37  ;;  %v2187_v33 = vpop.f32.mrf.mxu3 }
 0x28a   :  { %2683 = vmatpush.msrb.mxu3 %v11717_v18  ;;  %2631 = vmatpush.msrb.mxu0 %v11728_v22  ;;  %v11924_v10 = vadd.f32 %v2187_v33, %v2175_v52  ;;  %v11941_v52 = vld [vmem:[%s15012_s7 + $0x270] sm:$0xff] }
 0x28b   :  { %2651 = vmatpush.msra.mxu1 %v11748_v26  ;;  %2666 = vmatpush.msra.mxu2 %v11760_v35  ;;  %v2176_v27 = vpop.f32.mrf.mxu2 }
 0x28c   :  { %2684 = vmatpush.msrb.mxu3 %v11743_v25  ;;  %2632 = vmatpush.msrb.mxu0 %v11755_v13  ;;  %15064 = vst [vmem:[#allocation13_spill] sm:$0xff] %v11924_v10  ;;  %v2531_v33 = vsel %vm197_vm2, %v11924_v10, 0.0  ;;  %v11948_v27 = vld [vmem:[%s15012_s7 + $0x1a0] sm:$0xff]  ;;  %v11997_v25 = vld [vmem:[%s15012_s7 + $0x258] sm:$0xff]  ;;  %v12002_v10 = vld [vmem:[%s15012_s7 + $0x188] sm:$0xff] }
 0x28d   :  { %2652 = vmatpush.msra.mxu1 %v11773_v39  ;;  %2667 = vmatpush.msra.mxu2 %v11786_v24  ;;  %15066 = vst [vmem:[#allocation15_spill] sm:$0xff] %v11948_v27 }
 0x28e   :  { %2685 = vmatpush.msrb.mxu3 %v11768_v38  ;;  %2633 = vmatpush.msrb.mxu0 %v11781_v41  ;;  %v11992_v38 = vld [vmem:[%s15012_s7 + $0x100] sm:$0xff]  ;;  %15072 = vst [vmem:[#allocation21_spill] sm:$0xff] %v12002_v10 }
 0x28f   :  { %2653 = vmatpush.msra.mxu1 %v11797_v44  ;;  %2668 = vmatpush.msra.mxu2 %v11810_v30  ;;  %15071 = vst [vmem:[#allocation20_spill] sm:$0xff] %v11992_v38 }
 0x290   :  { %2686 = vmatpush.msrb.mxu3 %v11792_v14  ;;  %2634 = vmatpush.msrb.mxu0 %v11805_v47  ;;  %v11984_v14 = vld [vmem:[%s15012_s7 + $0x190] sm:$0xff] }
 0x291   :  { %2654 = vmatpush.msra.mxu1 %v11821_v51  ;;  %2669 = vmatpush.msra.mxu2 %v11834_v58  ;;  %15070 = vst [vmem:[#allocation19_spill] sm:$0xff] %v11984_v14 }
 0x292   :  { %2687 = vmatpush.msrb.mxu3 %v11816_v50  ;;  %2635 = vmatpush.msrb.mxu0 %v11829_v57  ;;  %v11979_v50 = vld [vmem:[%s15012_s7 + $0x260] sm:$0xff] }
 0x293   :  { %2655 = vmatpush.msra.mxu1 %v11845_v62  ;;  %2670 = vmatpush.msra.mxu2 %v11858_v12 }
 0x294   :  { %2688 = vmatpush.msrb.mxu3 %v11840_v61  ;;  %2636 = vmatpush.msrb.mxu0 %v11853_v4  ;;  %v11974_v61 = vld [vmem:[%s15012_s7 + $0x108] sm:$0xff] }
 0x295   :  { %2656 = vmatpush.msra.mxu1 %v11869_v20  ;;  %2671 = vmatpush.msra.mxu2 %v11882_v29  ;;  %15069 = vst [vmem:[#allocation18_spill] sm:$0xff] %v11974_v61  ;;  %v2213_v18 = vpop.f32.mrf.mxu1 }
 0x296   :  { %2689 = vmatpush.msrb.mxu3 %v11864_v17  ;;  %2637 = vmatpush.msrb.mxu0 %v11877_v21  ;;  %v11966_v17 = vld [vmem:[%s15012_s7 + $0x198] sm:$0xff] }
 0x297   :  { %2638 = vmatmul.f32.vlgmr.msrb.gmra.mxu0 %v2523_v40  ;;  %2657 = vmatpush.msra.mxu1 %v11898_v46  ;;  %v11936_v40 = vld [vmem:[%s15012_s7 + $0x118] sm:$0xff]  ;;  %15068 = vst [vmem:[#allocation17_spill] sm:$0xff] %v11966_v17 }
 0x298   :  { %2690 = vmatpush.msrb.mxu3 %v11890_v37  ;;  %2672 = vmatpush.msra.mxu2 %v11903_v6  ;;  %v11961_v37 = vld [vmem:[%s15012_s7 + $0x268] sm:$0xff] }
 0x299   :  { %2658 = vmatmul.f32.vlgmr.msra.gmra.mxu1 %v2530_v34  ;;  %2702 = vmatpush.msra.mxu0 %v11921_v60  ;;  %v2532_v34 = vrot.slane %v2531_v33, 4 }
 0x29a   :  { %2691 = vmatpush.msrb.mxu3 %v11909_v56  ;;  %2673 = vmatpush.msra.mxu2 %v11916_v2  ;;  %v11956_v56 = vld [vmem:[%s15012_s7 + $0x110] sm:$0xff] }
 0x29b   :  { %15067 = vst [vmem:[#allocation16_spill] sm:$0xff] %v11956_v56  ;;  %2703 = vmatpush.msra.mxu0 %v11941_v52 }
 0x29c   :  { %2692 = vmatpush.msrb.mxu3 %v11929_v36  ;;  %2674 = vmatpush.msra.mxu2 %v11936_v40  ;;  %v2533_v36 = vadd.f32 %v2532_v34, %v2531_v33  ;;  %v2189_v34 = vpop.f32.mrf.mxu3 }
 0x29d   :  { %2704 = vmatpush.msra.mxu0 %v11961_v37  ;;  %v12009_v34 = vld [vmem:[%s15012_s7 + $0x2f8] sm:$0xff] }
 0x29e   :  { %2693 = vmatpush.msrb.mxu3 %v11948_v27  ;;  %2675 = vmatpush.msra.mxu2 %v11956_v56  ;;  %v2534_v33 = vrot.slane %v2533_v36, 2  ;;  %v2200_v27 = vpop.f32.mrf.mxu0  ;;  %15073 = vst [vmem:[#allocation22_spill] sm:$0xff] %v12009_v34 }
 0x29f   :  { %2705 = vmatpush.msra.mxu0 %v11979_v50  ;;  %2722 = vmatpush.msrb.mxu1 %v12009_v34  ;;  %v12041_v34 = vld [vmem:[%s15012_s7 + $0x2e8] sm:$0xff] }
 0x2a0   :  { %2694 = vmatpush.msrb.mxu3 %v11966_v17  ;;  %2676 = vmatpush.msra.mxu2 %v11974_v61  ;;  %v2535_v17 = vadd.f32 %v2534_v33, %v2533_v36  ;;  %v12021_v61 = vld [vmem:[%s15012_s7 + $0x180] sm:$0xff]  ;;  %v12028_v36 = vld [vmem:[%s15012_s7 + $0x2f0] sm:$0xff]  ;;  %15076 = vst [vmem:[#allocation25_spill] sm:$0xff] %v12041_v34 }
 0x2a1   :  { %15074 = vst [vmem:[#allocation23_spill] sm:$0xff] %v12021_v61  ;;  %2706 = vmatpush.msra.mxu0 %v11997_v25  ;;  %2723 = vmatpush.msrb.mxu1 %v12028_v36 }
 0x2a2   :  { %2695 = vmatpush.msrb.mxu3 %v11984_v14  ;;  %2677 = vmatpush.msra.mxu2 %v11992_v38  ;;  %15075 = vst [vmem:[#allocation24_spill] sm:$0xff] %v12028_v36  ;;  %v2536_v33 = vrot.slane %v2535_v17, 1  ;;  %v12034_v14 = vld [vmem:[%s15012_s7 + $0x248] sm:$0xff]  ;;  %v12055_v36 = vld [vmem:[%s15012_s7 + $0x2e0] sm:$0xff] }
 0x2a3   :  { %2707 = vmatpush.msra.mxu0 %v12015_v9  ;;  %2724 = vmatpush.msrb.mxu1 %v12041_v34  ;;  %15077 = vst [vmem:[#allocation26_spill] sm:$0xff] %v12055_v36  ;;  %v12126_v34 = vld [vmem:[%s15012_s7 + $0x210] sm:$0xff] }
 0x2a4   :  { %2696 = vmatpush.msrb.mxu3 %v12002_v10  ;;  %v2537_v38 = vadd.f32 %v2536_v33, %v2535_v17  ;;  %v12047_v10 = vld [vmem:[%s15012_s7 + $0x240] sm:$0xff]  ;;  %v12060_v17 = vld [vmem:[%s15012_s7 + $0x238] sm:$0xff]  ;;  %v2215_v33 = vpop.f32.mrf.mxu1 }
 0x2a5   :  { %2708 = vmatpush.msra.mxu0 %v12034_v14  ;;  %2725 = vmatpush.msrb.mxu1 %v12055_v36  ;;  %v12099_v33 = vld [vmem:[%s15012_s7 + $0x2c8] sm:$0xff]  ;;  %v2214_v36 = vadd.f32 %v2213_v18, %v2200_v27  ;;  %v12140_v18 = vld [vmem:[%s15012_s7 + $0x2b0] sm:$0xff] }
 0x2a6   :  { %2697 = vmatpush.msrb.mxu3 %v12021_v61  ;;  %v2202_v56 = vpop.f32.mrf.mxu0  ;;  %2678 = vmatmul.f32.vlgmr.msra.gmra.mxu2 %v2537_v38  ;;  %v12073_v38 = vld [vmem:[%s15012_s7 + $0x230] sm:$0xff]  ;;  %v2226_v61 = vpop.f32.mrf.mxu2  ;;  %15081 = vst [vmem:[#allocation30_spill] sm:$0xff] %v12140_v18 }
 0x2a7   :  { %2709 = vmatpush.msra.mxu0 %v12047_v10  ;;  %v12086_v56 = vld [vmem:[%s15012_s7 + $0x228] sm:$0xff] }
 0x2a8   :  { %2762 = vmatpush.msra.mxu3 %v11549_v28  ;;  %v12068_v28 = vld [vmem:[%s15012_s7 + $0x2d8] sm:$0xff] }
 0x2a9   :  { %15078 = vst [vmem:[#allocation27_spill] sm:$0xff] %v12068_v28  ;;  %2726 = vmatpush.msrb.mxu1 %v12068_v28  ;;  %2710 = vmatpush.msra.mxu0 %v12060_v17  ;;  %v2566_v28 = vmul.f32 %v11594_v48, %v11594_v48  ;;  %v12134_v48 = vld [vmem:[%s15012_s7 + $0x208] sm:$0xff] }
 0x2aa   :  { %2763 = vmatpush.msra.mxu3 %v11574_v42  ;;  %v12081_v42 = vld [vmem:[%s15012_s7 + $0x2d0] sm:$0xff] }
 0x2ab   :  { %15079 = vst [vmem:[#allocation28_spill] sm:$0xff] %v12081_v42  ;;  %2727 = vmatpush.msrb.mxu1 %v12081_v42  ;;  %2711 = vmatpush.msra.mxu0 %v12073_v38  ;;  %v12111_v42 = vld [vmem:[%s15012_s7 + $0x218] sm:$0xff]  ;;  %v2573_v27 = vsel %vm197_vm2, %v2566_v28, 0.0 }
 0x2ac   :  { %2764 = vmatpush.msra.mxu3 %v11586_v45  ;;  %v12094_v45 = vld [vmem:[%s15012_s7 + $0x220] sm:$0xff]  ;;  %v2574_v28 = vrot.slane %v2573_v27, 4 }
 0x2ad   :  { %2712 = vmatpush.msra.mxu0 %v12086_v56  ;;  %2728 = vmatpush.msrb.mxu1 %v12099_v33 }
 0x2ae   :  { %2765 = vmatpush.msra.mxu3 %v11613_v31  ;;  %v12106_v31 = vld [vmem:[%s15012_s7 + $0x2c0] sm:$0xff] }
 0x2af   :  { %2713 = vmatpush.msra.mxu0 %v12094_v45  ;;  %2729 = vmatpush.msrb.mxu1 %v12106_v31 }
 0x2b0   :  { %2766 = vmatpush.msra.mxu3 %v11625_v55  ;;  %v12121_v55 = vld [vmem:[%s15012_s7 + $0x2b8] sm:$0xff] }
 0x2b1   :  { %15080 = vst [vmem:[#allocation29_spill] sm:$0xff] %v12121_v55  ;;  %2714 = vmatpush.msra.mxu0 %v12111_v42  ;;  %2730 = vmatpush.msrb.mxu1 %v12121_v55  ;;  %v12156_v55 = vld [vmem:[%s15012_s7 + $0x2a8] sm:$0xff] }
 0x2b2   :  { %2767 = vmatpush.msra.mxu3 %v11645_v63  ;;  %v2227_v63 = vadd.f32 %v2226_v61, %v2214_v36  ;;  %v12150_v36 = vld [vmem:[%s15012_s7 + $0x200] sm:$0xff]  ;;  %15083 = vst [vmem:[#allocation32_spill] sm:$0xff] %v12156_v55 }
 0x2b3   :  { %2715 = vmatpush.msra.mxu0 %v12126_v34  ;;  %2731 = vmatpush.msrb.mxu1 %v12140_v18 }
 0x2b4   :  { %2768 = vmatpush.msra.mxu3 %v11664_v3  ;;  %v2239_v3 = vpop.f32.mrf.mxu3 }
 0x2b5   :  { %v12145_v61 = vadd.f32 %v2239_v3, %v2227_v63  ;;  %2716 = vmatpush.msra.mxu0 %v12134_v48  ;;  %2732 = vmatpush.msrb.mxu1 %v12156_v55  ;;  %v12166_v3 = vld [vmem:[%s15012_s7 + $0x2a0] sm:$0xff]  ;;  %v2252_v55 = vpop.f32.mrf.mxu0 }
 0x2b6   :  { %2769 = vmatpush.msra.mxu3 %v11685_v8  ;;  %v2228_v8 = vpop.f32.mrf.mxu2  ;;  %15084 = vst [vmem:[#allocation33_spill] sm:$0xff] %v12166_v3 }
 0x2b7   :  { %15082 = vst [vmem:[#allocation31_spill] sm:$0xff] %v12145_v61  ;;  %v2538_v63 = vsel %vm197_vm2, %v12145_v61, 0.0  ;;  %2717 = vmatpush.msra.mxu0 %v12150_v36  ;;  %2733 = vmatpush.msrb.mxu1 %v12166_v3  ;;  %v2575_v61 = vadd.f32 %v2574_v28, %v2573_v27  ;;  %v12197_v27 = vld [vmem:[%s15012_s7 + $0x280] sm:$0xff] }
 0x2b8   :  { %2770 = vmatpush.msra.mxu3 %v11710_v16  ;;  %v2539_v18 = vrot.slane %v2538_v63, 4  ;;  %v12175_v16 = vld [vmem:[%s15012_s7 + $0x298] sm:$0xff] }
 0x2b9   :  { %2782 = vmatpush.msrb.mxu0 %v11554_v32  ;;  %2734 = vmatpush.msrb.mxu1 %v12175_v16 }
 0x2ba   :  { %2771 = vmatpush.msra.mxu3 %v11728_v22  ;;  %v2540_v8 = vadd.f32 %v2539_v18, %v2538_v63  ;;  %v12183_v22 = vld [vmem:[%s15012_s7 + $0x290] sm:$0xff]  ;;  %v12189_v18 = vld [vmem:[%s15012_s7 + $0x288] sm:$0xff] }
 0x2bb   :  { %2783 = vmatpush.msrb.mxu0 %v11580_v43  ;;  %2735 = vmatpush.msrb.mxu1 %v12183_v22 }
 0x2bc   :  { %2772 = vmatpush.msra.mxu3 %v11755_v13  ;;  %v2541_v32 = vrot.slane %v2540_v8, 2  ;;  %v2241_v3 = vpop.f32.mrf.mxu3  ;;  %v2265_v13 = vpop.f32.mrf.mxu1 }
 0x2bd   :  { %2784 = vmatpush.msrb.mxu0 %v11601_v49  ;;  %2736 = vmatpush.msrb.mxu1 %v12189_v18  ;;  %v15085_v3 = vld [vmem:[#allocation16_spill] sm:$0xff] }
 0x2be   :  { %2773 = vmatpush.msra.mxu3 %v11781_v41  ;;  %v2542_v43 = vadd.f32 %v2541_v32, %v2540_v8  ;;  %v2576_v41 = vrot.slane %v2575_v61, 2  ;;  %v12327_v8 = vld [vmem:[%s15012_s7 + $0x318] sm:$0xff] }
 0x2bf   :  { %2785 = vmatpush.msrb.mxu0 %v11619_v53  ;;  %2737 = vmatpush.msrb.mxu1 %v12197_v27  ;;  %v2254_v53 = vpop.f32.mrf.mxu0 }
 0x2c0   :  { %2774 = vmatpush.msra.mxu3 %v11805_v47  ;;  %v2543_v28 = vrot.slane %v2542_v43, 1  ;;  %v2577_v47 = vadd.f32 %v2576_v41, %v2575_v61 }
 0x2c1   :  { %2786 = vmatpush.msrb.mxu0 %v11633_v59  ;;  %2802 = vmatpush.msra.mxu1 %v11650_v0  ;;  %v12213_v59 = vld [vmem:[%s15012_s7 + $0x378] sm:$0xff]  ;;  %v12220_v0 = vld [vmem:[%s15012_s7 + $0x370] sm:$0xff] }
 0x2c2   :  { %2775 = vmatpush.msra.mxu3 %v11829_v57  ;;  %v2544_v49 = vadd.f32 %v2543_v28, %v2542_v43  ;;  %2742 = vmatpush.msrb.mxu2 %v12213_v59  ;;  %v12337_v43 = vld [vmem:[%s15012_s7 + $0x310] sm:$0xff] }
 0x2c3   :  { %2787 = vmatpush.msrb.mxu0 %v11656_v1  ;;  %2803 = vmatpush.msra.mxu1 %v11669_v5  ;;  %v2578_v1 = vrot.slane %v2577_v47, 1  ;;  %v12233_v5 = vld [vmem:[%s15012_s7 + $0x368] sm:$0xff] }
 0x2c4   :  { %2776 = vmatpush.msra.mxu3 %v11853_v4  ;;  %v2267_v57 = vpop.f32.mrf.mxu1  ;;  %2743 = vmatpush.msrb.mxu2 %v12220_v0 }
 0x2c5   :  { %2698 = vmatmul.f32.vlgmr.msrb.gmra.mxu3 %v2544_v49  ;;  %2788 = vmatpush.msrb.mxu0 %v11677_v7  ;;  %v2579_v7 = vadd.f32 %v2578_v1, %v2577_v47  ;;  %v15088_v49 = vld [vmem:[#allocation22_spill] sm:$0xff]  ;;  %v15089_v57 = vld [vmem:[#allocation24_spill] sm:$0xff]  ;;  %v12353_v1 = vld [vmem:[%s15012_s7 + $0x300] sm:$0xff] }
 0x2c6   :  { %2777 = vmatpush.msra.mxu3 %v11877_v21  ;;  %2804 = vmatpush.msra.mxu1 %v11704_v11  ;;  %v2567_v11 = vmul.f32 %v11736_v15, %v11736_v15 }
 0x2c7   :  { %2789 = vmatpush.msrb.mxu0 %v11698_v54  ;;  %2744 = vmatpush.msrb.mxu2 %v12233_v5  ;;  %v12240_v54 = vld [vmem:[%s15012_s7 + $0x360] sm:$0xff] }
 0x2c8   :  { %2842 = vmatpush.msrb.mxu3 %v11921_v60  ;;  %2805 = vmatpush.msra.mxu1 %v11734_v23  ;;  %v12250_v23 = vld [vmem:[%s15012_s7 + $0x358] sm:$0xff] }
 0x2c9   :  { %2790 = vmatpush.msrb.mxu0 %v11722_v19  ;;  %v2278_v19 = vpop.f32.mrf.mxu2  ;;  %2745 = vmatpush.msrb.mxu2 %v12240_v54 }
 0x2ca   :  { %2843 = vmatpush.msrb.mxu3 %v11941_v52  ;;  %2806 = vmatpush.msra.mxu1 %v11760_v35  ;;  %v2580_v35 = vsel %vm197_vm2, %v2567_v11, 0.0  ;;  %v15091_v11 = vld [vmem:[#allocation26_spill] sm:$0xff] }
 0x2cb   :  { %2791 = vmatpush.msrb.mxu0 %v11748_v26  ;;  %v2266_v26 = vadd.f32 %v2265_v13, %v2252_v55  ;;  %2746 = vmatpush.msrb.mxu2 %v12250_v23  ;;  %v15086_v13 = vld [vmem:[#allocation18_spill] sm:$0xff] }
 0x2cc   :  { %2844 = vmatpush.msrb.mxu3 %v11961_v37  ;;  %2807 = vmatpush.msra.mxu1 %v11786_v24 }
 0x2cd   :  { %2778 = vmatmul.f32.vlgmr.msra.gmra.mxu3 %v2579_v7  ;;  %2792 = vmatpush.msrb.mxu0 %v11773_v39  ;;  %v2279_v24 = vadd.f32 %v2278_v19, %v2266_v26  ;;  %v12262_v39 = vld [vmem:[%s15012_s7 + $0x350] sm:$0xff] }
 0x2ce   :  { %2845 = vmatpush.msrb.mxu3 %v11979_v50  ;;  %2808 = vmatpush.msra.mxu1 %v11810_v30  ;;  %v2291_v50 = vpop.f32.mrf.mxu3  ;;  %v15092_v19 = vld [vmem:[#allocation3_spill] sm:$0xff] }
 0x2cf   :  { %2793 = vmatpush.msrb.mxu0 %v11797_v44  ;;  %2747 = vmatpush.msrb.mxu2 %v12262_v39  ;;  %v2581_v44 = vrot.slane %v2580_v35, 4 }
 0x2d0   :  { %2846 = vmatpush.msrb.mxu3 %v11997_v25  ;;  %2809 = vmatpush.msra.mxu1 %v11834_v58  ;;  %v12267_v25 = vadd.f32 %v2291_v50, %v2279_v24  ;;  %v12286_v58 = vld [vmem:[%s15012_s7 + $0x340] sm:$0xff]  ;;  %v15094_v24 = vld [vmem:[#allocation27_spill] sm:$0xff]  ;;  %v15095_v50 = vld [vmem:[#allocation4_spill] sm:$0xff] }
 0x2d1   :  { %2794 = vmatpush.msrb.mxu0 %v11821_v51  ;;  %v2280_v51 = vpop.f32.mrf.mxu2  ;;  %v2582_v21 = vadd.f32 %v2581_v44, %v2580_v35 }
 0x2d2   :  { %2847 = vmatpush.msrb.mxu3 %v12015_v9  ;;  %v12273_v9 = vld [vmem:[%s15012_s7 + $0x348] sm:$0xff]  ;;  %2810 = vmatpush.msra.mxu1 %v11858_v12  ;;  %v2545_v30 = vsel %vm197_vm2, %v12267_v25, 0.0  ;;  %v12296_v12 = vld [vmem:[%s15012_s7 + $0x338] sm:$0xff] }
 0x2d3   :  { %2795 = vmatpush.msrb.mxu0 %v11845_v62  ;;  %2748 = vmatpush.msrb.mxu2 %v12273_v9  ;;  %v2546_v4 = vrot.slane %v2545_v30, 4 }
 0x2d4   :  { %2848 = vmatpush.msrb.mxu3 %v12034_v14  ;;  %v2570_v14 = vmul.f32 %v12267_v25, %v12267_v25  ;;  %2811 = vmatpush.msra.mxu1 %v11882_v29 }
 0x2d5   :  { %2796 = vmatpush.msrb.mxu0 %v11869_v20  ;;  %2749 = vmatpush.msrb.mxu2 %v12286_v58  ;;  %v2547_v37 = vadd.f32 %v2546_v4, %v2545_v30  ;;  %v12305_v20 = vld [vmem:[%s15012_s7 + $0x330] sm:$0xff]  ;;  %v15096_v30 = vld [vmem:[#allocation28_spill] sm:$0xff] }
 0x2d6   :  { %2849 = vmatpush.msrb.mxu3 %v12047_v10  ;;  %v2601_v62 = vsel %vm197_vm2, %v2570_v14, 0.0  ;;  %2812 = vmatpush.msra.mxu1 %v11903_v6  ;;  %v2293_v52 = vpop.f32.mrf.mxu3  ;;  %v12313_v6 = vld [vmem:[%s15012_s7 + $0x328] sm:$0xff]  ;;  %v15097_v14 = vld [vmem:[#allocation5_spill] sm:$0xff] }
 0x2d7   :  { %v2602_v60 = vrot.slane %v2601_v62, 4  ;;  %2797 = vmatpush.msrb.mxu0 %v11898_v46  ;;  %2750 = vmatpush.msrb.mxu2 %v12296_v12  ;;  %v2548_v29 = vrot.slane %v2547_v37, 2  ;;  %v2317_v46 = vpop.f32.mrf.mxu1 }
 0x2d8   :  { %2850 = vmatpush.msrb.mxu3 %v12060_v17  ;;  %v2304_v17 = vpop.f32.mrf.mxu0  ;;  %2813 = vmatpush.msra.mxu1 %v11916_v2  ;;  %v12321_v2 = vld [vmem:[%s15012_s7 + $0x320] sm:$0xff] }
 0x2d9   :  { %v2603_v10 = vadd.f32 %v2602_v60, %v2601_v62  ;;  %2751 = vmatpush.msrb.mxu2 %v12305_v20  ;;  %v2549_v55 = vadd.f32 %v2548_v29, %v2547_v37  ;;  %v2318_v44 = vadd.f32 %v2317_v46, %v2304_v17  ;;  %v15099_v29 = vld [vmem:[#allocation7_spill] sm:$0xff] }
 0x2da   :  { %2851 = vmatpush.msrb.mxu3 %v12073_v38  ;;  %v2583_v38 = vrot.slane %v2582_v21, 2  ;;  %2814 = vmatpush.msra.mxu1 %v11936_v40 }
 0x2db   :  { %v2604_v61 = vrot.slane %v2603_v10, 2  ;;  %2752 = vmatpush.msrb.mxu2 %v12313_v6 }
 0x2dc   :  { %2852 = vmatpush.msrb.mxu3 %v12086_v56  ;;  %v2550_v56 = vrot.slane %v2549_v55, 1  ;;  %2815 = vmatpush.msra.mxu1 %v15085_v3  ;;  %v2584_v32 = vadd.f32 %v2583_v38, %v2582_v21  ;;  %v15098_v21 = vld [vmem:[#allocation6_spill] sm:$0xff]  ;;  %v15100_v38 = vld [vmem:[#allocation29_spill] sm:$0xff] }
 0x2dd   :  { %v2605_v63 = vadd.f32 %v2604_v61, %v2603_v10  ;;  %2753 = vmatpush.msrb.mxu2 %v12321_v2  ;;  %v15103_v3 = vld [vmem:[#allocation9_spill] sm:$0xff] }
 0x2de   :  { %2853 = vmatpush.msrb.mxu3 %v12094_v45  ;;  %v2551_v40 = vadd.f32 %v2550_v56, %v2549_v55  ;;  %2816 = vmatpush.msra.mxu1 %v15086_v13  ;;  %v2585_v53 = vrot.slane %v2584_v32, 1 }
 0x2df   :  { %v2606_v45 = vrot.slane %v2605_v63, 1  ;;  %2754 = vmatpush.msrb.mxu2 %v12327_v8  ;;  %v2319_v47 = vpop.f32.mrf.mxu1 }
 0x2e0   :  { %2854 = vmatpush.msrb.mxu3 %v12111_v42  ;;  %2718 = vmatmul.f32.vlgmr.msra.gmra.mxu0 %v2551_v40  ;;  %v2306_v41 = vpop.f32.mrf.mxu0  ;;  %v15087_v42 = vld [vmem:[#allocation20_spill] sm:$0xff]  ;;  %v2586_v7 = vadd.f32 %v2585_v53, %v2584_v32 }
 0x2e1   :  { %v2607_v28 = vadd.f32 %v2606_v45, %v2605_v63  ;;  %2817 = vmatpush.msra.mxu1 %v15087_v42  ;;  %2862 = vmatpush.msra.mxu0 %v15088_v49  ;;  %v15104_v32 = vld [vmem:[#allocation32_spill] sm:$0xff] }
 0x2e2   :  { %2855 = vmatpush.msrb.mxu3 %v12126_v34  ;;  %v12345_v34 = vld [vmem:[%s15012_s7 + $0x308] sm:$0xff]  ;;  %2755 = vmatpush.msrb.mxu2 %v12337_v43 }
 0x2e3   :  { %2863 = vmatpush.msra.mxu0 %v15089_v57  ;;  %v2330_v35 = vpop.f32.mrf.mxu2  ;;  %v15106_v57 = vld [vmem:[#allocation33_spill] sm:$0xff] }
 0x2e4   :  { %2856 = vmatpush.msrb.mxu3 %v12134_v48  ;;  %2756 = vmatpush.msrb.mxu2 %v12345_v34  ;;  %v15090_v48 = vld [vmem:[#allocation25_spill] sm:$0xff]  ;;  %v2331_v4 = vadd.f32 %v2330_v35, %v2318_v44 }
 0x2e5   :  { %2864 = vmatpush.msra.mxu0 %v15090_v48  ;;  %v15107_v48 = vld [vmem:[#allocation11_spill] sm:$0xff] }
 0x2e6   :  { %2857 = vmatpush.msrb.mxu3 %v12150_v36  ;;  %2757 = vmatpush.msrb.mxu2 %v12353_v1  ;;  %v15093_v36 = vld [vmem:[#allocation13_spill] sm:$0xff] }
 0x2e7   :  { %2858 = vmatmul.f32.vlgmr.msrb.gmra.mxu3 %v2607_v28  ;;  %2865 = vmatpush.msra.mxu0 %v15091_v11  ;;  %v2568_v26 = vmul.f32 %v15093_v36, %v15093_v36  ;;  %v15105_v28 = vld [vmem:[#allocation10_spill] sm:$0xff] }
 0x2e8   :  { %2822 = vmatpush.msra.mxu2 %v15092_v19  ;;  %2798 = vmatmul.f32.vlgmr.msrb.gmra.mxu0 %v2586_v7  ;;  %v15108_v19 = vld [vmem:[#allocation12_spill] sm:$0xff] }
 0x2e9   :  { %2866 = vmatpush.msra.mxu0 %v15094_v24  ;;  %v2587_v51 = vsel %vm197_vm2, %v2568_v26, 0.0  ;;  %v2343_v62 = vpop.f32.mrf.mxu3 }
 0x2ea   :  { %2823 = vmatpush.msra.mxu2 %v15095_v50  ;;  %v12369_v37 = vadd.f32 %v2343_v62, %v2331_v4  ;;  %v2588_v60 = vrot.slane %v2587_v51, 4  ;;  %v15109_v50 = vld [vmem:[#allocation14_spill] sm:$0xff]  ;;  %v15113_v62 = vld [vmem:[#allocation31_spill] sm:$0xff] }
 0x2eb   :  { %2867 = vmatpush.msra.mxu0 %v15096_v30  ;;  %v2332_v17 = vpop.f32.mrf.mxu2 }
 0x2ec   :  { %2824 = vmatpush.msra.mxu2 %v15097_v14  ;;  %v2552_v10 = vsel %vm197_vm2, %v12369_v37, 0.0  ;;  %v2571_v52 = vmul.f32 %v12369_v37, %v12369_v37  ;;  %v2589_v61 = vadd.f32 %v2588_v60, %v2587_v51  ;;  %v15110_v51 = vld [vmem:[#allocation15_spill] sm:$0xff]  ;;  %v15114_v60 = vld [vmem:[#allocation21_spill] sm:$0xff] }
 0x2ed   :  { %2868 = vmatpush.msra.mxu0 %v12099_v33  ;;  %v2553_v46 = vrot.slane %v2552_v10, 4  ;;  %v15101_v33 = vld [vmem:[#allocation8_spill] sm:$0xff] }
 0x2ee   :  { %2825 = vmatpush.msra.mxu2 %v15098_v21  ;;  %v2608_v55 = vsel %vm197_vm2, %v2571_v52, 0.0  ;;  %v2590_v49 = vrot.slane %v2589_v61, 2 }
 0x2ef   :  { %2869 = vmatpush.msra.mxu0 %v12106_v31  ;;  %v2554_v56 = vadd.f32 %v2553_v46, %v2552_v10  ;;  %v2609_v63 = vrot.slane %v2608_v55, 4  ;;  %v15102_v31 = vld [vmem:[#allocation30_spill] sm:$0xff] }
 0x2f0   :  { %2826 = vmatpush.msra.mxu2 %v15099_v29  ;;  %v2591_v24 = vadd.f32 %v2590_v49, %v2589_v61 }
 0x2f1   :  { %2870 = vmatpush.msra.mxu0 %v15100_v38  ;;  %v2555_v40 = vrot.slane %v2554_v56, 2  ;;  %v2610_v45 = vadd.f32 %v2609_v63, %v2608_v55  ;;  %v2345_v13 = vpop.f32.mrf.mxu3 }
 0x2f2   :  { %2827 = vmatpush.msra.mxu2 %v15101_v33 }
 0x2f3   :  { %2871 = vmatpush.msra.mxu0 %v15102_v31  ;;  %v2556_v47 = vadd.f32 %v2555_v40, %v2554_v56  ;;  %v2611_v53 = vrot.slane %v2610_v45, 2 }
 0x2f4   :  { %2828 = vmatpush.msra.mxu2 %v15103_v3  ;;  %v2356_v41 = vpop.f32.mrf.mxu0 }
 0x2f5   :  { %2872 = vmatpush.msra.mxu0 %v15104_v32  ;;  %v2369_v42 = vpop.f32.mrf.mxu1  ;;  %v2612_v7 = vadd.f32 %v2611_v53, %v2610_v45  ;;  %v2557_v11 = vrot.slane %v2556_v47, 1 }
 0x2f6   :  { %2829 = vmatpush.msra.mxu2 %v15105_v28 }
 0x2f7   :  { %2873 = vmatpush.msra.mxu0 %v15106_v57  ;;  %v2613_v26 = vrot.slane %v2612_v7, 1  ;;  %v2558_v35 = vadd.f32 %v2557_v11, %v2556_v47 }
 0x2f8   :  { %2830 = vmatpush.msra.mxu2 %v15107_v48 }
 0x2f9   :  { %2874 = vmatpush.msra.mxu0 %v12175_v16  ;;  %2738 = vmatmul.f32.vlgmr.msrb.gmra.mxu1 %v2558_v35  ;;  %v2614_v30 = vadd.f32 %v2613_v26, %v2612_v7  ;;  %v2592_v16 = vrot.slane %v2591_v24, 1 }
 0x2fa   :  { %2831 = vmatpush.msra.mxu2 %v15108_v19  ;;  %2882 = vmatpush.msrb.mxu1 %v12213_v59  ;;  %v2569_v59 = vmul.f32 %v15113_v62, %v15113_v62 }
 0x2fb   :  { %2875 = vmatpush.msra.mxu0 %v12183_v22  ;;  %v15111_v22 = vld [vmem:[#allocation17_spill] sm:$0xff]  ;;  %v2593_v4 = vadd.f32 %v2592_v16, %v2591_v24 }
 0x2fc   :  { %2832 = vmatpush.msra.mxu2 %v15109_v50  ;;  %v2358_v44 = vpop.f32.mrf.mxu0  ;;  %2883 = vmatpush.msrb.mxu1 %v12220_v0  ;;  %v15115_v0 = vld [vmem:[#allocation23_spill] sm:$0xff] }
 0x2fd   :  { %2876 = vmatpush.msra.mxu0 %v12189_v18  ;;  %v2371_v14 = vpop.f32.mrf.mxu1  ;;  %v15112_v18 = vld [vmem:[#allocation19_spill] sm:$0xff] }
 0x2fe   :  { %2833 = vmatpush.msra.mxu2 %v15110_v51  ;;  %2884 = vmatpush.msrb.mxu1 %v12233_v5  ;;  %v2594_v5 = vsel %vm197_vm2, %v2569_v59, 0.0 }
 0x2ff   :  { %2877 = vmatpush.msra.mxu0 %v12197_v27  ;;  %v2370_v27 = vadd.f32 %v2369_v42, %v2356_v41  ;;  %v2595_v52 = vrot.slane %v2594_v5, 4 }
 0x300   :  { %2878 = vmatmul.f32.vlgmr.msra.gmra.mxu0 %v2614_v30  ;;  %2834 = vmatpush.msra.mxu2 %v15111_v22 }
 0x301   :  { %2885 = vmatpush.msrb.mxu1 %v12240_v54  ;;  %v2596_v33 = vadd.f32 %v2595_v52, %v2594_v5 }
 0x302   :  { %2835 = vmatpush.msra.mxu2 %v15112_v18  ;;  %2818 = vmatmul.f32.vlgmr.msra.gmra.mxu1 %v2593_v4  ;;  %v2513_v18 = vld [vmem:[%s15013_s8 + $0x10] sm:$0xff] }
 0x303   :  { %v2382_v21 = vpop.f32.mrf.mxu2  ;;  %2886 = vmatpush.msrb.mxu1 %v12250_v23  ;;  %v2597_v63 = vrot.slane %v2596_v33, 2  ;;  %2929 = vst [vmem:[#allocation1 + $0x20] ss:$2 sm:$0xff] %v2513_v18 }
 0x304   :  { %2836 = vmatpush.msra.mxu2 %v15114_v60  ;;  %v2383_v29 = vadd.f32 %v2382_v21, %v2370_v27  ;;  %v2514_v27 = vld [vmem:[%s15013_s8 + $0x18] sm:$0xf] }
 0x305   :  { %2887 = vmatpush.msrb.mxu1 %v12262_v39  ;;  %v2598_v13 = vadd.f32 %v2597_v63, %v2596_v33  ;;  %2931 = vst [vmem:[#allocation1 + $0x30] ss:$2 sm:$0xff] %v2514_v27 }
 0x306   :  { %2837 = vmatpush.msra.mxu2 %v15115_v0 }
 0x307   :  { %2888 = vmatpush.msrb.mxu1 %v12273_v9 }
 0x309   :  { %2889 = vmatpush.msrb.mxu1 %v12286_v58 }
 0x30a   :  { %v2395_v54 = vpop.f32.mrf.mxu3 }
 0x30b   :  { %v12407_v10 = vadd.f32 %v2395_v54, %v2383_v29  ;;  %v2384_v46 = vpop.f32.mrf.mxu2  ;;  %2890 = vmatpush.msrb.mxu1 %v12296_v12 }
 0x30c   :  { %v2936_v46 = vld.sshfl [vmem:[#allocation1 + $0x20] sm:$0xff pattern:$0x75316420] }
 0x30d   :  { %v2559_v17 = vsel %vm197_vm2, %v12407_v10, 0.0  ;;  %v2572_v23 = vmul.f32 %v12407_v10, %v12407_v10  ;;  %2891 = vmatpush.msrb.mxu1 %v12305_v20 }
 0x30e   :  { %v2560_v38 = vrot.slane %v2559_v17, 4 }
 0x30f   :  { %v2615_v39 = vsel %vm197_vm2, %v2572_v23, 0.0  ;;  %2892 = vmatpush.msrb.mxu1 %v12313_v6  ;;  %v2599_v6 = vrot.slane %v2598_v13, 1 }
 0x310   :  { %v2561_v9 = vadd.f32 %v2560_v38, %v2559_v17  ;;  %v2616_v55 = vrot.slane %v2615_v39, 4  ;;  %v2937_v38 = vld.sshfl [vmem:[#allocation1 + $0x28] sm:$0xff pattern:$0x75316420] }
 0x311   :  { %2893 = vmatpush.msrb.mxu1 %v12321_v2  ;;  %v2600_v41 = vadd.f32 %v2599_v6, %v2598_v13  ;;  %3101 = vst [vmem:[#allocation1 + $0x20] ss:$2 sm:$0xff] %v2513_v18  ;;  %v2516_v6 = vld [vmem:[%s15015_s10] sm:$0x1]  ;;  %v7902_v18 = vld [vmem:[%s15016_s11 + $0x3f0] sm:$0xf] }
 0x312   :  { %v2562_v61 = vrot.slane %v2561_v9, 2  ;;  %v2617_v56 = vadd.f32 %v2616_v55, %v2615_v39  ;;  %v2397_v58 = vpop.f32.mrf.mxu3 }
 0x313   :  { %2894 = vmatpush.msrb.mxu1 %v12327_v8 }
 0x314   :  { %v2563_v31 = vadd.f32 %v2562_v61, %v2561_v9  ;;  %v2618_v3 = vrot.slane %v2617_v56, 2  ;;  %v2639_v2 = vpop.f32.mrf.mxu0  ;;  %v2938_v9 = vld.sshfl [vmem:[#allocation1 + $0x30] sm:$0xff pattern:$0x75316420] }
 0x315   :  { %2895 = vmatpush.msrb.mxu1 %v12337_v43  ;;  %3103 = vst [vmem:[#allocation1 + $0x30] ss:$2 sm:$0xff] %v2514_v27  ;;  %v9233_v27 = vld [vmem:[%s15016_s11 + $0x168] sm:$0xf0] }
 0x316   :  { %v2564_v12 = vrot.slane %v2563_v31, 1  ;;  %v2619_v40 = vadd.f32 %v2618_v3, %v2617_v56  ;;  %v2659_v28 = vpop.f32.mrf.mxu1 }
 0x317   :  { %2896 = vmatpush.msrb.mxu1 %v12345_v34  ;;  %v2660_v43 = vadd.f32 %v2659_v28, %v2639_v2  ;;  %v2511_v34 = vld [vmem:[%s15013_s8] sm:$0xff]  ;;  %v8042_v28 = vld [vmem:[%s15016_s11 + $0x508] sm:$0xf] }
 0x318   :  { %v2565_v45 = vadd.f32 %v2564_v12, %v2563_v31  ;;  %v2620_v32 = vrot.slane %v2619_v40, 1  ;;  %2925 = vst [vmem:[#allocation1] ss:$2 sm:$0xff] %v2511_v34  ;;  %v3109_v56 = vld.sshfl [vmem:[#allocation1 + $0x28] sm:$0xff pattern:$0x75316420] }
 0x319   :  { %2897 = vmatpush.msrb.mxu1 %v12353_v1  ;;  %v2512_v1 = vld [vmem:[%s15013_s8 + $0x8] sm:$0xff] }
 0x31a   :  { %2758 = vmatmul.f32.vlgmr.msrb.gmra.mxu2 %v2565_v45  ;;  %v2621_v20 = vadd.f32 %v2620_v32, %v2619_v40  ;;  %2927 = vst [vmem:[#allocation1 + $0x10] ss:$2 sm:$0xff] %v2512_v1  ;;  %v2515_v45 = vld [vmem:[%s15014_s9] sm:$0x1] }
 0x31c   :  { %2898 = vmatmul.f32.vlgmr.msrb.gmra.mxu1 %v2621_v20  ;;  %v3110_v58 = vld.sshfl [vmem:[#allocation1 + $0x30] sm:$0xff pattern:$0x75316420] }
 0x31f   :  { %v2932_v51 = vld.sshfl [vmem:[#allocation1] sm:$0xff pattern:$0x75316420]  ;;  %v2933_v16 = vld.sshfl [vmem:[#allocation1 + $0x8] sm:$0xff pattern:$0x75316420] }
 0x320   :  { %7368 = vmatpush.msk.msrb.mxu2 %vm62_vm0, %v2932_v51  ;;  %7370 = vmatpush.msk.msra.mxu3 %vm62_vm0, %v2933_v16  ;;  %3097 = vst [vmem:[#allocation1] ss:$2 sm:$0xff] %v2511_v34  ;;  %v9338_v34 = vld [vmem:[%s15016_s11 + $0x4b0] sm:$0xf0] }
 0x321   :  { %v2934_v4 = vld.sshfl [vmem:[#allocation1 + $0x10] sm:$0xff pattern:$0x75316420]  ;;  %v2935_v21 = vld.sshfl [vmem:[#allocation1 + $0x18] sm:$0xff pattern:$0x75316420] }
 0x322   :  { %2838 = vmatmul.f32.vlgmr.msra.gmra.mxu2 %v2600_v41  ;;  %3099 = vst [vmem:[#allocation1 + $0x10] ss:$2 sm:$0xff] %v2512_v1  ;;  %7374 = vmatpush.msk.msrb.mxu3 %vm62_vm0, %v2935_v21  ;;  %v9289_v21 = vld [vmem:[%s15016_s11 + $0x328] sm:$0xf0] }
 0x323   :  { %7372 = vmatpush.msk.msra.mxu2 %vm62_vm0, %v2934_v4 }
 0x327   :  { %v3105_v23 = vld.sshfl [vmem:[#allocation1 + $0x8] sm:$0xff pattern:$0x75316420] }
 0x328   :  { %7384 = vmatpush.msk.msrb.mxu0 %vm62_vm0, %v3105_v23 }
 0x329   :  { %v2679_v8 = vpop.f32.mrf.mxu2  ;;  %v3106_v33 = vld.sshfl [vmem:[#allocation1 + $0x10] sm:$0xff pattern:$0x75316420] }
 0x32a   :  { %v2680_v57 = vadd.f32 %v2679_v8, %v2660_v43  ;;  %7386 = vmatpush.msk.msra.mxu1 %vm62_vm0, %v3106_v33  ;;  %7392 = vmatpush.msk.msra.mxu0 %vm62_vm0, %v3109_v56  ;;  %v9352_v8 = vld [vmem:[%s15016_s11 + $0x520] sm:$0xf0]  ;;  %v7538_v33 = vld [vmem:[%s15016_s11 + $0x118] sm:$0xf]  ;;  %v9401_v56 = vld [vmem:[%s15016_s11 + $0x6a8] sm:$0xf0] }
 0x32b   :  { %v3104_v43 = vld.sshfl [vmem:[#allocation1] sm:$0xff pattern:$0x75316420] }
 0x32c   :  { %7394 = vmatpush.msk.msrb.mxu1 %vm62_vm0, %v3110_v58  ;;  %v7846_v58 = vld [vmem:[%s15016_s11 + $0x380] sm:$0xf] }
 0x348   :  { %v2699_v42 = vpop.f32.mrf.mxu3 }
 0x349   :  { %v2700_v11 = vadd.f32 %v2699_v42, %v2680_v57  ;;  %v8043_v42 = vor.u32 %v9352_v8, %v8042_v28  ;;  %v7986_v57 = vld [vmem:[%s15016_s11 + $0x498] sm:$0xf] }
 0x34a   :  { %v7987_v1 = vor.u32 %v9338_v34, %v7986_v57  ;;  %v8210_v8 = vld [vmem:[%s15016_s11 + $0x658] sm:$0xf]  ;;  %v7482_v34 = vld [vmem:[%s15016_s11 + $0xa8] sm:$0xf] }
 0x350   :  { %v2779_v48 = vpop.f32.mrf.mxu3 }
 0x35d   :  { %v2719_v49 = vpop.f32.mrf.mxu0 }
 0x35e   :  { %v2720_v26 = vadd.f32 %v2719_v49, %v2700_v11  ;;  %v8014_v49 = vld [vmem:[%s15016_s11 + $0x4d0] sm:$0xf]  ;;  %v3107_v11 = vld.sshfl [vmem:[#allocation1 + $0x18] sm:$0xff pattern:$0x75316420] }
 0x365   :  { %v2799_v7 = vpop.f32.mrf.mxu0 }
 0x366   :  { %v2800_v35 = vadd.f32 %v2799_v7, %v2779_v48  ;;  %v7958_v48 = vld [vmem:[%s15016_s11 + $0x460] sm:$0xf]  ;;  %v9331_v7 = vld [vmem:[%s15016_s11 + $0x478] sm:$0xf0] }
 0x36a   :  { %v2859_v22 = vpop.f32.mrf.mxu3 }
 0x376   :  { %v2739_v47 = vpop.f32.mrf.mxu1 }
 0x377   :  { %v2740_v24 = vadd.f32 %v2739_v47, %v2720_v26  ;;  %v9345_v47 = vld [vmem:[%s15016_s11 + $0x4e8] sm:$0xf0]  ;;  %v7959_v26 = vor.u32 %v9331_v7, %v7958_v48 }
 0x378   :  { %v9569_v48 = vld [vmem:[%s15016_s11 + $0xbe8] sm:$0xf0] }
 0x37d   :  { %v2879_v60 = vpop.f32.mrf.mxu0 }
 0x37f   :  { %v2819_v19 = vpop.f32.mrf.mxu1 }
 0x380   :  { %v2820_v50 = vadd.f32 %v2819_v19, %v2800_v35  ;;  %v3108_v19 = vld.sshfl [vmem:[#allocation1 + $0x20] sm:$0xff pattern:$0x75316420]  ;;  %v7818_v35 = vld [vmem:[%s15016_s11 + $0x348] sm:$0xf] }
 0x399   :  { %v2899_v29 = vpop.f32.mrf.mxu1 }
 0x39d   :  { %v2759_v53 = vpop.f32.mrf.mxu2 }
 0x39e   :  { %v2760_v30 = vadd.f32 %v2759_v53, %v2740_v24  ;;  %v8015_v53 = vor.u32 %v9345_v47, %v8014_v49  ;;  %v7930_v24 = vld [vmem:[%s15016_s11 + $0x428] sm:$0xf] }
 0x3a0   :  { %v2902_v0 = vmul.f32 0.0025510204, %v2760_v30  ;;  %v7594_v30 = vld [vmem:[%s15016_s11 + $0x188] sm:$0xf] }
 0x3a2   :  { %v2904_v52 = vmul.f32 %v2902_v0, %v2902_v0 }
 0x3a5   :  { %v2839_v44 = vpop.f32.mrf.mxu2 }
 0x3a6   :  { %v2840_v14 = vadd.f32 %v2839_v44, %v2820_v50  ;;  %v9324_v50 = vld [vmem:[%s15016_s11 + $0x440] sm:$0xf0] }
 0x3a7   :  { %v9296_v44 = vld [vmem:[%s15016_s11 + $0x360] sm:$0xf0]  ;;  %v7931_v51 = vor.u32 %v9324_v50, %v7930_v24  ;;  %v7678_v24 = vld [vmem:[%s15016_s11 + $0x230] sm:$0xf] }
 0x3a8   :  { %v2860_v59 = vadd.f32 %v2859_v22, %v2840_v14  ;;  %v9240_v14 = vld [vmem:[%s15016_s11 + $0x1a0] sm:$0xf0]  ;;  %v7819_v16 = vor.u32 %v9296_v44, %v7818_v35  ;;  %v7790_v22 = vld [vmem:[%s15016_s11 + $0x310] sm:$0xf]  ;;  %v9261_v44 = vld [vmem:[%s15016_s11 + $0x248] sm:$0xf0] }
 0x3a9   :  { %v7595_v4 = vor.u32 %v9240_v14, %v7594_v30  ;;  %v7791_v23 = vor.u32 %v9289_v21, %v7790_v22  ;;  %v7454_v30 = vld [vmem:[%s15016_s11 + $0x70] sm:$0xf]  ;;  %v9205_v14 = vld [vmem:[%s15016_s11 + $0x88] sm:$0xf0]  ;;  %v7650_v22 = vld [vmem:[%s15016_s11 + $0x1f8] sm:$0xf] }
 0x3aa   :  { %v2880_v5 = vadd.f32 %v2879_v60, %v2860_v59  ;;  %v9317_v59 = vld [vmem:[%s15016_s11 + $0x408] sm:$0xf0]  ;;  %v7566_v60 = vld [vmem:[%s15016_s11 + $0x150] sm:$0xf]  ;;  %v9247_v21 = vld [vmem:[%s15016_s11 + $0x1d8] sm:$0xf0] }
 0x3ac   :  { %v2900_v54 = vadd.f32 %v2899_v29, %v2880_v5  ;;  %v8266_v5 = vld [vmem:[%s15016_s11 + $0x6c8] sm:$0xf]  ;;  %v9408_v29 = vld [vmem:[%s15016_s11 + $0x6e0] sm:$0xf0] }
 0x3ae   :  { %v2903_v17 = vmul.f32 0.0025510204, %v2900_v54  ;;  %v7874_v54 = vld [vmem:[%s15016_s11 + $0x3b8] sm:$0xf] }
 0x3b0   :  { %v2905_v39 = vsub.f32 %v2903_v17, %v2904_v52  ;;  %v8267_v52 = vor.u32 %v9408_v29, %v8266_v5  ;;  %v9310_v17 = vld [vmem:[%s15016_s11 + $0x3d0] sm:$0xf0]  ;;  %v8686_v29 = vld [vmem:[%s15016_s11 + $0xa10] sm:$0xf] }
 0x3b2   :  { %v2906_v55 = vmax.f32 %v2905_v39, 0.0  ;;  %v7567_v39 = vor.u32 %v9233_v27, %v7566_v60  ;;  %v8714_v60 = vld [vmem:[%s15016_s11 + $0xa48] sm:$0xf]  ;;  %v9520_v27 = vld [vmem:[%s15016_s11 + $0xa60] sm:$0xf0] }
 0x3b3   :  { %v8715_v5 = vor.u32 %v9520_v27, %v8714_v60  ;;  %v9359_v60 = vld [vmem:[%s15016_s11 + $0x558] sm:$0xf0] }
 0x3b4   :  { %v2907_v61 = vadd.f32 1e-05, %v2906_v55  ;;  %v7875_v55 = vor.u32 %v9310_v17, %v7874_v54  ;;  %v9513_v54 = vld [vmem:[%s15016_s11 + $0xa28] sm:$0xf0]  ;;  %v8658_v17 = vld [vmem:[%s15016_s11 + $0x9d8] sm:$0xf] }
 0x3b6   :  { %9582 = vrsqrt.f32 %v2907_v61  ;;  %vm2914_vm7 = vweird.f32 %v2907_v61 }
 0x3bc   :  { %v9583_v63 = vpop.eup %9582 }
 0x3bd   :  { %v2909_v31 = vmul.f32 %v9583_v63, %v2907_v61  ;;  %vm2915_vm6 = vweird.f32 %v9583_v63  ;;  %v8238_v61 = vld [vmem:[%s15016_s11 + $0x690] sm:$0xf] }
 0x3be   :  { %vm2916_vm8 = vmor %vm2914_vm7, %vm2915_vm6 }
 0x3bf   :  { %v2910_v3 = vmul.f32 %v9583_v63, %v2909_v31  ;;  %v8239_v31 = vor.u32 %v9401_v56, %v8238_v61  ;;  %v8882_v61 = vld [vmem:[%s15016_s11 + $0xb98] sm:$0xf] }
 0x3c1   :  { %v2911_v12 = vmul.f32 0.5, %v2910_v3 }
 0x3c3   :  { %v2912_v40 = vsub.f32 1.5, %v2911_v12  ;;  %v7734_v12 = vld [vmem:[%s15016_s11 + $0x2a0] sm:$0xf] }
 0x3c5   :  { %v2913_v32 = vmul.f32 %v9583_v63, %v2912_v40  ;;  %v9275_v40 = vld [vmem:[%s15016_s11 + $0x2b8] sm:$0xf0] }
 0x3c6   :  { %v7735_v47 = vor.u32 %v9275_v40, %v7734_v12  ;;  %v8154_v40 = vld [vmem:[%s15016_s11 + $0x5e8] sm:$0xf] }
 0x3c7   :  { %v2917_v13 = vsel %vm2916_vm8, %v9583_v63, %v2913_v32  ;;  %v9303_v63 = vld [vmem:[%s15016_s11 + $0x398] sm:$0xf0]  ;;  %v7510_v32 = vld [vmem:[%s15016_s11 + $0xe0] sm:$0xf] }
 0x3c8   :  { %v2918_v20 = vmul.f32 %v2917_v13, %v2515_v45  ;;  %v9219_v13 = vld [vmem:[%s15016_s11 + $0xf8] sm:$0xf0] }
 0x3c9   :  { %v7511_v57 = vor.u32 %v9219_v13, %v7510_v32  ;;  %v8574_v13 = vld [vmem:[%s15016_s11 + $0x930] sm:$0xf] }
 0x3ca   :  { %7369 = vmatmul.msk.f32.vlgmr.msrb.gmra.mxu2 %vm2939_vm9, %v2918_v20  ;;  %7371 = vmatmul.msk.f32.vlgmr.msra.gmra.mxu3 %vm2939_vm9, %v2918_v20  ;;  %v2919_v41 = vmul.f32 %v2918_v20, %v2902_v0  ;;  %v7903_v0 = vor.u32 %v9317_v59, %v7902_v18  ;;  %v7622_v59 = vld [vmem:[%s15016_s11 + $0x1c0] sm:$0xf] }
 0x3cb   :  { %7376 = vmatpush.msk.msrb.mxu2 %vm62_vm0, %v2936_v46  ;;  %7378 = vmatpush.msk.msra.mxu3 %vm62_vm0, %v2937_v38  ;;  %v7762_v46 = vld [vmem:[%s15016_s11 + $0x2d8] sm:$0xf]  ;;  %v9282_v38 = vld [vmem:[%s15016_s11 + $0x2f0] sm:$0xf0] }
 0x3cc   :  { %v12453_v2 = vsub.f32 %v2516_v6, %v2919_v41  ;;  %v7763_v3 = vor.u32 %v9282_v38, %v7762_v46  ;;  %v8938_v6 = vld [vmem:[%s15016_s11 + $0xc08] sm:$0xf]  ;;  %v9576_v41 = vld [vmem:[%s15016_s11 + $0xc20] sm:$0xf0]  ;;  %v8630_v38 = vld [vmem:[%s15016_s11 + $0x9a0] sm:$0xf] }
 0x3cd   :  { %v8939_v28 = vor.u32 %v9576_v41, %v8938_v6  ;;  %v8854_v6 = vld [vmem:[%s15016_s11 + $0xb60] sm:$0xf] }
 0x3ce   :  { %7385 = vmatmul.msk.f32.vlgmr.msrb.gmra.mxu0 %vm2939_vm9, %v12453_v2  ;;  %7387 = vmatmul.msk.f32.vlgmr.msra.gmra.mxu1 %vm2939_vm9, %v12453_v2 }
 0x3cf   :  { %5816 = vmatpush.bf16.msrb.mxu0 %v8043_v42  ;;  %5829 = vmatpush.bf16.msra.mxu1 %v8267_v52  ;;  %v9394_v42 = vld [vmem:[%s15016_s11 + $0x670] sm:$0xf0]  ;;  %v8687_v52 = vor.u32 %v9513_v54, %v8686_v29  ;;  %v9237_v54 = vld [vmem:[%s15016_s11 + $0x18c] sm:$0xf] }
 0x3d0   :  { %v8211_v49 = vor.u32 %v9394_v42, %v8210_v8  ;;  %v7398_v8 = vld [vmem:[%s15016_s11] sm:$0xf]  ;;  %v9191_v42 = vld [vmem:[%s15016_s11 + $0x18] sm:$0xf0]  ;;  %v9450_v29 = vld [vmem:[%s15016_s11 + $0x830] sm:$0xf0] }
 0x3d2   :  { %7373 = vmatmul.msk.f32.vlgmr.msra.gmra.mxu2 %vm2939_vm9, %v2918_v20  ;;  %7375 = vmatmul.msk.f32.vlgmr.msrb.gmra.mxu3 %vm2939_vm9, %v2918_v20 }
 0x3d3   :  { %7380 = vmatpush.msk.msra.mxu2 %vm62_vm0, %v2938_v9  ;;  %7382 = vmatpush.msk.msrb.mxu3 %vm62_vm0, %v3104_v43  ;;  %v9226_v9 = vld [vmem:[%s15016_s11 + $0x130] sm:$0xf0]  ;;  %v7706_v43 = vld [vmem:[%s15016_s11 + $0x268] sm:$0xf] }
 0x3d4   :  { %5817 = vmatpush.bf16.msrb.mxu0 %v8015_v53  ;;  %v7539_v45 = vor.u32 %v9226_v9, %v7538_v33  ;;  %5830 = vmatpush.bf16.msra.mxu1 %v8239_v31  ;;  %v9268_v53 = vld [vmem:[%s15016_s11 + $0x280] sm:$0xf0]  ;;  %v8602_v9 = vld [vmem:[%s15016_s11 + $0x968] sm:$0xf]  ;;  %v9198_v31 = vld [vmem:[%s15016_s11 + $0x50] sm:$0xf0] }
 0x3d5   :  { %v7707_v35 = vor.u32 %v9268_v53, %v7706_v43  ;;  %v8126_v43 = vld [vmem:[%s15016_s11 + $0x5b0] sm:$0xf]  ;;  %v9373_v53 = vld [vmem:[%s15016_s11 + $0x5c8] sm:$0xf0] }
 0x3d6   :  { %7393 = vmatmul.msk.f32.vlgmr.msra.gmra.mxu0 %vm2939_vm9, %v12453_v2  ;;  %7395 = vmatmul.msk.f32.vlgmr.msrb.gmra.mxu1 %vm2939_vm9, %v12453_v2 }
 0x3d8   :  { %5818 = vmatpush.bf16.msrb.mxu0 %v7987_v1  ;;  %5831 = vmatpush.bf16.msra.mxu1 %v8211_v49  ;;  %v8910_v1 = vld [vmem:[%s15016_s11 + $0xbd0] sm:$0xf] }
 0x3d9   :  { %v8911_v7 = vor.u32 %v9569_v48, %v8910_v1  ;;  %v8546_v48 = vld [vmem:[%s15016_s11 + $0x8f8] sm:$0xf] }
 0x3da   :  { %7377 = vmatmul.msk.f32.vlgmr.msrb.gmra.mxu2 %vm2939_vm9, %v2918_v20  ;;  %7379 = vmatmul.msk.f32.vlgmr.msra.gmra.mxu3 %vm2939_vm9, %v2918_v20 }
 0x3db   :  { %7388 = vmatpush.msk.msrb.mxu2 %vm62_vm0, %v3107_v11  ;;  %7390 = vmatpush.msk.msra.mxu3 %vm62_vm0, %v3108_v19  ;;  %v8182_v11 = vld [vmem:[%s15016_s11 + $0x620] sm:$0xf]  ;;  %v9387_v19 = vld [vmem:[%s15016_s11 + $0x638] sm:$0xf0] }
 0x3dc   :  { %5819 = vmatpush.bf16.msrb.mxu0 %v7959_v26  ;;  %v8183_v26 = vor.u32 %v9387_v19, %v8182_v11  ;;  %v8826_v11 = vld [vmem:[%s15016_s11 + $0xb28] sm:$0xf] }
 0x3de   :  { %5832 = vmatpush.bf16.msra.mxu1 %v8183_v26  ;;  %v9548_v26 = vld [vmem:[%s15016_s11 + $0xb40] sm:$0xf0] }
 0x3e0   :  { %5820 = vmatpush.bf16.msrb.mxu0 %v7931_v51  ;;  %v7679_v51 = vor.u32 %v9261_v44, %v7678_v24  ;;  %v9366_v24 = vld [vmem:[%s15016_s11 + $0x590] sm:$0xf0] }
 0x3e2   :  { %7381 = vmatmul.msk.f32.vlgmr.msra.gmra.mxu2 %vm2939_vm9, %v2918_v20  ;;  %7383 = vmatmul.msk.f32.vlgmr.msrb.gmra.mxu3 %vm2939_vm9, %v12453_v2  ;;  %v7847_v20 = vor.u32 %v9303_v63, %v7846_v58  ;;  %v9562_v58 = vld [vmem:[%s15016_s11 + $0xbb0] sm:$0xf0]  ;;  %v7426_v63 = vld [vmem:[%s15016_s11 + $0x38] sm:$0xf] }
 0x3e3   :  { %5803 = vmatpush.bf16.msrb.mxu3 %v7819_v16  ;;  %5790 = vmatpush.bf16.msra.mxu2 %v7595_v4  ;;  %v7455_v16 = vor.u32 %v9205_v14, %v7454_v30  ;;  %v9254_v4 = vld [vmem:[%s15016_s11 + $0x210] sm:$0xf0]  ;;  %v7427_v12 = vor.u32 %v9198_v31, %v7426_v63  ;;  %v8462_v30 = vld [vmem:[%s15016_s11 + $0x850] sm:$0xf]  ;;  %v9457_v14 = vld [vmem:[%s15016_s11 + $0x868] sm:$0xf0] }
 0x3e4   :  { %5821 = vmatpush.bf16.msrb.mxu0 %v7903_v0  ;;  %v7651_v18 = vor.u32 %v9254_v4, %v7650_v22  ;;  %v7623_v0 = vor.u32 %v9247_v21, %v7622_v59  ;;  %v9471_v22 = vld [vmem:[%s15016_s11 + $0x8d8] sm:$0xf0]  ;;  %v8798_v4 = vld [vmem:[%s15016_s11 + $0xaf0] sm:$0xf]  ;;  %v9541_v59 = vld [vmem:[%s15016_s11 + $0xb08] sm:$0xf0] }
 0x3e5   :  { %v8070_v21 = vld [vmem:[%s15016_s11 + $0x540] sm:$0xf]  ;;  %v8799_v27 = vor.u32 %v9541_v59, %v8798_v4  ;;  %v9527_v31 = vld [vmem:[%s15016_s11 + $0xa98] sm:$0xf0] }
 0x3e6   :  { %v8742_v63 = vld [vmem:[%s15016_s11 + $0xa80] sm:$0xf] }
 0x3e7   :  { %5804 = vmatpush.bf16.msrb.mxu3 %v7791_v23  ;;  %5791 = vmatpush.bf16.msra.mxu2 %v7567_v39  ;;  %v9506_v23 = vld [vmem:[%s15016_s11 + $0x9f0] sm:$0xf0]  ;;  %v9499_v39 = vld [vmem:[%s15016_s11 + $0x9b8] sm:$0xf0] }
 0x3e8   :  { %5822 = vmatpush.bf16.msrb.mxu0 %v7875_v55  ;;  %v8659_v46 = vor.u32 %v9506_v23, %v8658_v17  ;;  %v8631_v33 = vor.u32 %v9499_v39, %v8630_v38  ;;  %v9492_v55 = vld [vmem:[%s15016_s11 + $0x980] sm:$0xf0]  ;;  %v9534_v38 = vld [vmem:[%s15016_s11 + $0xad0] sm:$0xf0] }
 0x3e9   :  { %v8603_v56 = vor.u32 %v9492_v55, %v8602_v9  ;;  %v9443_v9 = vld [vmem:[%s15016_s11 + $0x7f8] sm:$0xf0]  ;;  %v9230_v55 = vld [vmem:[%s15016_s11 + $0x154] sm:$0xf] }
 0x3ea   :  { %7389 = vmatmul.msk.f32.vlgmr.msrb.gmra.mxu2 %vm2939_vm9, %v12453_v2  ;;  %7391 = vmatmul.msk.f32.vlgmr.msra.gmra.mxu3 %vm2939_vm9, %v12453_v2  ;;  %v9212_v2 = vld [vmem:[%s15016_s11 + $0xc0] sm:$0xf0] }
 0x3eb   :  { %5805 = vmatpush.bf16.msrb.mxu3 %v7763_v3  ;;  %5792 = vmatpush.bf16.msra.mxu2 %v7539_v45  ;;  %v7483_v50 = vor.u32 %v9212_v2, %v7482_v34  ;;  %v8883_v3 = vor.u32 %v9562_v58, %v8882_v61  ;;  %v9380_v45 = vld [vmem:[%s15016_s11 + $0x600] sm:$0xf0]  ;;  %v8127_v34 = vor.u32 %v9373_v53, %v8126_v43  ;;  %v9422_v43 = vld [vmem:[%s15016_s11 + $0x750] sm:$0xf0] }
 0x3ec   :  { %5823 = vmatpush.bf16.msrb.mxu0 %v7847_v20  ;;  %v8155_v32 = vor.u32 %v9380_v45, %v8154_v40  ;;  %v9485_v20 = vld [vmem:[%s15016_s11 + $0x948] sm:$0xf0]  ;;  %v9464_v2 = vld [vmem:[%s15016_s11 + $0x8a0] sm:$0xf0] }
 0x3ed   :  { %v8575_v41 = vor.u32 %v9485_v20, %v8574_v13  ;;  %v9436_v40 = vld [vmem:[%s15016_s11 + $0x7c0] sm:$0xf0]  ;;  %v7540_v13 = vld [vmem:[%s15016_s11 + $0x134] sm:$0xf0] }
 0x3ee   :  { %5833 = vmatpush.bf16.msra.mxu1 %v8155_v32  ;;  %v9223_v32 = vld [vmem:[%s15016_s11 + $0x11c] sm:$0xf] }
 0x3ef   :  { %5806 = vmatpush.bf16.msrb.mxu3 %v7735_v47  ;;  %5793 = vmatpush.bf16.msra.mxu2 %v7511_v57  ;;  %v7399_v47 = vor.u32 %v9191_v42, %v7398_v8  ;;  %v8490_v57 = vld [vmem:[%s15016_s11 + $0x888] sm:$0xf]  ;;  %v7543_v20 = vor.u32 %v9223_v32, %v7540_v13  ;;  %v9216_v8 = vld [vmem:[%s15016_s11 + $0xe4] sm:$0xf]  ;;  %v7512_v42 = vld [vmem:[%s15016_s11 + $0xfc] sm:$0xf0] }
 0x3f0   :  { %5868 = vmatpush.bf16.msra.mxu0 %v8939_v28  ;;  %v9555_v28 = vld [vmem:[%s15016_s11 + $0xb78] sm:$0xf0]  ;;  %v8491_v1 = vor.u32 %v9464_v2, %v8490_v57  ;;  %v9209_v57 = vld [vmem:[%s15016_s11 + $0xac] sm:$0xf]  ;;  %v7960_v32 = vld [vmem:[%s15016_s11 + $0x47c] sm:$0xf0] }
 0x3f1   :  { %v8855_v49 = vor.u32 %v9555_v28, %v8854_v6  ;;  %v8350_v6 = vld [vmem:[%s15016_s11 + $0x770] sm:$0xf] }
 0x3f2   :  { %5834 = vmatpush.bf16.msra.mxu1 %v8127_v34  ;;  %v7484_v34 = vld [vmem:[%s15016_s11 + $0xc4] sm:$0xf0] }
 0x3f3   :  { %5807 = vmatpush.bf16.msrb.mxu3 %v7707_v35  ;;  %5794 = vmatpush.bf16.msra.mxu2 %v7483_v50  ;;  %v8098_v35 = vld [vmem:[%s15016_s11 + $0x578] sm:$0xf]  ;;  %v8827_v50 = vor.u32 %v9548_v26, %v8826_v11  ;;  %v7487_v2 = vor.u32 %v9209_v57, %v7484_v34  ;;  %v9202_v26 = vld [vmem:[%s15016_s11 + $0x74] sm:$0xf] }
 0x3f4   :  { %5869 = vmatpush.bf16.msra.mxu0 %v8911_v7  ;;  %v9478_v7 = vld [vmem:[%s15016_s11 + $0x910] sm:$0xf0]  ;;  %v8099_v44 = vor.u32 %v9366_v24, %v8098_v35  ;;  %v7456_v35 = vld [vmem:[%s15016_s11 + $0x8c] sm:$0xf0]  ;;  %v8212_v34 = vld [vmem:[%s15016_s11 + $0x674] sm:$0xf0] }
 0x3f5   :  { %v8547_v19 = vor.u32 %v9478_v7, %v8546_v48  ;;  %v8294_v48 = vld [vmem:[%s15016_s11 + $0x700] sm:$0xf] }
 0x3f6   :  { %5835 = vmatpush.bf16.msra.mxu1 %v8099_v44  ;;  %v7459_v44 = vor.u32 %v9202_v26, %v7456_v35  ;;  %v7904_v35 = vld [vmem:[%s15016_s11 + $0x40c] sm:$0xf0] }
 0x3f7   :  { %5808 = vmatpush.bf16.msrb.mxu3 %v7679_v51  ;;  %5795 = vmatpush.bf16.msra.mxu2 %v7455_v16  ;;  %v8463_v51 = vor.u32 %v9457_v14, %v8462_v30  ;;  %v8518_v16 = vld [vmem:[%s15016_s11 + $0x8c0] sm:$0xf] }
 0x3f8   :  { %5870 = vmatpush.bf16.msra.mxu0 %v8883_v3  ;;  %v8743_v3 = vor.u32 %v9527_v31, %v8742_v63 }
 0x3fb   :  { %5809 = vmatpush.bf16.msrb.mxu3 %v7651_v18  ;;  %5796 = vmatpush.bf16.msra.mxu2 %v7427_v12  ;;  %v8519_v18 = vor.u32 %v9471_v22, %v8518_v16  ;;  %v8378_v12 = vld [vmem:[%s15016_s11 + $0x7a8] sm:$0xf]  ;;  %v7428_v16 = vld [vmem:[%s15016_s11 + $0x54] sm:$0xf0] }
 0x3fc   :  { %5871 = vmatpush.bf16.msra.mxu0 %v8855_v49  ;;  %v8379_v45 = vor.u32 %v9436_v40, %v8378_v12  ;;  %v7515_v49 = vor.u32 %v9216_v8, %v7512_v42 }
 0x3ff   :  { %5810 = vmatpush.bf16.msrb.mxu3 %v7623_v0  ;;  %5797 = vmatpush.bf16.msra.mxu2 %v7399_v47  ;;  %v8071_v0 = vor.u32 %v9359_v60, %v8070_v21  ;;  %v8322_v47 = vld [vmem:[%s15016_s11 + $0x738] sm:$0xf] }
 0x400   :  { %5872 = vmatpush.bf16.msra.mxu0 %v8827_v50  ;;  %v8323_v53 = vor.u32 %v9422_v43, %v8322_v47  ;;  %v9321_v47 = vld [vmem:[%s15016_s11 + $0x42c] sm:$0xf]  ;;  %v7932_v43 = vld [vmem:[%s15016_s11 + $0x444] sm:$0xf0] }
 0x401   :  { %5836 = vmatpush.bf16.msra.mxu1 %v8071_v0 }
 0x403   :  { %5855 = vmatpush.bf16.msra.mxu3 %v8715_v5  ;;  %5842 = vmatpush.bf16.msrb.mxu2 %v8491_v1  ;;  %v8434_v5 = vld [vmem:[%s15016_s11 + $0x818] sm:$0xf] }
 0x404   :  { %5873 = vmatpush.bf16.msra.mxu0 %v8799_v27  ;;  %v8435_v17 = vor.u32 %v9450_v29, %v8434_v5  ;;  %v9188_v5 = vld [vmem:[%s15016_s11 + $0x4] sm:$0xf]  ;;  %v7400_v29 = vld [vmem:[%s15016_s11 + $0x1c] sm:$0xf0] }
 0x407   :  { %5856 = vmatpush.bf16.msra.mxu3 %v8687_v52  ;;  %5843 = vmatpush.bf16.msrb.mxu2 %v8463_v51  ;;  %v7596_v52 = vld [vmem:[%s15016_s11 + $0x1a4] sm:$0xf0]  ;;  %v9195_v51 = vld [vmem:[%s15016_s11 + $0x3c] sm:$0xf] }
 0x408   :  { %v7599_v23 = vor.u32 %v9237_v54, %v7596_v52  ;;  %v7431_v22 = vor.u32 %v9195_v51, %v7428_v16  ;;  %v9384_v51 = vld [vmem:[%s15016_s11 + $0x624] sm:$0xf]  ;;  %v8184_v16 = vld [vmem:[%s15016_s11 + $0x63c] sm:$0xf0] }
 0x40a   :  { %5881 = vmatpush.bf16.msrb.mxu1 %v7599_v23  ;;  %v8016_v23 = vld [vmem:[%s15016_s11 + $0x4ec] sm:$0xf0] }
 0x40b   :  { %5857 = vmatpush.bf16.msra.mxu3 %v8659_v46  ;;  %v8770_v46 = vld [vmem:[%s15016_s11 + $0xab8] sm:$0xf]  ;;  %5844 = vmatpush.bf16.msrb.mxu2 %v8435_v17  ;;  %v9342_v17 = vld [vmem:[%s15016_s11 + $0x4d4] sm:$0xf] }
 0x40c   :  { %v8771_v39 = vor.u32 %v9534_v38, %v8770_v46  ;;  %v7403_v46 = vor.u32 %v9188_v5, %v7400_v29 }
 0x40e   :  { %5874 = vmatpush.bf16.msra.mxu0 %v8771_v39 }
 0x40f   :  { %5858 = vmatpush.bf16.msra.mxu3 %v8631_v33  ;;  %v8406_v33 = vld [vmem:[%s15016_s11 + $0x7e0] sm:$0xf] }
 0x410   :  { %v8407_v61 = vor.u32 %v9443_v9, %v8406_v33  ;;  %v8019_v33 = vor.u32 %v9342_v17, %v8016_v23  ;;  %v9335_v9 = vld [vmem:[%s15016_s11 + $0x49c] sm:$0xf]  ;;  %v9377_v17 = vld [vmem:[%s15016_s11 + $0x5ec] sm:$0xf]  ;;  %v8156_v23 = vld [vmem:[%s15016_s11 + $0x604] sm:$0xf0] }
 0x412   :  { %5845 = vmatpush.bf16.msrb.mxu2 %v8407_v61  ;;  %5875 = vmatpush.bf16.msra.mxu0 %v8743_v3  ;;  %v7988_v61 = vld [vmem:[%s15016_s11 + $0x4b4] sm:$0xf0] }
 0x413   :  { %5859 = vmatpush.bf16.msra.mxu3 %v8603_v56  ;;  %v7568_v56 = vld [vmem:[%s15016_s11 + $0x16c] sm:$0xf0]  ;;  %v7991_v12 = vor.u32 %v9335_v9, %v7988_v61  ;;  %v8159_v61 = vor.u32 %v9377_v17, %v8156_v23 }
 0x414   :  { %v7571_v58 = vor.u32 %v9230_v55, %v7568_v56  ;;  %v9405_v56 = vld [vmem:[%s15016_s11 + $0x6cc] sm:$0xf] }
 0x416   :  { %5882 = vmatpush.bf16.msrb.mxu1 %v7571_v58  ;;  %5846 = vmatpush.bf16.msrb.mxu2 %v8379_v45  ;;  %v9328_v45 = vld [vmem:[%s15016_s11 + $0x464] sm:$0xf] }
 0x417   :  { %5860 = vmatpush.bf16.msra.mxu3 %v8575_v41  ;;  %v9429_v41 = vld [vmem:[%s15016_s11 + $0x788] sm:$0xf0]  ;;  %v7963_v42 = vor.u32 %v9328_v45, %v7960_v32  ;;  %v8128_v45 = vld [vmem:[%s15016_s11 + $0x5cc] sm:$0xf0] }
 0x418   :  { %v8351_v28 = vor.u32 %v9429_v41, %v8350_v6  ;;  %v9398_v6 = vld [vmem:[%s15016_s11 + $0x694] sm:$0xf]  ;;  %v8240_v41 = vld [vmem:[%s15016_s11 + $0x6ac] sm:$0xf0]  ;;  %v9573_v32 = vld [vmem:[%s15016_s11 + $0xc0c] sm:$0xf] }
 0x41a   :  { %5883 = vmatpush.bf16.msrb.mxu1 %v7543_v20  ;;  %5847 = vmatpush.bf16.msrb.mxu2 %v8351_v28 }
 0x41b   :  { %5861 = vmatpush.bf16.msra.mxu3 %v8547_v19  ;;  %v9415_v19 = vld [vmem:[%s15016_s11 + $0x718] sm:$0xf0] }
 0x41c   :  { %v8295_v50 = vor.u32 %v9415_v19, %v8294_v48  ;;  %v7935_v19 = vor.u32 %v9321_v47, %v7932_v43 }
 0x41e   :  { %5884 = vmatpush.bf16.msrb.mxu1 %v7515_v49  ;;  %5848 = vmatpush.bf16.msrb.mxu2 %v8323_v53  ;;  %v8243_v49 = vor.u32 %v9398_v6, %v8240_v41  ;;  %v9279_v41 = vld [vmem:[%s15016_s11 + $0x2dc] sm:$0xf] }
 0x41f   :  { %5862 = vmatpush.bf16.msra.mxu3 %v8519_v18  ;;  %v9349_v18 = vld [vmem:[%s15016_s11 + $0x50c] sm:$0xf] }
 0x422   :  { %5885 = vmatpush.bf16.msrb.mxu1 %v7487_v2  ;;  %5849 = vmatpush.bf16.msrb.mxu2 %v8295_v50 }
 0x426   :  { %5886 = vmatpush.bf16.msrb.mxu1 %v7459_v44 }
 0x42a   :  { %5887 = vmatpush.bf16.msrb.mxu1 %v7431_v22 }
 0x42e   :  { %5888 = vmatpush.bf16.msrb.mxu1 %v7403_v46 }
 0x44b   :  { %v3165_v1 = vpop.f32.mrf.mxu0  ;;  %v3185_v59 = vpop.f32.mrf.mxu1 }
 0x44c   :  { %v3283_v30 = vperm.slane %v3165_v1, 0  ;;  %v3284_v38 = vperm.slane %v3185_v59, 0  ;;  %v7820_v59 = vld [vmem:[%s15016_s11 + $0x364] sm:$0xf0] }
 0x44d   :  { %v12841_v7 = vpop.f32.mrf.mxu2  ;;  %v2994_v11 = vpop.f32.mrf.mxu3 }
 0x44e   :  { %v3269_v24 = vperm.slane %v2994_v11, 0  ;;  %v3268_v53 = vperm.slane %v12841_v7, 0  ;;  %v9314_v7 = vld [vmem:[%s15016_s11 + $0x3f4] sm:$0xf] }
 0x450   :  { %v3276_v14 = vmul.f32 %v3269_v24, %v11736_v15  ;;  %v8044_v15 = vld [vmem:[%s15016_s11 + $0x524] sm:$0xf0] }
 0x451   :  { %v8047_v0 = vor.u32 %v9349_v18, %v8044_v15  ;;  %v15116_v24 = vld [vmem:[#allocation2_spill] sm:$0xff] }
 0x452   :  { %v3290_v4 = vadd.f32 %v3283_v30, %v3276_v14  ;;  %v3275_v50 = vmul.f32 %v3268_v53, %v15116_v24  ;;  %v9293_v15 = vld [vmem:[%s15016_s11 + $0x34c] sm:$0xf]  ;;  %v8464_v24 = vld [vmem:[%s15016_s11 + $0x86c] sm:$0xf0] }
 0x453   :  { %v3245_v58 = vpop.f32.mrf.mxu0  ;;  %v3265_v2 = vpop.f32.mrf.mxu1  ;;  %v7823_v46 = vor.u32 %v9293_v15, %v7820_v59  ;;  %v8884_v15 = vld [vmem:[%s15016_s11 + $0xbb4] sm:$0xf0]  ;;  %v7602_v59 = vld [vmem:[%s15016_s11 + $0x190] sm:$0xf] }
 0x454   :  { %v3297_v21 = vmax.f32 %v3290_v4, 0.0  ;;  %v3287_v28 = vperm.slane %v3245_v58, 0  ;;  %v3288_v22 = vperm.slane %v3265_v2, 0  ;;  %v9370_v58 = vld [vmem:[%s15016_s11 + $0x5b4] sm:$0xf] }
 0x455   :  { %v3014_v60 = vpop.f32.mrf.mxu2  ;;  %v12865_v27 = vpop.f32.mrf.mxu3  ;;  %v8131_v43 = vor.u32 %v9370_v58, %v8128_v45  ;;  %v9258_v58 = vld [vmem:[%s15016_s11 + $0x234] sm:$0xf]  ;;  %v9545_v45 = vld [vmem:[%s15016_s11 + $0xb2c] sm:$0xf] }
 0x456   :  { %v12873_v54 = vpack.c.bf16 %v3297_v21, %v3297_v21  ;;  %v3270_v52 = vperm.slane %v3014_v60, 0  ;;  %v7907_v21 = vor.u32 %v9314_v7, %v7904_v35  ;;  %v8187_v60 = vor.u32 %v9384_v51, %v8184_v16  ;;  %v9454_v35 = vld [vmem:[%s15016_s11 + $0x854] sm:$0xf]  ;;  %v9356_v51 = vld [vmem:[%s15016_s11 + $0x544] sm:$0xf] }
 0x457   :  { %v3271_v5 = vperm.slane %v12865_v27, 0  ;;  %v7792_v27 = vld [vmem:[%s15016_s11 + $0x32c] sm:$0xf0]  ;;  %v8072_v16 = vld [vmem:[%s15016_s11 + $0x55c] sm:$0xf0] }
 0x458   :  { %v3277_v39 = vmul.f32 %v3270_v52, %v15093_v36  ;;  %5811 = vmatmul.bf16.vlgmr.msrb.gmra.mxu3 %v12873_v54  ;;  %v8268_v36 = vld [vmem:[%s15016_s11 + $0x6e4] sm:$0xf0] }
 0x459   :  { %5907 = vmatpush.bf16.msrb.mxu3 %v8047_v0  ;;  %v8271_v40 = vor.u32 %v9405_v56, %v8268_v36  ;;  %v9307_v0 = vld [vmem:[%s15016_s11 + $0x3bc] sm:$0xf]  ;;  %v9300_v56 = vld [vmem:[%s15016_s11 + $0x384] sm:$0xf]  ;;  %v7848_v36 = vld [vmem:[%s15016_s11 + $0x39c] sm:$0xf0] }
 0x45a   :  { %v3291_v55 = vadd.f32 %v3284_v38, %v3277_v39  ;;  %v7851_v47 = vor.u32 %v9300_v56, %v7848_v36  ;;  %v8408_v56 = vld [vmem:[%s15016_s11 + $0x7fc] sm:$0xf0] }
 0x45c   :  { %v3298_v63 = vmax.f32 %v3291_v55, 0.0 }
 0x45d   :  { %5908 = vmatpush.bf16.msrb.mxu3 %v8019_v33  ;;  %v12895_v31 = vpop.f32.mrf.mxu2  ;;  %v3074_v3 = vpop.f32.mrf.mxu3  ;;  %v9286_v33 = vld [vmem:[%s15016_s11 + $0x314] sm:$0xf] }
 0x45e   :  { %v12903_v13 = vpack.c.bf16 %v3298_v63, %v3298_v63  ;;  %v3273_v20 = vperm.slane %v3074_v3, 0  ;;  %v3278_v63 = vmul.f32 %v3271_v5, %v15113_v62  ;;  %v7795_v6 = vor.u32 %v9286_v33, %v7792_v27  ;;  %v8940_v62 = vld [vmem:[%s15016_s11 + $0xc24] sm:$0xf0]  ;;  %v8856_v33 = vld [vmem:[%s15016_s11 + $0xb7c] sm:$0xf0] }
 0x45f   :  { %v8075_v5 = vor.u32 %v9356_v51, %v8072_v16  ;;  %v7574_v27 = vld [vmem:[%s15016_s11 + $0x158] sm:$0xf]  ;;  %v9213_v51 = vld [vmem:[%s15016_s11 + $0xc8] sm:$0xf0] }
 0x460   :  { %v3280_v8 = vmul.f32 %v3273_v20, %v12369_v37  ;;  %5824 = vmatmul.bf16.vlgmr.msrb.gmra.mxu0 %v12903_v13  ;;  %v9391_v37 = vld [vmem:[%s15016_s11 + $0x65c] sm:$0xf]  ;;  %v3272_v20 = vperm.slane %v12895_v31, 0  ;;  %v9461_v31 = vld [vmem:[%s15016_s11 + $0x88c] sm:$0xf] }
 0x461   :  { %5909 = vmatpush.bf16.msrb.mxu3 %v7991_v12  ;;  %5920 = vmatpush.bf16.msrb.mxu0 %v8271_v40  ;;  %v8215_v26 = vor.u32 %v9391_v37, %v8212_v34  ;;  %v9363_v37 = vld [vmem:[%s15016_s11 + $0x57c] sm:$0xf]  ;;  %v8100_v34 = vld [vmem:[%s15016_s11 + $0x594] sm:$0xf0] }
 0x462   :  { %v3294_v57 = vadd.f32 %v3287_v28, %v3280_v8  ;;  %v7764_v8 = vld [vmem:[%s15016_s11 + $0x2f4] sm:$0xf0]  ;;  %v3279_v2 = vmul.f32 %v3272_v20, %v12267_v25  ;;  %v7736_v25 = vld [vmem:[%s15016_s11 + $0x2bc] sm:$0xf0]  ;;  %v8828_v20 = vld [vmem:[%s15016_s11 + $0xb44] sm:$0xf0] }
 0x464   :  { %v3301_v1 = vmax.f32 %v3294_v57, 0.0  ;;  %v8943_v57 = vor.u32 %v9573_v32, %v8940_v62  ;;  %v9227_v62 = vld [vmem:[%s15016_s11 + $0x138] sm:$0xf0] }
 0x465   :  { %5910 = vmatpush.bf16.msrb.mxu3 %v7963_v42  ;;  %5921 = vmatpush.bf16.msrb.mxu0 %v8243_v49  ;;  %v3094_v48 = vpop.f32.mrf.mxu2  ;;  %v3145_v11 = vpop.f32.mrf.mxu3  ;;  %v8492_v42 = vld [vmem:[%s15016_s11 + $0x8a4] sm:$0xf0] }
 0x466   :  { %v12933_v44 = vpack.c.bf16 %v3301_v1, %v3301_v1  ;;  %v3274_v30 = vperm.slane %v3094_v48, 0  ;;  %v3282_v14 = vperm.slane %v3145_v11, 0  ;;  %v7767_v1 = vor.u32 %v9279_v41, %v7764_v8  ;;  %v9566_v11 = vld [vmem:[%s15016_s11 + $0xbd4] sm:$0xf]  ;;  %v7652_v8 = vld [vmem:[%s15016_s11 + $0x214] sm:$0xf0] }
 0x467   :  { %v8495_v48 = vor.u32 %v9461_v31, %v8492_v42  ;;  %v9433_v31 = vld [vmem:[%s15016_s11 + $0x7ac] sm:$0xf]  ;;  %v8380_v42 = vld [vmem:[%s15016_s11 + $0x7c4] sm:$0xf0] }
 0x468   :  { %v3281_v4 = vmul.f32 %v3274_v30, %v12407_v10  ;;  %v3289_v18 = vadd.f32 %v3282_v14, %v3275_v50  ;;  %5863 = vmatmul.bf16.vlgmr.msra.gmra.mxu3 %v12933_v44  ;;  %v7876_v10 = vld [vmem:[%s15016_s11 + $0x3d4] sm:$0xf0]  ;;  %v8103_v30 = vor.u32 %v9363_v37, %v8100_v34  ;;  %v9220_v37 = vld [vmem:[%s15016_s11 + $0x100] sm:$0xf0] }
 0x469   :  { %5911 = vmatpush.bf16.msrb.mxu3 %v7935_v19  ;;  %5922 = vmatpush.bf16.msrb.mxu0 %v8215_v26  ;;  %v7879_v55 = vor.u32 %v9307_v0, %v7876_v10  ;;  %v8912_v19 = vld [vmem:[%s15016_s11 + $0xbec] sm:$0xf0]  ;;  %v9272_v26 = vld [vmem:[%s15016_s11 + $0x2a4] sm:$0xf]  ;;  %v8436_v0 = vld [vmem:[%s15016_s11 + $0x834] sm:$0xf0] }
 0x46a   :  { %v3295_v29 = vadd.f32 %v3288_v22, %v3281_v4  ;;  %v3296_v52 = vmax.f32 %v3289_v18, 0.0  ;;  %v8915_v14 = vor.u32 %v9566_v11, %v8912_v19  ;;  %v9559_v22 = vld [vmem:[%s15016_s11 + $0xb9c] sm:$0xf]  ;;  %v7739_v4 = vor.u32 %v9272_v26, %v7736_v25  ;;  %v9426_v11 = vld [vmem:[%s15016_s11 + $0x774] sm:$0xf] }
 0x46b   :  { %v8467_v18 = vor.u32 %v9454_v35, %v8464_v24  ;;  %v8887_v17 = vor.u32 %v9559_v22, %v8884_v15  ;;  %v8352_v19 = vld [vmem:[%s15016_s11 + $0x78c] sm:$0xf0]  ;;  %v9517_v35 = vld [vmem:[%s15016_s11 + $0xa4c] sm:$0xf]  ;;  %v8716_v24 = vld [vmem:[%s15016_s11 + $0xa64] sm:$0xf0] }
 0x46c   :  { %v3302_v38 = vmax.f32 %v3295_v29, 0.0  ;;  %v12962_v39 = vpack.c.bf16 %v3296_v52, %v3296_v52  ;;  %v9265_v29 = vld [vmem:[%s15016_s11 + $0x26c] sm:$0xf]  ;;  %v7708_v52 = vld [vmem:[%s15016_s11 + $0x284] sm:$0xf0]  ;;  %v8355_v22 = vor.u32 %v9426_v11, %v8352_v19 }
 0x46d   :  { %5912 = vmatpush.bf16.msrb.mxu3 %v7907_v21  ;;  %5923 = vmatpush.bf16.msrb.mxu0 %v8187_v60  ;;  %v3205_v9 = vpop.f32.mrf.mxu2  ;;  %v3225_v40 = vpop.f32.mrf.mxu3  ;;  %v9241_v21 = vld [vmem:[%s15016_s11 + $0x1a8] sm:$0xf0]  ;;  %v9447_v60 = vld [vmem:[%s15016_s11 + $0x81c] sm:$0xf]  ;;  %v8324_v15 = vld [vmem:[%s15016_s11 + $0x754] sm:$0xf0] }
 0x46e   :  { %v12980_v3 = vpack.c.bf16 %v3302_v38, %v3302_v38  ;;  %v3285_v12 = vperm.slane %v3205_v9, 0  ;;  %5798 = vmatmul.bf16.vlgmr.msra.gmra.mxu2 %v12962_v39  ;;  %v3286_v49 = vperm.slane %v3225_v40, 0  ;;  %v7603_v23 = vor.u32 %v9241_v21, %v7602_v59  ;;  %v9234_v9 = vld [vmem:[%s15016_s11 + $0x170] sm:$0xf0]  ;;  %v9489_v11 = vld [vmem:[%s15016_s11 + $0x96c] sm:$0xf] }
 0x46f   :  { %5894 = vmatpush.bf16.msra.mxu2 %v7823_v46  ;;  %v9552_v46 = vld [vmem:[%s15016_s11 + $0xb64] sm:$0xf]  ;;  %v8439_v38 = vor.u32 %v9447_v60, %v8436_v0  ;;  %v7575_v40 = vor.u32 %v9234_v9, %v7574_v27  ;;  %v9510_v60 = vld [vmem:[%s15016_s11 + $0xa14] sm:$0xf]  ;;  %v8688_v0 = vld [vmem:[%s15016_s11 + $0xa2c] sm:$0xf0] }
 0x470   :  { %v3292_v28 = vadd.f32 %v3285_v12, %v3278_v63  ;;  %5876 = vmatmul.bf16.vlgmr.msra.gmra.mxu0 %v12980_v3  ;;  %v3293_v50 = vadd.f32 %v3286_v49, %v3279_v2  ;;  %v7680_v63 = vld [vmem:[%s15016_s11 + $0x24c] sm:$0xf0]  ;;  %v8859_v12 = vor.u32 %v9552_v46, %v8856_v33  ;;  %v8831_v49 = vor.u32 %v9545_v45, %v8828_v20  ;;  %v9409_v46 = vld [vmem:[%s15016_s11 + $0x6e8] sm:$0xf0]  ;;  %v9412_v33 = vld [vmem:[%s15016_s11 + $0x704] sm:$0xf] }
 0x471   :  { %5913 = vmatpush.bf16.msrb.mxu3 %v7879_v55  ;;  %5924 = vmatpush.bf16.msrb.mxu0 %v8159_v61  ;;  %v7711_v55 = vor.u32 %v9265_v29, %v7708_v52  ;;  %v9440_v61 = vld [vmem:[%s15016_s11 + $0x7e4] sm:$0xf]  ;;  %v7683_v41 = vor.u32 %v9258_v58, %v7680_v63  ;;  %v8383_v2 = vor.u32 %v9433_v31, %v8380_v42  ;;  %v7462_v29 = vld [vmem:[%s15016_s11 + $0x78] sm:$0xf]  ;;  %v9206_v52 = vld [vmem:[%s15016_s11 + $0x90] sm:$0xf0] }
 0x472   :  { %v3299_v53 = vmax.f32 %v3292_v28, 0.0  ;;  %v3300_v10 = vmax.f32 %v3293_v50, 0.0  ;;  %v8411_v32 = vor.u32 %v9440_v61, %v8408_v56  ;;  %v9251_v28 = vld [vmem:[%s15016_s11 + $0x1fc] sm:$0xf]  ;;  %v8296_v27 = vld [vmem:[%s15016_s11 + $0x71c] sm:$0xf0]  ;;  %v7463_v61 = vor.u32 %v9206_v52, %v7462_v29 }
 0x473   :  { %5895 = vmatpush.bf16.msra.mxu2 %v7795_v6  ;;  %v7546_v6 = vld [vmem:[%s15016_s11 + $0x120] sm:$0xf]  ;;  %v7655_v34 = vor.u32 %v9251_v28, %v7652_v8  ;;  %v9531_v50 = vld [vmem:[%s15016_s11 + $0xabc] sm:$0xf]  ;;  %v8660_v56 = vld [vmem:[%s15016_s11 + $0x9f4] sm:$0xf0] }
 0x474   :  { %v13022_v7 = vpack.c.bf16 %v3299_v53, %v3299_v53  ;;  %v13083_v36 = vpack.c.bf16 %v3300_v10, %v3300_v10  ;;  %v8800_v53 = vld [vmem:[%s15016_s11 + $0xb0c] sm:$0xf0]  ;;  %v9524_v10 = vld [vmem:[%s15016_s11 + $0xa84] sm:$0xf]  ;;  %v9503_v9 = vld [vmem:[%s15016_s11 + $0x9dc] sm:$0xf] }
 0x475   :  { %5914 = vmatpush.bf16.msrb.mxu3 %v7851_v47  ;;  %5925 = vmatpush.bf16.msrb.mxu0 %v8131_v43  ;;  %v7547_v47 = vor.u32 %v9227_v62, %v7546_v6  ;;  %v9538_v43 = vld [vmem:[%s15016_s11 + $0xaf4] sm:$0xf]  ;;  %v7826_v58 = vld [vmem:[%s15016_s11 + $0x350] sm:$0xf]  ;;  %v9297_v63 = vld [vmem:[%s15016_s11 + $0x368] sm:$0xf0]  ;;  %v8663_v62 = vor.u32 %v9503_v9, %v8660_v56 }
 0x476   :  { %5837 = vmatmul.bf16.vlgmr.msra.gmra.mxu1 %v13022_v7  ;;  %v8803_v26 = vor.u32 %v9538_v43, %v8800_v53  ;;  %v9199_v45 = vld [vmem:[%s15016_s11 + $0x58] sm:$0xf0]  ;;  %v8246_v20 = vld [vmem:[%s15016_s11 + $0x698] sm:$0xf]  ;;  %v9402_v6 = vld [vmem:[%s15016_s11 + $0x6b0] sm:$0xf0] }
 0x477   :  { %5896 = vmatpush.bf16.msra.mxu2 %v7767_v1  ;;  %5933 = vmatpush.bf16.msra.mxu1 %v8495_v48  ;;  %v9244_v1 = vld [vmem:[%s15016_s11 + $0x1c4] sm:$0xf]  ;;  %v7624_v48 = vld [vmem:[%s15016_s11 + $0x1dc] sm:$0xf0]  ;;  %v7798_v42 = vld [vmem:[%s15016_s11 + $0x318] sm:$0xf] }
 0x478   :  { %5915 = vmatmul.bf16.vlgmr.msrb.gmra.mxu3 %v12903_v13  ;;  %v7627_v16 = vor.u32 %v9244_v1, %v7624_v48  ;;  %v9496_v28 = vld [vmem:[%s15016_s11 + $0x9a4] sm:$0xf]  ;;  %v8632_v31 = vld [vmem:[%s15016_s11 + $0x9bc] sm:$0xf0]  ;;  %v7406_v43 = vld [vmem:[%s15016_s11 + $0x8] sm:$0xf] }
 0x479   :  { %5959 = vmatpush.bf16.msra.mxu3 %v8943_v57  ;;  %5926 = vmatpush.bf16.msrb.mxu0 %v8103_v30  ;;  %v7518_v57 = vld [vmem:[%s15016_s11 + $0xe8] sm:$0xf]  ;;  %v8772_v30 = vld [vmem:[%s15016_s11 + $0xad4] sm:$0xf0]  ;;  %v9192_v53 = vld [vmem:[%s15016_s11 + $0x20] sm:$0xf0]  ;;  %v8635_v1 = vor.u32 %v9496_v28, %v8632_v31 }
 0x47a   :  { %v7519_v25 = vor.u32 %v9220_v37, %v7518_v57  ;;  %v8775_v59 = vor.u32 %v9531_v50, %v8772_v30  ;;  %v8218_v57 = vld [vmem:[%s15016_s11 + $0x660] sm:$0xf]  ;;  %v9395_v37 = vld [vmem:[%s15016_s11 + $0x678] sm:$0xf0]  ;;  %v7407_v19 = vor.u32 %v9192_v53, %v7406_v43  ;;  %v8190_v30 = vld [vmem:[%s15016_s11 + $0x628] sm:$0xf] }
 0x47b   :  { %5897 = vmatpush.bf16.msra.mxu2 %v7739_v4  ;;  %5934 = vmatpush.bf16.msra.mxu1 %v8467_v18  ;;  %v8719_v4 = vor.u32 %v9517_v35, %v8716_v24  ;;  %v9419_v18 = vld [vmem:[%s15016_s11 + $0x73c] sm:$0xf]  ;;  %v8219_v24 = vor.u32 %v9395_v37, %v8218_v57  ;;  %v8442_v29 = vld [vmem:[%s15016_s11 + $0x820] sm:$0xf]  ;;  %v9374_v56 = vld [vmem:[%s15016_s11 + $0x5d0] sm:$0xf0] }
 0x47c   :  { %v9283_v35 = vld [vmem:[%s15016_s11 + $0x2f8] sm:$0xf0]  ;;  %v8050_v28 = vld [vmem:[%s15016_s11 + $0x510] sm:$0xf]  ;;  %v8106_v31 = vld [vmem:[%s15016_s11 + $0x580] sm:$0xf] }
 0x47d   :  { %5960 = vmatpush.bf16.msra.mxu3 %v8915_v14  ;;  %5927 = vmatpush.bf16.msrb.mxu0 %v8075_v5  ;;  %v7490_v14 = vld [vmem:[%s15016_s11 + $0xb0] sm:$0xf]  ;;  %v8744_v5 = vld [vmem:[%s15016_s11 + $0xa9c] sm:$0xf0]  ;;  %v9451_v52 = vld [vmem:[%s15016_s11 + $0x838] sm:$0xf0] }
 0x47e   :  { %5850 = vmatmul.bf16.vlgmr.msrb.gmra.mxu2 %v13083_v36  ;;  %v7491_v21 = vor.u32 %v9213_v51, %v7490_v14  ;;  %v9388_v14 = vld [vmem:[%s15016_s11 + $0x640] sm:$0xf0]  ;;  %v8470_v51 = vld [vmem:[%s15016_s11 + $0x858] sm:$0xf]  ;;  %v7658_v37 = vld [vmem:[%s15016_s11 + $0x200] sm:$0xf] }
 0x47f   :  { %5935 = vmatpush.bf16.msra.mxu1 %v8439_v38  ;;  %5898 = vmatpush.bf16.msra.mxu2 %v7711_v55  ;;  %v8691_v38 = vor.u32 %v9510_v60, %v8688_v0  ;;  %v8747_v55 = vor.u32 %v9524_v10, %v8744_v5  ;;  %v8191_v60 = vor.u32 %v9388_v14, %v8190_v30  ;;  %v8162_v10 = vld [vmem:[%s15016_s11 + $0x5f0] sm:$0xf]  ;;  %v9381_v5 = vld [vmem:[%s15016_s11 + $0x608] sm:$0xf0] }
 0x480   :  { %5928 = vmatmul.bf16.vlgmr.msrb.gmra.mxu0 %v13022_v7  ;;  %v8163_v9 = vor.u32 %v9381_v5, %v8162_v10  ;;  %v7604_v30 = vld [vmem:[%s15016_s11 + $0x1ac] sm:$0xf0]  ;;  %v9423_v10 = vld [vmem:[%s15016_s11 + $0x758] sm:$0xf0] }
 0x481   :  { %5961 = vmatpush.bf16.msra.mxu3 %v8887_v17  ;;  %5972 = vmatpush.bf16.msra.mxu0 %v7603_v23  ;;  %v8327_v17 = vor.u32 %v9419_v18, %v8324_v15  ;;  %v8274_v23 = vld [vmem:[%s15016_s11 + $0x6d0] sm:$0xf]  ;;  %v9482_v18 = vld [vmem:[%s15016_s11 + $0x934] sm:$0xf] }
 0x482   :  { %v8576_v15 = vld [vmem:[%s15016_s11 + $0x94c] sm:$0xf0] }
 0x483   :  { %5936 = vmatpush.bf16.msra.mxu1 %v8411_v32  ;;  %5899 = vmatpush.bf16.msra.mxu2 %v7683_v41  ;;  %v8299_v32 = vor.u32 %v9412_v33, %v8296_v27  ;;  %v7827_v41 = vor.u32 %v9297_v63, %v7826_v58  ;;  %v7714_v33 = vld [vmem:[%s15016_s11 + $0x270] sm:$0xf]  ;;  %v9269_v27 = vld [vmem:[%s15016_s11 + $0x288] sm:$0xf0]  ;;  %v8414_v58 = vld [vmem:[%s15016_s11 + $0x7e8] sm:$0xf] }
 0x484   :  { %v9444_v63 = vld [vmem:[%s15016_s11 + $0x800] sm:$0xf0] }
 0x485   :  { %5962 = vmatpush.bf16.msra.mxu3 %v8859_v12  ;;  %5973 = vmatpush.bf16.msra.mxu0 %v7575_v40  ;;  %v8275_v12 = vor.u32 %v9409_v46, %v8274_v23  ;;  %v7434_v40 = vld [vmem:[%s15016_s11 + $0x40] sm:$0xf]  ;;  %v9475_v46 = vld [vmem:[%s15016_s11 + $0x8fc] sm:$0xf] }
 0x486   :  { %5889 = vmatmul.bf16.vlgmr.msrb.gmra.mxu1 %v12962_v39  ;;  %v7435_v8 = vor.u32 %v9199_v45, %v7434_v40  ;;  %v7715_v40 = vor.u32 %v9269_v27, %v7714_v33  ;;  %v9468_v45 = vld [vmem:[%s15016_s11 + $0x8c4] sm:$0xf]  ;;  %v8694_v27 = vld [vmem:[%s15016_s11 + $0xa18] sm:$0xf] }
 0x487   :  { %5900 = vmatpush.bf16.msra.mxu2 %v7655_v34  ;;  %5937 = vmatpush.bf16.msra.mxu1 %v8383_v2  ;;  %v8498_v34 = vld [vmem:[%s15016_s11 + $0x890] sm:$0xf]  ;;  %v9465_v2 = vld [vmem:[%s15016_s11 + $0x8a8] sm:$0xf0]  ;;  %v9332_v33 = vld [vmem:[%s15016_s11 + $0x480] sm:$0xf0] }
 0x488   :  { %v8499_v50 = vor.u32 %v9465_v2, %v8498_v34  ;;  %v9255_v34 = vld [vmem:[%s15016_s11 + $0x218] sm:$0xf0] }
 0x489   :  { %5963 = vmatpush.bf16.msra.mxu3 %v8831_v49  ;;  %5974 = vmatpush.bf16.msra.mxu0 %v7547_v47  ;;  %v9290_v49 = vld [vmem:[%s15016_s11 + $0x330] sm:$0xf0]  ;;  %v8247_v47 = vor.u32 %v9402_v6, %v8246_v20  ;;  %v7686_v20 = vld [vmem:[%s15016_s11 + $0x238] sm:$0xf] }
 0x48a   :  { %v7799_v48 = vor.u32 %v9290_v49, %v7798_v42  ;;  %v9262_v6 = vld [vmem:[%s15016_s11 + $0x250] sm:$0xf0]  ;;  %v9367_v42 = vld [vmem:[%s15016_s11 + $0x598] sm:$0xf0]  ;;  %v8386_v49 = vld [vmem:[%s15016_s11 + $0x7b0] sm:$0xf] }
 0x48b   :  { %5901 = vmatpush.bf16.msra.mxu2 %v7627_v16  ;;  %5938 = vmatpush.bf16.msra.mxu1 %v8355_v22  ;;  %v9458_v16 = vld [vmem:[%s15016_s11 + $0x870] sm:$0xf0]  ;;  %v7687_v53 = vor.u32 %v9262_v6, %v7686_v20  ;;  %v8107_v2 = vor.u32 %v9367_v42, %v8106_v31  ;;  %v7938_v20 = vld [vmem:[%s15016_s11 + $0x430] sm:$0xf]  ;;  %v9217_v42 = vld [vmem:[%s15016_s11 + $0xec] sm:$0xf] }
 0x48c   :  { %v8471_v0 = vor.u32 %v9458_v16, %v8470_v51  ;;  %v7630_v51 = vld [vmem:[%s15016_s11 + $0x1c8] sm:$0xf]  ;;  %v9248_v16 = vld [vmem:[%s15016_s11 + $0x1e0] sm:$0xf0] }
 0x48d   :  { %5964 = vmatpush.bf16.msra.mxu3 %v8803_v26  ;;  %5975 = vmatpush.bf16.msra.mxu0 %v7519_v25  ;;  %v8604_v26 = vld [vmem:[%s15016_s11 + $0x984] sm:$0xf0]  ;;  %v7770_v25 = vld [vmem:[%s15016_s11 + $0x2e0] sm:$0xf]  ;;  %v7631_v5 = vor.u32 %v9248_v16, %v7630_v51  ;;  %v8610_v51 = vld [vmem:[%s15016_s11 + $0x970] sm:$0xf] }
 0x48e   :  { %5902 = vmatmul.bf16.vlgmr.msra.gmra.mxu2 %v12873_v54  ;;  %v8607_v22 = vor.u32 %v9489_v11, %v8604_v26  ;;  %v9346_v11 = vld [vmem:[%s15016_s11 + $0x4f0] sm:$0xf0]  ;;  %v9360_v26 = vld [vmem:[%s15016_s11 + $0x560] sm:$0xf0]  ;;  %v9493_v16 = vld [vmem:[%s15016_s11 + $0x988] sm:$0xf0] }
 0x48f   :  { %5946 = vmatpush.bf16.msrb.mxu2 %v8719_v4  ;;  %5939 = vmatpush.bf16.msra.mxu1 %v8327_v17  ;;  %v7771_v4 = vor.u32 %v9283_v35, %v7770_v25  ;;  %v8579_v17 = vor.u32 %v9482_v18, %v8576_v15  ;;  %v8358_v25 = vld [vmem:[%s15016_s11 + $0x778] sm:$0xf]  ;;  %v9430_v35 = vld [vmem:[%s15016_s11 + $0x790] sm:$0xf0]  ;;  %v9339_v15 = vld [vmem:[%s15016_s11 + $0x4b8] sm:$0xf0] }
 0x490   :  { %v8359_v18 = vor.u32 %v9430_v35, %v8358_v25  ;;  %v9280_v25 = vld [vmem:[%s15016_s11 + $0x2e4] sm:$0xf]  ;;  %v7772_v35 = vld [vmem:[%s15016_s11 + $0x2fc] sm:$0xf0] }
 0x491   :  { %5965 = vmatpush.bf16.msra.mxu3 %v8775_v59  ;;  %5976 = vmatpush.bf16.msra.mxu0 %v7491_v21  ;;  %v7742_v59 = vld [vmem:[%s15016_s11 + $0x2a8] sm:$0xf]  ;;  %v9276_v21 = vld [vmem:[%s15016_s11 + $0x2c0] sm:$0xf0] }
 0x492   :  { %v7743_v23 = vor.u32 %v9276_v21, %v7742_v59  ;;  %v8722_v59 = vld [vmem:[%s15016_s11 + $0xa50] sm:$0xf]  ;;  %v9521_v21 = vld [vmem:[%s15016_s11 + $0xa68] sm:$0xf0] }
 0x493   :  { %5947 = vmatpush.bf16.msrb.mxu2 %v8691_v38  ;;  %5940 = vmatpush.bf16.msra.mxu1 %v8299_v32  ;;  %v8548_v38 = vld [vmem:[%s15016_s11 + $0x914] sm:$0xf0]  ;;  %v8520_v32 = vld [vmem:[%s15016_s11 + $0x8dc] sm:$0xf0] }
 0x494   :  { %v8523_v43 = vor.u32 %v9468_v45, %v8520_v32 }
 0x495   :  { %5966 = vmatpush.bf16.msra.mxu3 %v8747_v55  ;;  %5977 = vmatpush.bf16.msra.mxu0 %v7463_v61  ;;  %v8443_v55 = vor.u32 %v9451_v52, %v8442_v29  ;;  %v8134_v61 = vld [vmem:[%s15016_s11 + $0x5b8] sm:$0xf]  ;;  %v9231_v29 = vld [vmem:[%s15016_s11 + $0x15c] sm:$0xf] }
 0x496   :  { %5941 = vmatmul.bf16.vlgmr.msra.gmra.mxu1 %v13083_v36  ;;  %v7576_v52 = vld [vmem:[%s15016_s11 + $0x174] sm:$0xf0] }
 0x497   :  { %5948 = vmatpush.bf16.msrb.mxu2 %v8663_v62  ;;  %5985 = vmatpush.bf16.msrb.mxu1 %v7827_v41  ;;  %v8135_v62 = vor.u32 %v9374_v56, %v8134_v61  ;;  %v8415_v41 = vor.u32 %v9444_v63, %v8414_v58  ;;  %v8302_v61 = vld [vmem:[%s15016_s11 + $0x708] sm:$0xf]  ;;  %v9416_v56 = vld [vmem:[%s15016_s11 + $0x720] sm:$0xf0]  ;;  %v7548_v63 = vld [vmem:[%s15016_s11 + $0x13c] sm:$0xf0] }
 0x498   :  { %5967 = vmatmul.bf16.vlgmr.msra.gmra.mxu3 %v12980_v3  ;;  %v9224_v58 = vld [vmem:[%s15016_s11 + $0x124] sm:$0xf]  ;;  %v8303_v6 = vor.u32 %v9416_v56, %v8302_v61 }
 0x499   :  { %6011 = vmatpush.bf16.msrb.mxu3 %v8275_v12  ;;  %5978 = vmatpush.bf16.msra.mxu0 %v7435_v8  ;;  %v8551_v12 = vor.u32 %v9475_v46, %v8548_v38  ;;  %v9353_v8 = vld [vmem:[%s15016_s11 + $0x528] sm:$0xf0]  ;;  %v7966_v46 = vld [vmem:[%s15016_s11 + $0x468] sm:$0xf] }
 0x49a   :  { %v8051_v57 = vor.u32 %v9353_v8, %v8050_v28  ;;  %v7967_v45 = vor.u32 %v9332_v33, %v7966_v46  ;;  %v9507_v28 = vld [vmem:[%s15016_s11 + $0x9f8] sm:$0xf0]  ;;  %v7551_v8 = vor.u32 %v9224_v58, %v7548_v63  ;;  %v8946_v46 = vld [vmem:[%s15016_s11 + $0xc10] sm:$0xf]  ;;  %v9196_v33 = vld [vmem:[%s15016_s11 + $0x44] sm:$0xf] }
 0x49b   :  { %5949 = vmatpush.bf16.msrb.mxu2 %v8635_v1  ;;  %5986 = vmatpush.bf16.msrb.mxu1 %v7799_v48  ;;  %v8022_v48 = vld [vmem:[%s15016_s11 + $0x4d8] sm:$0xf]  ;;  %v8554_v63 = vld [vmem:[%s15016_s11 + $0x900] sm:$0xf] }
 0x49c   :  { %v8023_v14 = vor.u32 %v9346_v11, %v8022_v48 }
 0x49d   :  { %6012 = vmatpush.bf16.msrb.mxu3 %v8247_v47  ;;  %5979 = vmatpush.bf16.msra.mxu0 %v7407_v19  ;;  %v9437_v47 = vld [vmem:[%s15016_s11 + $0x7c8] sm:$0xf0]  ;;  %v8078_v19 = vld [vmem:[%s15016_s11 + $0x548] sm:$0xf] }
 0x49e   :  { %v8387_v1 = vor.u32 %v9437_v47, %v8386_v49  ;;  %v7520_v49 = vld [vmem:[%s15016_s11 + $0x104] sm:$0xf0]  ;;  %v9287_v47 = vld [vmem:[%s15016_s11 + $0x31c] sm:$0xf] }
 0x49f   :  { %5950 = vmatpush.bf16.msrb.mxu2 %v8607_v22  ;;  %5987 = vmatpush.bf16.msrb.mxu1 %v7771_v4  ;;  %v7994_v22 = vld [vmem:[%s15016_s11 + $0x4a0] sm:$0xf]  ;;  %v8079_v4 = vor.u32 %v9360_v26, %v8078_v19  ;;  %v7523_v48 = vor.u32 %v9217_v42, %v7520_v49  ;;  %v9210_v19 = vld [vmem:[%s15016_s11 + $0xb4] sm:$0xf]  ;;  %v7492_v26 = vld [vmem:[%s15016_s11 + $0xcc] sm:$0xf0] }
 0x4a0   :  { %5980 = vmatmul.bf16.vlgmr.msra.gmra.mxu0 %v12962_v39  ;;  %v8500_v42 = vld [vmem:[%s15016_s11 + $0x8ac] sm:$0xf0] }
 0x4a1   :  { %6013 = vmatpush.bf16.msrb.mxu3 %v8219_v24  ;;  %6024 = vmatpush.bf16.msrb.mxu0 %v8499_v50  ;;  %v7659_v24 = vor.u32 %v9255_v34, %v7658_v37  ;;  %v9238_v50 = vld [vmem:[%s15016_s11 + $0x194] sm:$0xf]  ;;  %v7910_v37 = vld [vmem:[%s15016_s11 + $0x3f8] sm:$0xf] }
 0x4a2   :  { %v9318_v34 = vld [vmem:[%s15016_s11 + $0x410] sm:$0xf0] }
 0x4a3   :  { %5951 = vmatpush.bf16.msrb.mxu2 %v8579_v17  ;;  %5988 = vmatpush.bf16.msrb.mxu1 %v7743_v23  ;;  %v7995_v17 = vor.u32 %v9339_v15, %v7994_v22  ;;  %v8723_v23 = vor.u32 %v9521_v21, %v8722_v59  ;;  %v7495_v22 = vor.u32 %v9210_v19, %v7492_v26  ;;  %v7464_v15 = vld [vmem:[%s15016_s11 + $0x94] sm:$0xf0]  ;;  %v9273_v59 = vld [vmem:[%s15016_s11 + $0x2ac] sm:$0xf]  ;;  %v7744_v21 = vld [vmem:[%s15016_s11 + $0x2c4] sm:$0xf0] }
 0x4a4   :  { %v7660_v19 = vld [vmem:[%s15016_s11 + $0x21c] sm:$0xf0] }
 0x4a5   :  { %6014 = vmatpush.bf16.msrb.mxu3 %v8191_v60  ;;  %6025 = vmatpush.bf16.msrb.mxu0 %v8471_v0  ;;  %v7607_v60 = vor.u32 %v9238_v50, %v7604_v30  ;;  %v8330_v0 = vld [vmem:[%s15016_s11 + $0x740] sm:$0xf] }
 0x4a6   :  { %v8331_v38 = vor.u32 %v9423_v10, %v8330_v0  ;;  %v7882_v30 = vld [vmem:[%s15016_s11 + $0x3c0] sm:$0xf]  ;;  %v8611_v0 = vor.u32 %v9493_v16, %v8610_v51  ;;  %v7854_v10 = vld [vmem:[%s15016_s11 + $0x388] sm:$0xf]  ;;  %v9556_v51 = vld [vmem:[%s15016_s11 + $0xb80] sm:$0xf0] }
 0x4a7   :  { %5952 = vmatpush.bf16.msrb.mxu2 %v8551_v12  ;;  %5989 = vmatpush.bf16.msrb.mxu1 %v7715_v40  ;;  %v9294_v12 = vld [vmem:[%s15016_s11 + $0x354] sm:$0xf]  ;;  %v7828_v40 = vld [vmem:[%s15016_s11 + $0x36c] sm:$0xf0]  ;;  %v9343_v16 = vld [vmem:[%s15016_s11 + $0x4dc] sm:$0xf] }
 0x4a8   :  { %v7831_v31 = vor.u32 %v9294_v12, %v7828_v40  ;;  %v9479_v12 = vld [vmem:[%s15016_s11 + $0x918] sm:$0xf0] }
 0x4a9   :  { %6015 = vmatpush.bf16.msrb.mxu3 %v8163_v9  ;;  %6026 = vmatpush.bf16.msrb.mxu0 %v8443_v55  ;;  %v9514_v9 = vld [vmem:[%s15016_s11 + $0xa30] sm:$0xf0]  ;;  %v7579_v55 = vor.u32 %v9231_v29, %v7576_v52  ;;  %v8582_v29 = vld [vmem:[%s15016_s11 + $0x938] sm:$0xf] }
 0x4aa   :  { %v8695_v32 = vor.u32 %v9514_v9, %v8694_v27  ;;  %v9486_v52 = vld [vmem:[%s15016_s11 + $0x950] sm:$0xf0]  ;;  %v7436_v27 = vld [vmem:[%s15016_s11 + $0x5c] sm:$0xf0] }
 0x4ab   :  { %5953 = vmatpush.bf16.msrb.mxu2 %v8523_v43  ;;  %5990 = vmatpush.bf16.msrb.mxu1 %v7687_v53  ;;  %v7800_v43 = vld [vmem:[%s15016_s11 + $0x334] sm:$0xf0]  ;;  %v9266_v9 = vld [vmem:[%s15016_s11 + $0x274] sm:$0xf]  ;;  %v8583_v56 = vor.u32 %v9486_v52, %v8582_v29  ;;  %v7439_v40 = vor.u32 %v9196_v33, %v7436_v27  ;;  %v8834_v29 = vld [vmem:[%s15016_s11 + $0xb30] sm:$0xf] }
 0x4ac   :  { %v7803_v11 = vor.u32 %v9287_v47, %v7800_v43  ;;  %v8526_v47 = vld [vmem:[%s15016_s11 + $0x8c8] sm:$0xf]  ;;  %v9472_v43 = vld [vmem:[%s15016_s11 + $0x8e0] sm:$0xf0]  ;;  %v9441_v27 = vld [vmem:[%s15016_s11 + $0x7ec] sm:$0xf] }
 0x4ad   :  { %6016 = vmatpush.bf16.msrb.mxu3 %v8135_v62  ;;  %6027 = vmatpush.bf16.msrb.mxu0 %v8415_v41  ;;  %v9325_v62 = vld [vmem:[%s15016_s11 + $0x448] sm:$0xf0]  ;;  %v8666_v41 = vld [vmem:[%s15016_s11 + $0x9e0] sm:$0xf]  ;;  %v8527_v26 = vor.u32 %v9472_v43, %v8526_v47  ;;  %v9322_v47 = vld [vmem:[%s15016_s11 + $0x434] sm:$0xf] }
 0x4ae   :  { %5954 = vmatmul.bf16.vlgmr.msrb.gmra.mxu2 %v12933_v44  ;;  %v7939_v53 = vor.u32 %v9325_v62, %v7938_v20  ;;  %v9570_v20 = vld [vmem:[%s15016_s11 + $0xbf0] sm:$0xf0]  ;;  %v7408_v62 = vld [vmem:[%s15016_s11 + $0x24] sm:$0xf0]  ;;  %v7940_v43 = vld [vmem:[%s15016_s11 + $0x44c] sm:$0xf0] }
 0x4af   :  { %5998 = vmatpush.bf16.msra.mxu2 %v8051_v57  ;;  %5991 = vmatpush.bf16.msrb.mxu1 %v7659_v24  ;;  %v8667_v57 = vor.u32 %v9507_v28, %v8666_v41  ;;  %v7911_v24 = vor.u32 %v9318_v34, %v7910_v37  ;;  %v9259_v41 = vld [vmem:[%s15016_s11 + $0x23c] sm:$0xf]  ;;  %v7688_v28 = vld [vmem:[%s15016_s11 + $0x254] sm:$0xf0] }
 0x4b0   :  { %v7691_v37 = vor.u32 %v9259_v41, %v7688_v28  ;;  %v9563_v34 = vld [vmem:[%s15016_s11 + $0xbb8] sm:$0xf0]  ;;  %v9504_v41 = vld [vmem:[%s15016_s11 + $0x9e4] sm:$0xf]  ;;  %v8668_v28 = vld [vmem:[%s15016_s11 + $0x9fc] sm:$0xf0] }
 0x4b1   :  { %6017 = vmatpush.bf16.msrb.mxu3 %v8107_v2  ;;  %6028 = vmatpush.bf16.msrb.mxu0 %v8387_v1  ;;  %v8638_v2 = vld [vmem:[%s15016_s11 + $0x9a8] sm:$0xf]  ;;  %v9500_v1 = vld [vmem:[%s15016_s11 + $0x9c0] sm:$0xf0] }
 0x4b2   :  { %v8639_v50 = vor.u32 %v9500_v1, %v8638_v2  ;;  %v9350_v2 = vld [vmem:[%s15016_s11 + $0x514] sm:$0xf]  ;;  %v8052_v1 = vld [vmem:[%s15016_s11 + $0x52c] sm:$0xf0] }
 0x4b3   :  { %5999 = vmatpush.bf16.msra.mxu2 %v8023_v14  ;;  %5992 = vmatpush.bf16.msrb.mxu1 %v7631_v5  ;;  %v9311_v14 = vld [vmem:[%s15016_s11 + $0x3d8] sm:$0xf0]  ;;  %v9304_v5 = vld [vmem:[%s15016_s11 + $0x3a0] sm:$0xf0] }
 0x4b4   :  { %v7855_v61 = vor.u32 %v9304_v5, %v7854_v10 }
 0x4b5   :  { %6018 = vmatpush.bf16.msrb.mxu3 %v8079_v4  ;;  %6029 = vmatpush.bf16.msrb.mxu0 %v8359_v18  ;;  %v7775_v4 = vor.u32 %v9280_v25, %v7772_v35  ;;  %v9203_v18 = vld [vmem:[%s15016_s11 + $0x7c] sm:$0xf]  ;;  %v8472_v35 = vld [vmem:[%s15016_s11 + $0x874] sm:$0xf0] }
 0x4b6   :  { %5993 = vmatmul.bf16.vlgmr.msrb.gmra.mxu1 %v12873_v54  ;;  %v9455_v25 = vld [vmem:[%s15016_s11 + $0x85c] sm:$0xf] }
 0x4b7   :  { %6000 = vmatpush.bf16.msra.mxu2 %v7995_v17  ;;  %6037 = vmatpush.bf16.msra.mxu1 %v8723_v23  ;;  %v7467_v17 = vor.u32 %v9203_v18, %v7464_v15  ;;  %v7747_v23 = vor.u32 %v9273_v59, %v7744_v21  ;;  %v9245_v18 = vld [vmem:[%s15016_s11 + $0x1cc] sm:$0xf]  ;;  %v7632_v15 = vld [vmem:[%s15016_s11 + $0x1e4] sm:$0xf0]  ;;  %v9448_v59 = vld [vmem:[%s15016_s11 + $0x824] sm:$0xf] }
 0x4b8   :  { %6019 = vmatmul.bf16.vlgmr.msrb.gmra.mxu3 %v13022_v7  ;;  %v8444_v21 = vld [vmem:[%s15016_s11 + $0x83c] sm:$0xf0]  ;;  %v7635_v52 = vor.u32 %v9245_v18, %v7632_v15  ;;  %v9490_v18 = vld [vmem:[%s15016_s11 + $0x974] sm:$0xf]  ;;  %v8612_v15 = vld [vmem:[%s15016_s11 + $0x98c] sm:$0xf0] }
 0x4b9   :  { %6063 = vmatpush.bf16.msra.mxu3 %v7607_v60  ;;  %6030 = vmatpush.bf16.msrb.mxu0 %v8331_v38  ;;  %v7883_v60 = vor.u32 %v9311_v14, %v7882_v30  ;;  %v9577_v38 = vld [vmem:[%s15016_s11 + $0xc28] sm:$0xf0]  ;;  %v8862_v30 = vld [vmem:[%s15016_s11 + $0xb68] sm:$0xf] }
 0x4ba   :  { %v8947_v58 = vor.u32 %v9577_v38, %v8946_v46  ;;  %v8863_v10 = vor.u32 %v9556_v51, %v8862_v30  ;;  %v7996_v46 = vld [vmem:[%s15016_s11 + $0x4bc] sm:$0xf0]  ;;  %v8447_v38 = vor.u32 %v9448_v59, %v8444_v21  ;;  %v9406_v51 = vld [vmem:[%s15016_s11 + $0x6d4] sm:$0xf] }
 0x4bb   :  { %6001 = vmatpush.bf16.msra.mxu2 %v7967_v45  ;;  %6038 = vmatpush.bf16.msra.mxu1 %v8695_v32  ;;  %v8918_v32 = vld [vmem:[%s15016_s11 + $0xbd8] sm:$0xf] }
 0x4bc   :  { %v8919_v49 = vor.u32 %v9570_v20, %v8918_v32 }
 0x4bd   :  { %6064 = vmatpush.bf16.msra.mxu3 %v7579_v55  ;;  %6031 = vmatpush.bf16.msrb.mxu0 %v8303_v6  ;;  %v7716_v55 = vld [vmem:[%s15016_s11 + $0x28c] sm:$0xf0]  ;;  %v9189_v6 = vld [vmem:[%s15016_s11 + $0xc] sm:$0xf] }
 0x4be   :  { %v7719_v45 = vor.u32 %v9266_v9, %v7716_v55  ;;  %v8416_v9 = vld [vmem:[%s15016_s11 + $0x804] sm:$0xf0]  ;;  %v9511_v55 = vld [vmem:[%s15016_s11 + $0xa1c] sm:$0xf] }
 0x4bf   :  { %6002 = vmatpush.bf16.msra.mxu2 %v7939_v53  ;;  %6039 = vmatpush.bf16.msra.mxu1 %v8667_v57  ;;  %v8890_v53 = vld [vmem:[%s15016_s11 + $0xba0] sm:$0xf]  ;;  %v7411_v57 = vor.u32 %v9189_v6, %v7408_v62  ;;  %v8419_v32 = vor.u32 %v9441_v27, %v8416_v9  ;;  %v9434_v6 = vld [vmem:[%s15016_s11 + $0x7b4] sm:$0xf]  ;;  %v8388_v62 = vld [vmem:[%s15016_s11 + $0x7cc] sm:$0xf0] }
 0x4c0   :  { %6032 = vmatmul.bf16.vlgmr.msrb.gmra.mxu0 %v13083_v36 }
 0x4c1   :  { %6065 = vmatpush.bf16.msra.mxu3 %v7551_v8  ;;  %6076 = vmatpush.bf16.msra.mxu0 %v7831_v31  ;;  %v8555_v8 = vor.u32 %v9479_v12, %v8554_v63  ;;  %v9462_v31 = vld [vmem:[%s15016_s11 + $0x894] sm:$0xf]  ;;  %v8806_v63 = vld [vmem:[%s15016_s11 + $0xaf8] sm:$0xf] }
 0x4c2   :  { %v9542_v12 = vld [vmem:[%s15016_s11 + $0xb10] sm:$0xf0] }
 0x4c3   :  { %6003 = vmatpush.bf16.msra.mxu2 %v7911_v24  ;;  %6040 = vmatpush.bf16.msra.mxu1 %v8639_v50  ;;  %v8891_v24 = vor.u32 %v9563_v34, %v8890_v53  ;;  %v8055_v50 = vor.u32 %v9350_v2, %v8052_v1  ;;  %v8391_v53 = vor.u32 %v9434_v6, %v8388_v62  ;;  %v8360_v34 = vld [vmem:[%s15016_s11 + $0x794] sm:$0xf0]  ;;  %v9497_v2 = vld [vmem:[%s15016_s11 + $0x9ac] sm:$0xf]  ;;  %v8640_v1 = vld [vmem:[%s15016_s11 + $0x9c4] sm:$0xf0] }
 0x4c4   :  { %v9574_v6 = vld [vmem:[%s15016_s11 + $0xc14] sm:$0xf]  ;;  %v8948_v62 = vld [vmem:[%s15016_s11 + $0xc2c] sm:$0xf0] }
 0x4c5   :  { %6066 = vmatpush.bf16.msra.mxu3 %v7523_v48  ;;  %6077 = vmatpush.bf16.msra.mxu0 %v7803_v11  ;;  %v8503_v48 = vor.u32 %v9462_v31, %v8500_v42  ;;  %v9252_v11 = vld [vmem:[%s15016_s11 + $0x204] sm:$0xf]  ;;  %v8778_v42 = vld [vmem:[%s15016_s11 + $0xac0] sm:$0xf] }
 0x4c6   :  { %v7663_v14 = vor.u32 %v9252_v11, %v7660_v19  ;;  %v7943_v19 = vor.u32 %v9322_v47, %v7940_v43  ;;  %v8951_v43 = vor.u32 %v9574_v6, %v8948_v62 }
 0x4c7   :  { %6004 = vmatpush.bf16.msra.mxu2 %v7883_v60  ;;  %6041 = vmatpush.bf16.msra.mxu1 %v8611_v0  ;;  %v9518_v60 = vld [vmem:[%s15016_s11 + $0xa54] sm:$0xf]  ;;  %v8724_v0 = vld [vmem:[%s15016_s11 + $0xa6c] sm:$0xf0] }
 0x4c8   :  { %v8727_v33 = vor.u32 %v9518_v60, %v8724_v0  ;;  %v9308_v0 = vld [vmem:[%s15016_s11 + $0x3c4] sm:$0xf] }
 0x4c9   :  { %6067 = vmatpush.bf16.msra.mxu3 %v7495_v22  ;;  %6078 = vmatpush.bf16.msra.mxu0 %v7775_v4  ;;  %v8024_v22 = vld [vmem:[%s15016_s11 + $0x4f4] sm:$0xf0]  ;;  %v8475_v4 = vor.u32 %v9455_v25, %v8472_v35  ;;  %v9528_v25 = vld [vmem:[%s15016_s11 + $0xaa0] sm:$0xf0]  ;;  %v9315_v35 = vld [vmem:[%s15016_s11 + $0x3fc] sm:$0xf] }
 0x4ca   :  { %v8027_v5 = vor.u32 %v9343_v16, %v8024_v22  ;;  %v8276_v16 = vld [vmem:[%s15016_s11 + $0x6ec] sm:$0xf0]  ;;  %v9420_v22 = vld [vmem:[%s15016_s11 + $0x744] sm:$0xf] }
 0x4cb   :  { %6005 = vmatpush.bf16.msra.mxu2 %v7855_v61  ;;  %6042 = vmatpush.bf16.msra.mxu1 %v8583_v56  ;;  %v8696_v61 = vld [vmem:[%s15016_s11 + $0xa34] sm:$0xf0]  ;;  %v8279_v60 = vor.u32 %v9406_v51, %v8276_v16 }
 0x4cc   :  { %v8699_v20 = vor.u32 %v9511_v55, %v8696_v61  ;;  %v7834_v55 = vld [vmem:[%s15016_s11 + $0x358] sm:$0xf]  ;;  %v9298_v61 = vld [vmem:[%s15016_s11 + $0x370] sm:$0xf0] }
 0x4cd   :  { %6068 = vmatpush.bf16.msra.mxu3 %v7467_v17  ;;  %6079 = vmatpush.bf16.msra.mxu0 %v7747_v23  ;;  %v9549_v17 = vld [vmem:[%s15016_s11 + $0xb48] sm:$0xf0]  ;;  %v9336_v23 = vld [vmem:[%s15016_s11 + $0x4a4] sm:$0xf] }
 0x4ce   :  { %6006 = vmatmul.bf16.vlgmr.msra.gmra.mxu2 %v12903_v13  ;;  %v8835_v56 = vor.u32 %v9549_v17, %v8834_v29  ;;  %v8615_v29 = vor.u32 %v9490_v18, %v8612_v15  ;;  %v8248_v17 = vld [vmem:[%s15016_s11 + $0x6b4] sm:$0xf0]  ;;  %v8164_v15 = vld [vmem:[%s15016_s11 + $0x60c] sm:$0xf0] }
 0x4cf   :  { %6050 = vmatpush.bf16.msrb.mxu2 %v8947_v58  ;;  %6043 = vmatpush.bf16.msra.mxu1 %v8555_v8  ;;  %v7999_v58 = vor.u32 %v9336_v23, %v7996_v46  ;;  %v8807_v8 = vor.u32 %v9542_v12, %v8806_v63  ;;  %v9413_v23 = vld [vmem:[%s15016_s11 + $0x70c] sm:$0xf]  ;;  %v8304_v46 = vld [vmem:[%s15016_s11 + $0x724] sm:$0xf0]  ;;  %v9392_v12 = vld [vmem:[%s15016_s11 + $0x664] sm:$0xf] }
 0x4d0   :  { %v7856_v63 = vld [vmem:[%s15016_s11 + $0x3a4] sm:$0xf0] }
 0x4d1   :  { %6069 = vmatpush.bf16.msra.mxu3 %v7439_v40  ;;  %6080 = vmatpush.bf16.msra.mxu0 %v7719_v45  ;;  %v9329_v40 = vld [vmem:[%s15016_s11 + $0x46c] sm:$0xf]  ;;  %v7968_v45 = vld [vmem:[%s15016_s11 + $0x484] sm:$0xf0] }
 0x4d2   :  { %v7971_v31 = vor.u32 %v9329_v40, %v7968_v45  ;;  %v8307_v45 = vor.u32 %v9413_v23, %v8304_v46 }
 0x4d3   :  { %6051 = vmatpush.bf16.msrb.mxu2 %v8919_v49  ;;  %6044 = vmatpush.bf16.msra.mxu1 %v8527_v26  ;;  %v9535_v49 = vld [vmem:[%s15016_s11 + $0xad8] sm:$0xf0]  ;;  %v8750_v26 = vld [vmem:[%s15016_s11 + $0xa88] sm:$0xf] }
 0x4d4   :  { %v8779_v11 = vor.u32 %v9535_v49, %v8778_v42  ;;  %v8751_v59 = vor.u32 %v9528_v25, %v8750_v26  ;;  %v7806_v42 = vld [vmem:[%s15016_s11 + $0x320] sm:$0xf]  ;;  %v9291_v49 = vld [vmem:[%s15016_s11 + $0x338] sm:$0xf0]  ;;  %v7778_v26 = vld [vmem:[%s15016_s11 + $0x2e8] sm:$0xf] }
 0x4d5   :  { %6070 = vmatpush.bf16.msra.mxu3 %v7411_v57  ;;  %6081 = vmatpush.bf16.msra.mxu0 %v7691_v37  ;;  %v8671_v57 = vor.u32 %v9504_v41, %v8668_v28  ;;  %v9427_v37 = vld [vmem:[%s15016_s11 + $0x77c] sm:$0xf]  ;;  %v7835_v41 = vor.u32 %v9298_v61, %v7834_v55  ;;  %v9476_v28 = vld [vmem:[%s15016_s11 + $0x904] sm:$0xf]  ;;  %v8864_v55 = vld [vmem:[%s15016_s11 + $0xb84] sm:$0xf0] }
 0x4d6   :  { %6045 = vmatmul.bf16.vlgmr.msra.gmra.mxu1 %v12933_v44  ;;  %v8363_v30 = vor.u32 %v9427_v37, %v8360_v34  ;;  %v9567_v34 = vld [vmem:[%s15016_s11 + $0xbdc] sm:$0xf]  ;;  %v9284_v25 = vld [vmem:[%s15016_s11 + $0x300] sm:$0xf0] }
 0x4d7   :  { %6052 = vmatpush.bf16.msrb.mxu2 %v8891_v24  ;;  %6089 = vmatpush.bf16.msrb.mxu1 %v8055_v50  ;;  %v7912_v24 = vld [vmem:[%s15016_s11 + $0x414] sm:$0xf0] }
 0x4d8   :  { %6071 = vmatmul.bf16.vlgmr.msra.gmra.mxu3 %v12962_v39  ;;  %v7915_v21 = vor.u32 %v9315_v35, %v7912_v24  ;;  %v13842_v24 = vld [vmem:[%s15017_s12] sm:$0xff] }
 0x4d9   :  { %6115 = vmatpush.bf16.msrb.mxu3 %v8503_v48  ;;  %6082 = vmatpush.bf16.msra.mxu0 %v7663_v14  ;;  %v8643_v14 = vor.u32 %v9497_v2, %v8640_v1  ;;  %v8920_v2 = vld [vmem:[%s15016_s11 + $0xbf4] sm:$0xf0]  ;;  %v9469_v1 = vld [vmem:[%s15016_s11 + $0x8cc] sm:$0xf] }
 0x4da   :  { %v8923_v16 = vor.u32 %v9567_v34, %v8920_v2 }
 0x4db   :  { %6053 = vmatpush.bf16.msrb.mxu2 %v8863_v10  ;;  %6090 = vmatpush.bf16.msrb.mxu1 %v8027_v5  ;;  %v13718_v48 = vpop.f32.mrf.mxu3  ;;  %v7884_v10 = vld [vmem:[%s15016_s11 + $0x3dc] sm:$0xf0] }
 0x4dc   :  { %v7887_v9 = vor.u32 %v9308_v0, %v7884_v10  ;;  %v7779_v0 = vor.u32 %v9284_v25, %v7778_v26  ;;  %v8080_v26 = vld [vmem:[%s15016_s11 + $0x564] sm:$0xf0]  ;;  %v9539_v25 = vld [vmem:[%s15016_s11 + $0xafc] sm:$0xf] }
 0x4dd   :  { %6116 = vmatpush.bf16.msrb.mxu3 %v8475_v4  ;;  %6083 = vmatpush.bf16.msra.mxu0 %v7635_v52  ;;  %v13732_v50 = vpop.f32.mrf.mxu0  ;;  %v8332_v4 = vld [vmem:[%s15016_s11 + $0x75c] sm:$0xf0]  ;;  %v9399_v52 = vld [vmem:[%s15016_s11 + $0x69c] sm:$0xf] }
 0x4de   :  { %v8335_v5 = vor.u32 %v9420_v22, %v8332_v4  ;;  %v9378_v22 = vld [vmem:[%s15016_s11 + $0x5f4] sm:$0xf] }
 0x4df   :  { %6054 = vmatpush.bf16.msrb.mxu2 %v8835_v56  ;;  %6091 = vmatpush.bf16.msrb.mxu1 %v7999_v58  ;;  %v8251_v56 = vor.u32 %v9399_v52, %v8248_v17  ;;  %v9301_v58 = vld [vmem:[%s15016_s11 + $0x38c] sm:$0xf]  ;;  %v8030_v52 = vld [vmem:[%s15016_s11 + $0x4e0] sm:$0xf]  ;;  %v9347_v17 = vld [vmem:[%s15016_s11 + $0x4f8] sm:$0xf0]  ;;  %v8167_v23 = vor.u32 %v9378_v22, %v8164_v15 }
 0x4e0   :  { %6084 = vmatmul.bf16.vlgmr.msra.gmra.mxu0 %v12873_v54  ;;  %v9242_v22 = vld [vmem:[%s15016_s11 + $0x1b0] sm:$0xf0] }
 0x4e1   :  { %6117 = vmatpush.bf16.msrb.mxu3 %v8447_v38  ;;  %6128 = vmatpush.bf16.msrb.mxu0 %v8727_v33  ;;  %v9483_v38 = vld [vmem:[%s15016_s11 + $0x93c] sm:$0xf]  ;;  %v8584_v33 = vld [vmem:[%s15016_s11 + $0x954] sm:$0xf0] }
 0x4e3   :  { %6055 = vmatpush.bf16.msrb.mxu2 %v8807_v8  ;;  %6092 = vmatpush.bf16.msrb.mxu1 %v7971_v31  ;;  %v5814_v27 = vpop.f32.mrf.mxu3  ;;  %v8556_v8 = vld [vmem:[%s15016_s11 + $0x91c] sm:$0xf0]  ;;  %v7859_v31 = vor.u32 %v9301_v58, %v7856_v63  ;;  %v8031_v58 = vor.u32 %v9347_v17, %v8030_v52  ;;  %v7722_v63 = vld [vmem:[%s15016_s11 + $0x278] sm:$0xf]  ;;  %v9532_v17 = vld [vmem:[%s15016_s11 + $0xac4] sm:$0xf] }
 0x4e4   :  { %v8559_v37 = vor.u32 %v9476_v28, %v8556_v8  ;;  %v8136_v27 = vld [vmem:[%s15016_s11 + $0x5d4] sm:$0xf0]  ;;  %v9364_v28 = vld [vmem:[%s15016_s11 + $0x584] sm:$0xf] }
 0x4e5   :  { %6118 = vmatpush.bf16.msrb.mxu3 %v8419_v32  ;;  %6129 = vmatpush.bf16.msrb.mxu0 %v8699_v20  ;;  %v5827_v40 = vpop.f32.mrf.mxu0  ;;  %v8587_v32 = vor.u32 %v9483_v38, %v8584_v33  ;;  %v8220_v20 = vld [vmem:[%s15016_s11 + $0x67c] sm:$0xf0]  ;;  %v9371_v38 = vld [vmem:[%s15016_s11 + $0x5bc] sm:$0xf] }
 0x4e6   :  { %v8223_v47 = vor.u32 %v9392_v12, %v8220_v20  ;;  %v9340_v20 = vld [vmem:[%s15016_s11 + $0x4c0] sm:$0xf0]  ;;  %v8139_v62 = vor.u32 %v9371_v38, %v8136_v27  ;;  %v9235_v27 = vld [vmem:[%s15016_s11 + $0x178] sm:$0xf0] }
 0x4e7   :  { %6056 = vmatpush.bf16.msrb.mxu2 %v8779_v11  ;;  %6093 = vmatpush.bf16.msrb.mxu1 %v7943_v19  ;;  %v7807_v11 = vor.u32 %v9291_v49, %v7806_v42  ;;  %v8528_v19 = vld [vmem:[%s15016_s11 + $0x8e4] sm:$0xf0]  ;;  %v9546_v42 = vld [vmem:[%s15016_s11 + $0xb34] sm:$0xf] }
 0x4e8   :  { %v8531_v18 = vor.u32 %v9469_v1, %v8528_v19 }
 0x4e9   :  { %6119 = vmatpush.bf16.msrb.mxu3 %v8391_v53  ;;  %6130 = vmatpush.bf16.msrb.mxu0 %v8671_v57  ;;  %v9385_v53 = vld [vmem:[%s15016_s11 + $0x62c] sm:$0xf]  ;;  %v8192_v57 = vld [vmem:[%s15016_s11 + $0x644] sm:$0xf0] }
 0x4ea   :  { %v8195_v51 = vor.u32 %v9385_v53, %v8192_v57  ;;  %v7694_v53 = vld [vmem:[%s15016_s11 + $0x240] sm:$0xf]  ;;  %v9263_v57 = vld [vmem:[%s15016_s11 + $0x258] sm:$0xf0] }
 0x4eb   :  { %6057 = vmatpush.bf16.msrb.mxu2 %v8751_v59  ;;  %6094 = vmatpush.bf16.msrb.mxu1 %v7915_v21  ;;  %v13837_v35 = vpop.f32.mrf.mxu3  ;;  %v9560_v59 = vld [vmem:[%s15016_s11 + $0xba4] sm:$0xf]  ;;  %v8892_v21 = vld [vmem:[%s15016_s11 + $0xbbc] sm:$0xf0] }
 0x4ec   :  { %v8895_v46 = vor.u32 %v9560_v59, %v8892_v21  ;;  %v9256_v21 = vld [vmem:[%s15016_s11 + $0x220] sm:$0xf0] }
 0x4ed   :  { %6120 = vmatpush.bf16.msrb.mxu3 %v8363_v30  ;;  %6131 = vmatpush.bf16.msrb.mxu0 %v8643_v14  ;;  %v8058_v30 = vld [vmem:[%s15016_s11 + $0x518] sm:$0xf]  ;;  %v9354_v14 = vld [vmem:[%s15016_s11 + $0x530] sm:$0xf0]  ;;  %v13854_v4 = vpop.f32.mrf.mxu0 }
 0x4ee   :  { %6058 = vmatmul.bf16.vlgmr.msrb.gmra.mxu2 %v12980_v3  ;;  %v8059_v10 = vor.u32 %v9354_v14, %v8058_v30  ;;  %v8808_v30 = vld [vmem:[%s15016_s11 + $0xb14] sm:$0xf0]  ;;  %v7695_v14 = vor.u32 %v9263_v57, %v7694_v53 }
 0x4ef   :  { %6102 = vmatpush.bf16.msra.mxu2 %v8279_v60  ;;  %6095 = vmatpush.bf16.msrb.mxu1 %v7887_v9  ;;  %v3760_v60 = vperm.slane %v13842_v24, 0  ;;  %v9553_v9 = vld [vmem:[%s15016_s11 + $0xb6c] sm:$0xf] }
 0x4f1   :  { %6121 = vmatpush.bf16.msrb.mxu3 %v8335_v5  ;;  %6132 = vmatpush.bf16.msrb.mxu0 %v8615_v29  ;;  %v7750_v5 = vld [vmem:[%s15016_s11 + $0x2b0] sm:$0xf]  ;;  %v9277_v29 = vld [vmem:[%s15016_s11 + $0x2c8] sm:$0xf0]  ;;  %v5799_v33 = vpop.f32.mrf.mxu2 }
 0x4f2   :  { %v5800_v61 = vadd.f32 %v5799_v33, %v3760_v60  ;;  %v7946_v60 = vld [vmem:[%s15016_s11 + $0x438] sm:$0xf]  ;;  %v7582_v33 = vld [vmem:[%s15016_s11 + $0x160] sm:$0xf] }
 0x4f3   :  { %6103 = vmatpush.bf16.msra.mxu2 %v8251_v56  ;;  %6096 = vmatpush.bf16.msrb.mxu1 %v7859_v31  ;;  %v7751_v56 = vor.u32 %v9277_v29, %v7750_v5  ;;  %v5838_v12 = vpop.f32.mrf.mxu1  ;;  %v5866_v40 = vpop.f32.mrf.mxu3  ;;  %v8108_v31 = vld [vmem:[%s15016_s11 + $0x59c] sm:$0xf0]  ;;  %v8811_v5 = vor.u32 %v9539_v25, %v8808_v30  ;;  %v9221_v25 = vld [vmem:[%s15016_s11 + $0x108] sm:$0xf0] }
 0x4f4   :  { %v5813_v6 = vadd.f32 %v13718_v48, %v5800_v61  ;;  %v8836_v48 = vld [vmem:[%s15016_s11 + $0xb4c] sm:$0xf0]  ;;  %v8111_v2 = vor.u32 %v9364_v28, %v8108_v31  ;;  %v7918_v61 = vld [vmem:[%s15016_s11 + $0x400] sm:$0xf]  ;;  %v7583_v40 = vor.u32 %v9235_v27, %v7582_v33  ;;  %v9228_v28 = vld [vmem:[%s15016_s11 + $0x140] sm:$0xf0] }
 0x4f5   :  { %6122 = vmatpush.bf16.msrb.mxu3 %v8307_v45  ;;  %6133 = vmatpush.bf16.msrb.mxu0 %v8587_v32  ;;  %v9270_v45 = vld [vmem:[%s15016_s11 + $0x290] sm:$0xf0]  ;;  %v8002_v32 = vld [vmem:[%s15016_s11 + $0x4a8] sm:$0xf]  ;;  %v5879_v8 = vpop.f32.mrf.mxu0  ;;  %v8839_v1 = vor.u32 %v9546_v42, %v8836_v48  ;;  %v8254_v30 = vld [vmem:[%s15016_s11 + $0x6a0] sm:$0xf] }
 0x4f6   :  { %6097 = vmatmul.bf16.vlgmr.msrb.gmra.mxu1 %v12903_v13  ;;  %v5826_v49 = vadd.f32 %v13732_v50, %v5813_v6  ;;  %v9333_v50 = vld [vmem:[%s15016_s11 + $0x488] sm:$0xf0]  ;;  %v8282_v8 = vld [vmem:[%s15016_s11 + $0x6d8] sm:$0xf]  ;;  %v9410_v31 = vld [vmem:[%s15016_s11 + $0x6f0] sm:$0xf0] }
 0x4f7   :  { %6104 = vmatpush.bf16.msra.mxu2 %v8223_v47  ;;  %6141 = vmatpush.bf16.msra.mxu1 %v8951_v43  ;;  %v7723_v47 = vor.u32 %v9270_v45, %v7722_v63  ;;  %v8003_v43 = vor.u32 %v9340_v20, %v8002_v32  ;;  %v8730_v63 = vld [vmem:[%s15016_s11 + $0xa58] sm:$0xf]  ;;  %v9525_v45 = vld [vmem:[%s15016_s11 + $0xa8c] sm:$0xf]  ;;  %v8752_v32 = vld [vmem:[%s15016_s11 + $0xaa4] sm:$0xf0] }
 0x4f8   :  { %6123 = vmatmul.bf16.vlgmr.msrb.gmra.mxu3 %v13083_v36  ;;  %v5839_v34 = vadd.f32 %v5838_v12, %v5826_v49  ;;  %v9522_v12 = vld [vmem:[%s15016_s11 + $0xa70] sm:$0xf0]  ;;  %v7554_v20 = vld [vmem:[%s15016_s11 + $0x128] sm:$0xf]  ;;  %v8755_v57 = vor.u32 %v9525_v45, %v8752_v32  ;;  %v8646_v27 = vld [vmem:[%s15016_s11 + $0x9b0] sm:$0xf] }
 0x4f9   :  { %6167 = vmatpush.bf16.msra.mxu3 %v7835_v41  ;;  %6134 = vmatpush.bf16.msrb.mxu0 %v8559_v37  ;;  %v8867_v41 = vor.u32 %v9553_v9, %v8864_v55  ;;  %v7974_v37 = vld [vmem:[%s15016_s11 + $0x470] sm:$0xf]  ;;  %v5801_v19 = vpop.f32.mrf.mxu2  ;;  %v9249_v55 = vld [vmem:[%s15016_s11 + $0x1e8] sm:$0xf0]  ;;  %v8731_v49 = vor.u32 %v9522_v12, %v8730_v63  ;;  %v9207_v45 = vld [vmem:[%s15016_s11 + $0x98] sm:$0xf0] }
 0x4fa   :  { %v7638_v9 = vld [vmem:[%s15016_s11 + $0x1d0] sm:$0xf] }
 0x4fb   :  { %6105 = vmatpush.bf16.msra.mxu2 %v8195_v51  ;;  %6142 = vmatpush.bf16.msra.mxu1 %v8923_v16  ;;  %v7975_v51 = vor.u32 %v9333_v50, %v7974_v37  ;;  %v7610_v16 = vld [vmem:[%s15016_s11 + $0x198] sm:$0xf]  ;;  %v5840_v15 = vpop.f32.mrf.mxu1  ;;  %v13951_v59 = vpop.f32.mrf.mxu3  ;;  %v8702_v37 = vld [vmem:[%s15016_s11 + $0xa20] sm:$0xf]  ;;  %v9515_v50 = vld [vmem:[%s15016_s11 + $0xa38] sm:$0xf0] }
 0x4fc   :  { %v7611_v52 = vor.u32 %v9242_v22, %v7610_v16  ;;  %v7526_v19 = vld [vmem:[%s15016_s11 + $0xf0] sm:$0xf]  ;;  %v9305_v22 = vld [vmem:[%s15016_s11 + $0x3a8] sm:$0xf0]  ;;  %v8954_v15 = vld [vmem:[%s15016_s11 + $0xc18] sm:$0xf] }
 0x4fd   :  { %6168 = vmatpush.bf16.msra.mxu3 %v7807_v11  ;;  %6135 = vmatpush.bf16.msrb.mxu0 %v8531_v18  ;;  %v9357_v11 = vld [vmem:[%s15016_s11 + $0x54c] sm:$0xf]  ;;  %v7666_v18 = vld [vmem:[%s15016_s11 + $0x208] sm:$0xf]  ;;  %v13962_v29 = vpop.f32.mrf.mxu0  ;;  %v7862_v16 = vld [vmem:[%s15016_s11 + $0x390] sm:$0xf] }
 0x4fe   :  { %v8198_v32 = vld [vmem:[%s15016_s11 + $0x630] sm:$0xf] }
 0x4ff   :  { %6106 = vmatpush.bf16.msra.mxu2 %v8167_v23  ;;  %6143 = vmatpush.bf16.msra.mxu1 %v8895_v46  ;;  %v8780_v23 = vld [vmem:[%s15016_s11 + $0xadc] sm:$0xf0]  ;;  %v7667_v46 = vor.u32 %v9256_v21, %v7666_v18  ;;  %v8674_v18 = vld [vmem:[%s15016_s11 + $0x9e8] sm:$0xf]  ;;  %v9578_v21 = vld [vmem:[%s15016_s11 + $0xc30] sm:$0xf0] }
 0x500   :  { %6136 = vmatmul.bf16.vlgmr.msrb.gmra.mxu0 %v12933_v44  ;;  %v8955_v33 = vor.u32 %v9578_v21, %v8954_v15 }
 0x501   :  { %6169 = vmatpush.bf16.msra.mxu3 %v7779_v0  ;;  %6180 = vmatpush.bf16.msra.mxu0 %v8059_v10  ;;  %v9326_v0 = vld [vmem:[%s15016_s11 + $0x450] sm:$0xf0]  ;;  %v8083_v10 = vor.u32 %v9357_v11, %v8080_v26  ;;  %v5851_v6 = vpop.f32.mrf.mxu2  ;;  %v8283_v11 = vor.u32 %v9410_v31, %v8282_v8  ;;  %v8898_v8 = vld [vmem:[%s15016_s11 + $0xba8] sm:$0xf]  ;;  %v9564_v31 = vld [vmem:[%s15016_s11 + $0xbc0] sm:$0xf0] }
 0x502   :  { %v7947_v38 = vor.u32 %v9326_v0, %v7946_v60  ;;  %v5852_v42 = vadd.f32 %v5851_v6, %v5839_v34  ;;  %v7527_v60 = vor.u32 %v9221_v25, %v7526_v19  ;;  %v9487_v19 = vld [vmem:[%s15016_s11 + $0x958] sm:$0xf0]  ;;  %v9557_v25 = vld [vmem:[%s15016_s11 + $0xb88] sm:$0xf0] }
 0x503   :  { %6107 = vmatpush.bf16.msra.mxu2 %v8139_v62  ;;  %6144 = vmatpush.bf16.msra.mxu1 %v8867_v41  ;;  %v7639_v62 = vor.u32 %v9249_v55, %v7638_v9  ;;  %v5918_v48 = vpop.f32.mrf.mxu3  ;;  %v14019_v53 = vpop.f32.mrf.mxu1  ;;  %v9501_v55 = vld [vmem:[%s15016_s11 + $0x9c8] sm:$0xf0] }
 0x504   :  { %v5865_v34 = vadd.f32 %v13837_v35, %v5852_v42  ;;  %v9403_v35 = vld [vmem:[%s15016_s11 + $0x6b8] sm:$0xf0]  ;;  %v8647_v6 = vor.u32 %v9501_v55, %v8646_v27  ;;  %v9368_v55 = vld [vmem:[%s15016_s11 + $0x5a0] sm:$0xf0] }
 0x505   :  { %6170 = vmatpush.bf16.msra.mxu3 %v7751_v56  ;;  %6181 = vmatpush.bf16.msra.mxu0 %v8031_v58  ;;  %v9319_v56 = vld [vmem:[%s15016_s11 + $0x418] sm:$0xf0]  ;;  %v8783_v58 = vor.u32 %v9532_v17, %v8780_v23  ;;  %v8255_v0 = vor.u32 %v9403_v35, %v8254_v30  ;;  %v9214_v17 = vld [vmem:[%s15016_s11 + $0xd0] sm:$0xf0]  ;;  %v8226_v23 = vld [vmem:[%s15016_s11 + $0x668] sm:$0xf] }
 0x506   :  { %v7919_v41 = vor.u32 %v9319_v56, %v7918_v61  ;;  %v8926_v61 = vld [vmem:[%s15016_s11 + $0xbe0] sm:$0xf]  ;;  %v9571_v56 = vld [vmem:[%s15016_s11 + $0xbf8] sm:$0xf0] }
 0x507   :  { %6108 = vmatpush.bf16.msra.mxu2 %v8111_v2  ;;  %6145 = vmatpush.bf16.msra.mxu1 %v8839_v1  ;;  %v5931_v2 = vpop.f32.mrf.mxu0  ;;  %v7555_v1 = vor.u32 %v9228_v28, %v7554_v20  ;;  %v9389_v20 = vld [vmem:[%s15016_s11 + $0x648] sm:$0xf0]  ;;  %v9494_v28 = vld [vmem:[%s15016_s11 + $0x990] sm:$0xf0] }
 0x508   :  { %v8899_v2 = vor.u32 %v9564_v31, %v8898_v8  ;;  %v8086_v31 = vld [vmem:[%s15016_s11 + $0x550] sm:$0xf] }
 0x509   :  { %6171 = vmatpush.bf16.msra.mxu3 %v7723_v47  ;;  %6182 = vmatpush.bf16.msra.mxu0 %v8003_v43  ;;  %v7890_v47 = vld [vmem:[%s15016_s11 + $0x3c8] sm:$0xf]  ;;  %v9312_v43 = vld [vmem:[%s15016_s11 + $0x3e0] sm:$0xf0] }
 0x50a   :  { %v7891_v26 = vor.u32 %v9312_v43, %v7890_v47  ;;  %v7442_v47 = vld [vmem:[%s15016_s11 + $0x48] sm:$0xf] }
 0x50b   :  { %6109 = vmatpush.bf16.msra.mxu2 %v8083_v10  ;;  %6146 = vmatpush.bf16.msra.mxu1 %v8811_v5  ;;  %v7498_v10 = vld [vmem:[%s15016_s11 + $0xb8] sm:$0xf]  ;;  %v5853_v5 = vpop.f32.mrf.mxu2  ;;  %v5892_v9 = vpop.f32.mrf.mxu1 }
 0x50c   :  { %v7499_v63 = vor.u32 %v9214_v17, %v7498_v10  ;;  %v8562_v10 = vld [vmem:[%s15016_s11 + $0x908] sm:$0xf]  ;;  %v8842_v5 = vld [vmem:[%s15016_s11 + $0xb38] sm:$0xf] }
 0x50d   :  { %6172 = vmatpush.bf16.msra.mxu3 %v7695_v14  ;;  %6183 = vmatpush.bf16.msra.mxu0 %v7975_v51  ;;  %v14041_v14 = vadd.f32 %v13854_v4, %v5865_v34  ;;  %v8703_v51 = vor.u32 %v9515_v50, %v8702_v37  ;;  %v9508_v4 = vld [vmem:[%s15016_s11 + $0xa00] sm:$0xf0]  ;;  %v8170_v37 = vld [vmem:[%s15016_s11 + $0x5f8] sm:$0xf]  ;;  %v8114_v9 = vld [vmem:[%s15016_s11 + $0x588] sm:$0xf] }
 0x50e   :  { %6110 = vmatmul.bf16.vlgmr.msra.gmra.mxu2 %v13022_v7 }
 0x50f   :  { %6154 = vmatpush.bf16.msrb.mxu2 %v7611_v52  ;;  %6147 = vmatpush.bf16.msra.mxu1 %v8783_v58  ;;  %v7863_v52 = vor.u32 %v9305_v22, %v7862_v16  ;;  %v3761_v58 = vperm.slane %v13842_v24, 1  ;;  %v7414_v16 = vld [vmem:[%s15016_s11 + $0x10] sm:$0xf]  ;;  %v9193_v22 = vld [vmem:[%s15016_s11 + $0x28] sm:$0xf0] }
 0x511   :  { %6173 = vmatpush.bf16.msra.mxu3 %v7667_v46  ;;  %6184 = vmatpush.bf16.msra.mxu0 %v7947_v38  ;;  %v9396_v46 = vld [vmem:[%s15016_s11 + $0x680] sm:$0xf0]  ;;  %v8675_v38 = vor.u32 %v9508_v4, %v8674_v18  ;;  %v5891_v42 = vadd.f32 %v14019_v53, %v3761_v58  ;;  %v9382_v53 = vld [vmem:[%s15016_s11 + $0x610] sm:$0xf0]  ;;  %v8142_v18 = vld [vmem:[%s15016_s11 + $0x5c0] sm:$0xf] }
 0x512   :  { %v8227_v12 = vor.u32 %v9396_v46, %v8226_v23  ;;  %v7415_v46 = vor.u32 %v9193_v22, %v7414_v16  ;;  %v9445_v16 = vld [vmem:[%s15016_s11 + $0x808] sm:$0xf0]  ;;  %v9232_v22 = vld [vmem:[%s15016_s11 + $0x164] sm:$0xf] }
 0x513   :  { %6155 = vmatpush.bf16.msrb.mxu2 %v7583_v40  ;;  %6148 = vmatpush.bf16.msra.mxu1 %v8755_v57  ;;  %v7470_v40 = vld [vmem:[%s15016_s11 + $0x80] sm:$0xf]  ;;  %v5903_v43 = vpop.f32.mrf.mxu2  ;;  %v9200_v57 = vld [vmem:[%s15016_s11 + $0x60] sm:$0xf0] }
 0x514   :  { %v7471_v48 = vor.u32 %v9207_v45, %v7470_v40  ;;  %v5904_v50 = vadd.f32 %v5903_v43, %v5891_v42  ;;  %v7443_v35 = vor.u32 %v9200_v57, %v7442_v47  ;;  %v8534_v40 = vld [vmem:[%s15016_s11 + $0x8d0] sm:$0xf]  ;;  %v9361_v42 = vld [vmem:[%s15016_s11 + $0x568] sm:$0xf0]  ;;  %v9452_v43 = vld [vmem:[%s15016_s11 + $0x840] sm:$0xf0] }
 0x515   :  { %6174 = vmatpush.bf16.msra.mxu3 %v7639_v62  ;;  %6185 = vmatpush.bf16.msra.mxu0 %v7919_v41  ;;  %v8927_v62 = vor.u32 %v9571_v56, %v8926_v61  ;;  %v8618_v41 = vld [vmem:[%s15016_s11 + $0x978] sm:$0xf]  ;;  %v9239_v57 = vld [vmem:[%s15016_s11 + $0x19c] sm:$0xf] }
 0x516   :  { %6149 = vmatmul.bf16.vlgmr.msra.gmra.mxu1 %v12980_v3  ;;  %v8619_v34 = vor.u32 %v9494_v28, %v8618_v41  ;;  %v5917_v30 = vadd.f32 %v13951_v59, %v5904_v50  ;;  %v9375_v59 = vld [vmem:[%s15016_s11 + $0x5d8] sm:$0xf0]  ;;  %v8060_v28 = vld [vmem:[%s15016_s11 + $0x534] sm:$0xf0]  ;;  %v8786_v50 = vld [vmem:[%s15016_s11 + $0xac8] sm:$0xf] }
 0x517   :  { %6156 = vmatpush.bf16.msrb.mxu2 %v7555_v1  ;;  %6193 = vmatpush.bf16.msrb.mxu1 %v8283_v11  ;;  %v8590_v1 = vld [vmem:[%s15016_s11 + $0x940] sm:$0xf]  ;;  %v5942_v11 = vpop.f32.mrf.mxu1  ;;  %v9351_v41 = vld [vmem:[%s15016_s11 + $0x51c] sm:$0xf] }
 0x518   :  { %6175 = vmatmul.bf16.vlgmr.msra.gmra.mxu3 %v12873_v54  ;;  %v5930_v4 = vadd.f32 %v13962_v29, %v5917_v30  ;;  %v8591_v15 = vor.u32 %v9487_v19, %v8590_v1  ;;  %v9480_v29 = vld [vmem:[%s15016_s11 + $0x920] sm:$0xf0]  ;;  %v8087_v1 = vor.u32 %v9361_v42, %v8086_v31  ;;  %v8032_v19 = vld [vmem:[%s15016_s11 + $0x4fc] sm:$0xf0]  ;;  %v8422_v30 = vld [vmem:[%s15016_s11 + $0x7f0] sm:$0xf] }
 0x519   :  { %6219 = vmatpush.bf16.msrb.mxu3 %v8731_v49  ;;  %6186 = vmatpush.bf16.msra.mxu0 %v7891_v26  ;;  %v8199_v49 = vor.u32 %v9389_v20, %v8198_v32  ;;  %v8870_v26 = vld [vmem:[%s15016_s11 + $0xb70] sm:$0xf]  ;;  %v8563_v56 = vor.u32 %v9480_v29, %v8562_v10  ;;  %v9473_v32 = vld [vmem:[%s15016_s11 + $0x8e8] sm:$0xf0]  ;;  %v8814_v20 = vld [vmem:[%s15016_s11 + $0xb00] sm:$0xf]  ;;  %v8423_v29 = vor.u32 %v9445_v16, %v8422_v30 }
 0x51a   :  { %v8871_v21 = vor.u32 %v9557_v25, %v8870_v26  ;;  %v14170_v17 = vadd.f32 %v5942_v11, %v5930_v4  ;;  %v9344_v11 = vld [vmem:[%s15016_s11 + $0x4e4] sm:$0xf]  ;;  %v8758_v4 = vld [vmem:[%s15016_s11 + $0xa90] sm:$0xf]  ;;  %v8284_v10 = vld [vmem:[%s15016_s11 + $0x6f4] sm:$0xf0] }
 0x51b   :  { %6157 = vmatpush.bf16.msrb.mxu2 %v7527_v60  ;;  %6194 = vmatpush.bf16.msrb.mxu1 %v8255_v0  ;;  %v8506_v60 = vld [vmem:[%s15016_s11 + $0x898] sm:$0xf]  ;;  %v9466_v0 = vld [vmem:[%s15016_s11 + $0x8b0] sm:$0xf0]  ;;  %v14172_v23 = vpop.f32.mrf.mxu3  ;;  %v9323_v31 = vld [vmem:[%s15016_s11 + $0x43c] sm:$0xf] }
 0x51c   :  { %v8507_v27 = vor.u32 %v9466_v0, %v8506_v60  ;;  %v8004_v60 = vld [vmem:[%s15016_s11 + $0x4c4] sm:$0xf0]  ;;  %v9407_v0 = vld [vmem:[%s15016_s11 + $0x6dc] sm:$0xf]  ;;  %v7948_v42 = vld [vmem:[%s15016_s11 + $0x454] sm:$0xf0] }
 0x51d   :  { %6220 = vmatpush.bf16.msrb.mxu3 %v8703_v51  ;;  %6187 = vmatpush.bf16.msra.mxu0 %v7863_v52  ;;  %v8171_v51 = vor.u32 %v9382_v53, %v8170_v37  ;;  %v9550_v52 = vld [vmem:[%s15016_s11 + $0xb50] sm:$0xf0]  ;;  %v14180_v61 = vpop.f32.mrf.mxu0  ;;  %v7612_v37 = vld [vmem:[%s15016_s11 + $0x1b4] sm:$0xf0]  ;;  %v8063_v53 = vor.u32 %v9351_v41, %v8060_v28  ;;  %v3762_v41 = vperm.slane %v13842_v24, 2 }
 0x51e   :  { %v8843_v58 = vor.u32 %v9550_v52, %v8842_v5  ;;  %v7615_v25 = vor.u32 %v9239_v57, %v7612_v37  ;;  %v8394_v52 = vld [vmem:[%s15016_s11 + $0x7b8] sm:$0xf]  ;;  %v8228_v24 = vld [vmem:[%s15016_s11 + $0x684] sm:$0xf0]  ;;  %v9424_v57 = vld [vmem:[%s15016_s11 + $0x760] sm:$0xf0] }
 0x51f   :  { %6158 = vmatpush.bf16.msrb.mxu2 %v7499_v63  ;;  %6195 = vmatpush.bf16.msrb.mxu1 %v8227_v12  ;;  %v8478_v63 = vld [vmem:[%s15016_s11 + $0x860] sm:$0xf]  ;;  %v9459_v12 = vld [vmem:[%s15016_s11 + $0x878] sm:$0xf0]  ;;  %v5944_v45 = vpop.f32.mrf.mxu1 }
 0x520   :  { %6188 = vmatmul.bf16.vlgmr.msra.gmra.mxu0 %v12903_v13  ;;  %v8479_v8 = vor.u32 %v9459_v12, %v8478_v63  ;;  %v9400_v63 = vld [vmem:[%s15016_s11 + $0x6a4] sm:$0xf]  ;;  %v8256_v12 = vld [vmem:[%s15016_s11 + $0x6bc] sm:$0xf0] }
 0x521   :  { %6221 = vmatpush.bf16.msrb.mxu3 %v8675_v38  ;;  %6232 = vmatpush.bf16.msrb.mxu0 %v8955_v33  ;;  %v8143_v38 = vor.u32 %v9375_v59, %v8142_v18  ;;  %v5905_v33 = vpop.f32.mrf.mxu2  ;;  %v7584_v18 = vld [vmem:[%s15016_s11 + $0x17c] sm:$0xf0]  ;;  %v8035_v59 = vor.u32 %v9344_v11, %v8032_v19  ;;  %v9316_v19 = vld [vmem:[%s15016_s11 + $0x404] sm:$0xf] }
 0x522   :  { %v7587_v5 = vor.u32 %v9232_v22, %v7584_v18  ;;  %v9225_v33 = vld [vmem:[%s15016_s11 + $0x12c] sm:$0xf]  ;;  %v7920_v30 = vld [vmem:[%s15016_s11 + $0x41c] sm:$0xf0]  ;;  %v8310_v22 = vld [vmem:[%s15016_s11 + $0x710] sm:$0xf] }
 0x523   :  { %6159 = vmatpush.bf16.msrb.mxu2 %v7471_v48  ;;  %6196 = vmatpush.bf16.msrb.mxu1 %v8199_v49  ;;  %v8450_v48 = vld [vmem:[%s15016_s11 + $0x828] sm:$0xf]  ;;  %v8535_v49 = vor.u32 %v9473_v32, %v8534_v40  ;;  %v8366_v32 = vld [vmem:[%s15016_s11 + $0x780] sm:$0xf]  ;;  %v9417_v18 = vld [vmem:[%s15016_s11 + $0x728] sm:$0xf0] }
 0x524   :  { %v8451_v26 = vor.u32 %v9452_v43, %v8450_v48  ;;  %v9393_v48 = vld [vmem:[%s15016_s11 + $0x66c] sm:$0xf]  ;;  %v8338_v43 = vld [vmem:[%s15016_s11 + $0x748] sm:$0xf] }
 0x525   :  { %6222 = vmatpush.bf16.msrb.mxu3 %v8647_v6  ;;  %6233 = vmatpush.bf16.msrb.mxu0 %v8927_v62  ;;  %v9543_v6 = vld [vmem:[%s15016_s11 + $0xb18] sm:$0xf0]  ;;  %v8115_v62 = vor.u32 %v9368_v55, %v8114_v9  ;;  %v8287_v55 = vor.u32 %v9407_v0, %v8284_v10  ;;  %v8231_v11 = vor.u32 %v9393_v48, %v8228_v24  ;;  %v9309_v0 = vld [vmem:[%s15016_s11 + $0x3cc] sm:$0xf]  ;;  %v7892_v10 = vld [vmem:[%s15016_s11 + $0x3e4] sm:$0xf0] }
 0x526   :  { %v8815_v47 = vor.u32 %v9543_v6, %v8814_v20  ;;  %v9431_v20 = vld [vmem:[%s15016_s11 + $0x798] sm:$0xf0]  ;;  %v9218_v6 = vld [vmem:[%s15016_s11 + $0xf4] sm:$0xf]  ;;  %v7416_v24 = vld [vmem:[%s15016_s11 + $0x2c] sm:$0xf0] }
 0x527   :  { %6160 = vmatpush.bf16.msrb.mxu2 %v7443_v35  ;;  %6197 = vmatpush.bf16.msrb.mxu1 %v8171_v51  ;;  %v5983_v35 = vpop.f32.mrf.mxu0 }
 0x528   :  { %v9386_v35 = vld [vmem:[%s15016_s11 + $0x634] sm:$0xf] }
 0x529   :  { %6223 = vmatpush.bf16.msrb.mxu3 %v8619_v34  ;;  %6234 = vmatpush.bf16.msrb.mxu0 %v8899_v2  ;;  %v9536_v34 = vld [vmem:[%s15016_s11 + $0xae0] sm:$0xf0]  ;;  %v5970_v2 = vpop.f32.mrf.mxu3 }
 0x52a   :  { %v8787_v51 = vor.u32 %v9536_v34, %v8786_v50  ;;  %v9211_v50 = vld [vmem:[%s15016_s11 + $0xbc] sm:$0xf]  ;;  %v7500_v34 = vld [vmem:[%s15016_s11 + $0xd4] sm:$0xf0]  ;;  %v5982_v2 = vadd.f32 %v14180_v61, %v3762_v41 }
 0x52b   :  { %6161 = vmatpush.bf16.msrb.mxu2 %v7415_v46  ;;  %6198 = vmatpush.bf16.msrb.mxu1 %v8143_v38  ;;  %v9438_v38 = vld [vmem:[%s15016_s11 + $0x7d0] sm:$0xf0]  ;;  %v7503_v16 = vor.u32 %v9211_v50, %v7500_v34  ;;  %v8508_v50 = vld [vmem:[%s15016_s11 + $0x8b4] sm:$0xf0] }
 0x52c   :  { %v8395_v40 = vor.u32 %v9438_v38, %v8394_v52 }
 0x52d   :  { %6224 = vmatpush.bf16.msrb.mxu3 %v8591_v15  ;;  %6235 = vmatpush.bf16.msrb.mxu0 %v8871_v21  ;;  %v9529_v15 = vld [vmem:[%s15016_s11 + $0xaa8] sm:$0xf0] }
 0x52e   :  { %6162 = vmatmul.bf16.vlgmr.msrb.gmra.mxu2 %v12962_v39  ;;  %v9337_v21 = vld [vmem:[%s15016_s11 + $0x4ac] sm:$0xf]  ;;  %v8759_v46 = vor.u32 %v9529_v15, %v8758_v4  ;;  %v7923_v4 = vor.u32 %v9316_v19, %v7920_v30  ;;  %v8928_v30 = vld [vmem:[%s15016_s11 + $0xbfc] sm:$0xf0] }
 0x52f   :  { %6206 = vmatpush.bf16.msra.mxu2 %v8507_v27  ;;  %6199 = vmatpush.bf16.msrb.mxu1 %v8115_v62  ;;  %v7556_v27 = vld [vmem:[%s15016_s11 + $0x144] sm:$0xf0]  ;;  %v8007_v9 = vor.u32 %v9337_v21, %v8004_v60  ;;  %v7528_v62 = vld [vmem:[%s15016_s11 + $0x10c] sm:$0xf0]  ;;  %v9295_v21 = vld [vmem:[%s15016_s11 + $0x35c] sm:$0xf] }
 0x530   :  { %v7559_v45 = vor.u32 %v9225_v33, %v7556_v27  ;;  %v7836_v60 = vld [vmem:[%s15016_s11 + $0x374] sm:$0xf0] }
 0x531   :  { %6225 = vmatpush.bf16.msrb.mxu3 %v8563_v56  ;;  %6236 = vmatpush.bf16.msrb.mxu0 %v8843_v58  ;;  %v9330_v56 = vld [vmem:[%s15016_s11 + $0x474] sm:$0xf]  ;;  %v7976_v58 = vld [vmem:[%s15016_s11 + $0x48c] sm:$0xf0]  ;;  %v5955_v37 = vpop.f32.mrf.mxu2  ;;  %v7839_v27 = vor.u32 %v9295_v21, %v7836_v60  ;;  %v9561_v60 = vld [vmem:[%s15016_s11 + $0xbac] sm:$0xf] }
 0x532   :  { %v7979_v28 = vor.u32 %v9330_v56, %v7976_v58  ;;  %v8088_v21 = vld [vmem:[%s15016_s11 + $0x56c] sm:$0xf0] }
 0x533   :  { %6207 = vmatpush.bf16.msra.mxu2 %v8479_v8  ;;  %6200 = vmatpush.bf16.msrb.mxu1 %v8087_v1  ;;  %v8259_v8 = vor.u32 %v9400_v63, %v8256_v12  ;;  %v5956_v1 = vadd.f32 %v5955_v37, %v14170_v17  ;;  %v8200_v17 = vld [vmem:[%s15016_s11 + $0x64c] sm:$0xf0]  ;;  %v9288_v63 = vld [vmem:[%s15016_s11 + $0x324] sm:$0xf]  ;;  %v7808_v12 = vld [vmem:[%s15016_s11 + $0x33c] sm:$0xf0] }
 0x534   :  { %v8203_v15 = vor.u32 %v9386_v35, %v8200_v17  ;;  %v7811_v48 = vor.u32 %v9288_v63, %v7808_v12  ;;  %v7780_v37 = vld [vmem:[%s15016_s11 + $0x304] sm:$0xf0]  ;;  %v9554_v63 = vld [vmem:[%s15016_s11 + $0xb74] sm:$0xf]  ;;  %v8872_v12 = vld [vmem:[%s15016_s11 + $0xb8c] sm:$0xf0] }
 0x535   :  { %6226 = vmatpush.bf16.msrb.mxu3 %v8535_v49  ;;  %6237 = vmatpush.bf16.msrb.mxu0 %v8815_v47  ;;  %v8367_v49 = vor.u32 %v9431_v20, %v8366_v32  ;;  %v7531_v47 = vor.u32 %v9218_v6, %v7528_v62  ;;  %v5969_v61 = vadd.f32 %v14172_v23, %v5956_v1  ;;  %v7472_v23 = vld [vmem:[%s15016_s11 + $0x9c] sm:$0xf0]  ;;  %v7864_v32 = vld [vmem:[%s15016_s11 + $0x3ac] sm:$0xf0]  ;;  %v9372_v20 = vld [vmem:[%s15016_s11 + $0x5c4] sm:$0xf] }
 0x536   :  { %6201 = vmatmul.bf16.vlgmr.msrb.gmra.mxu1 %v13022_v7  ;;  %v8144_v6 = vld [vmem:[%s15016_s11 + $0x5dc] sm:$0xf0]  ;;  %v9365_v1 = vld [vmem:[%s15016_s11 + $0x58c] sm:$0xf] }
 0x537   :  { %6208 = vmatpush.bf16.msra.mxu2 %v8451_v26  ;;  %6245 = vmatpush.bf16.msra.mxu1 %v7615_v25  ;;  %v5994_v26 = vpop.f32.mrf.mxu1  ;;  %v8339_v25 = vor.u32 %v9424_v57, %v8338_v43  ;;  %9584 = vtanh.f32 %v5969_v61  ;;  %v8147_v57 = vor.u32 %v9372_v20, %v8144_v6  ;;  %v9274_v61 = vld [vmem:[%s15016_s11 + $0x2b4] sm:$0xf]  ;;  %v9260_v6 = vld [vmem:[%s15016_s11 + $0x244] sm:$0xf] }
 0x538   :  { %6227 = vmatmul.bf16.vlgmr.msrb.gmra.mxu3 %v12933_v44  ;;  %9586 = vtanh.f32 %v14041_v14  ;;  %v7895_v14 = vor.u32 %v9309_v0, %v7892_v10  ;;  %v8900_v0 = vld [vmem:[%s15016_s11 + $0xbc4] sm:$0xf0]  ;;  %v7618_v10 = vld [vmem:[%s15016_s11 + $0x1a0] sm:$0xf] }
 0x539   :  { %6271 = vmatpush.bf16.msra.mxu3 %v8063_v53  ;;  %6238 = vmatpush.bf16.msrb.mxu0 %v8787_v51  ;;  %v7951_v53 = vor.u32 %v9323_v31, %v7948_v42  ;;  %v14346_v51 = vadd.f32 %v5994_v26, %v5982_v2  ;;  %v5957_v33 = vpop.f32.mrf.mxu2  ;;  %v8956_v31 = vld [vmem:[%s15016_s11 + $0xc34] sm:$0xf0] }
 0x53b   :  { %6209 = vmatpush.bf16.msra.mxu2 %v8423_v29  ;;  %6246 = vmatpush.bf16.msra.mxu1 %v7587_v5  ;;  %v9379_v29 = vld [vmem:[%s15016_s11 + $0x5fc] sm:$0xf]  ;;  %v8172_v5 = vld [vmem:[%s15016_s11 + $0x614] sm:$0xf0]  ;;  %v14379_v52 = vpop.f32.mrf.mxu3 }
 0x53c   :  { %v8175_v58 = vor.u32 %v9379_v29, %v8172_v5  ;;  %v9243_v29 = vld [vmem:[%s15016_s11 + $0x1b8] sm:$0xf0] }
 0x53d   :  { %6272 = vmatpush.bf16.msra.mxu3 %v8035_v59  ;;  %6239 = vmatpush.bf16.msrb.mxu0 %v8759_v46  ;;  %v9204_v59 = vld [vmem:[%s15016_s11 + $0x84] sm:$0xf]  ;;  %v8311_v46 = vor.u32 %v9417_v18, %v8310_v22  ;;  %v14387_v56 = vpop.f32.mrf.mxu0  ;;  %v9585_v62 = vpop.eup %9584  ;;  %v7752_v18 = vld [vmem:[%s15016_s11 + $0x2cc] sm:$0xf0] }
 0x53e   :  { %v7475_v38 = vor.u32 %v9204_v59, %v7472_v23  ;;  %v6441_v42 = vrot.slane %v9585_v62, 6  ;;  %v9456_v59 = vld [vmem:[%s15016_s11 + $0x864] sm:$0xf]  ;;  %v8480_v23 = vld [vmem:[%s15016_s11 + $0x87c] sm:$0xf0]  ;;  %v7755_v5 = vor.u32 %v9274_v61, %v7752_v18 }
 0x53f   :  { %6210 = vmatpush.bf16.msra.mxu2 %v8395_v40  ;;  %6247 = vmatpush.bf16.msra.mxu1 %v7559_v45  ;;  %v9302_v40 = vld [vmem:[%s15016_s11 + $0x394] sm:$0xf]  ;;  %v5996_v45 = vpop.f32.mrf.mxu1  ;;  %v7696_v62 = vld [vmem:[%s15016_s11 + $0x25c] sm:$0xf0]  ;;  %v7640_v18 = vld [vmem:[%s15016_s11 + $0x1ec] sm:$0xf0] }
 0x540   :  { %6240 = vmatmul.bf16.vlgmr.msrb.gmra.mxu0 %v12980_v3  ;;  %v7867_v43 = vor.u32 %v9302_v40, %v7864_v32  ;;  %v7590_v40 = vld [vmem:[%s15016_s11 + $0x168] sm:$0xf]  ;;  %v9236_v45 = vld [vmem:[%s15016_s11 + $0x180] sm:$0xf0] }
 0x541   :  { %6273 = vmatpush.bf16.msra.mxu3 %v8007_v9  ;;  %6284 = vmatpush.bf16.msra.mxu0 %v8287_v55  ;;  %v9197_v9 = vld [vmem:[%s15016_s11 + $0x4c] sm:$0xf]  ;;  %v7444_v55 = vld [vmem:[%s15016_s11 + $0x64] sm:$0xf0] }
 0x542   :  { %v7447_v41 = vor.u32 %v9197_v9, %v7444_v55  ;;  %v9449_v9 = vld [vmem:[%s15016_s11 + $0x82c] sm:$0xf]  ;;  %v8452_v55 = vld [vmem:[%s15016_s11 + $0x844] sm:$0xf0] }
 0x543   :  { %6211 = vmatpush.bf16.msra.mxu2 %v8367_v49  ;;  %6248 = vmatpush.bf16.msra.mxu1 %v7531_v47  ;;  %v9281_v49 = vld [vmem:[%s15016_s11 + $0x2ec] sm:$0xf]  ;;  %v9587_v47 = vpop.eup %9586  ;;  %v6022_v19 = vpop.f32.mrf.mxu3  ;;  %v8455_v20 = vor.u32 %v9449_v9, %v8452_v55  ;;  %v8340_v55 = vld [vmem:[%s15016_s11 + $0x764] sm:$0xf0] }
 0x544   :  { %v14432_v34 = vsel %vm197_vm2, %v9587_v47, %v6441_v42  ;;  %v7783_v35 = vor.u32 %v9281_v49, %v7780_v37  ;;  %v9547_v42 = vld [vmem:[%s15016_s11 + $0xb3c] sm:$0xf]  ;;  %v9229_v49 = vld [vmem:[%s15016_s11 + $0x148] sm:$0xf0]  ;;  %v7699_v47 = vor.u32 %v9260_v6, %v7696_v62  ;;  %v7478_v6 = vld [vmem:[%s15016_s11 + $0x88] sm:$0xf] }
 0x545   :  { %6274 = vmatpush.bf16.msra.mxu3 %v7979_v28  ;;  %6285 = vmatpush.bf16.msra.mxu0 %v8259_v8  ;;  %v9190_v28 = vld [vmem:[%s15016_s11 + $0x14] sm:$0xf]  ;;  %v9575_v8 = vld [vmem:[%s15016_s11 + $0xc1c] sm:$0xf]  ;;  %v9421_v9 = vld [vmem:[%s15016_s11 + $0x74c] sm:$0xf] }
 0x546   :  { %v8959_v2 = vor.u32 %v9575_v8, %v8956_v31  ;;  %v7419_v26 = vor.u32 %v9190_v28, %v7416_v24  ;;  %v8424_v28 = vld [vmem:[%s15016_s11 + $0x80c] sm:$0xf0]  ;;  %v8875_v8 = vor.u32 %v9554_v63, %v8872_v12  ;;  %v7591_v31 = vor.u32 %v9236_v45, %v7590_v40  ;;  %v9512_v12 = vld [vmem:[%s15016_s11 + $0xa24] sm:$0xf]  ;;  %v8704_v40 = vld [vmem:[%s15016_s11 + $0xa3c] sm:$0xf0] }
 0x547   :  { %6212 = vmatpush.bf16.msra.mxu2 %v8339_v25  ;;  %6249 = vmatpush.bf16.msra.mxu1 %v7503_v16  ;;  %v9568_v25 = vld [vmem:[%s15016_s11 + $0xbe4] sm:$0xf]  ;;  %v6035_v16 = vpop.f32.mrf.mxu0  ;;  %v7562_v24 = vld [vmem:[%s15016_s11 + $0x130] sm:$0xf]  ;;  %v9526_v45 = vld [vmem:[%s15016_s11 + $0xa94] sm:$0xf] }
 0x548   :  { %v7563_v19 = vor.u32 %v9229_v49, %v7562_v24  ;;  %v9208_v62 = vld [vmem:[%s15016_s11 + $0xa0] sm:$0xf0]  ;;  %v9505_v24 = vld [vmem:[%s15016_s11 + $0x9ec] sm:$0xf] }
 0x549   :  { %6275 = vmatpush.bf16.msra.mxu3 %v7951_v53  ;;  %6286 = vmatpush.bf16.msra.mxu0 %v8231_v11  ;;  %v9463_v53 = vld [vmem:[%s15016_s11 + $0x89c] sm:$0xf]  ;;  %v8116_v11 = vld [vmem:[%s15016_s11 + $0x5a4] sm:$0xf0] }
 0x54a   :  { %v8511_v17 = vor.u32 %v9463_v53, %v8508_v50  ;;  %v8119_v22 = vor.u32 %v9365_v1, %v8116_v11  ;;  %v7668_v53 = vld [vmem:[%s15016_s11 + $0x224] sm:$0xf0]  ;;  %v9435_v50 = vld [vmem:[%s15016_s11 + $0x7bc] sm:$0xf] }
 0x54b   :  { %6213 = vmatpush.bf16.msra.mxu2 %v8311_v46  ;;  %6250 = vmatpush.bf16.msra.mxu1 %v7475_v38  ;;  %v8483_v46 = vor.u32 %v9456_v59, %v8480_v23  ;;  %v9267_v38 = vld [vmem:[%s15016_s11 + $0x27c] sm:$0xf]  ;;  %v9428_v59 = vld [vmem:[%s15016_s11 + $0x784] sm:$0xf] }
 0x54d   :  { %6276 = vmatpush.bf16.msra.mxu3 %v7923_v4  ;;  %6287 = vmatpush.bf16.msra.mxu0 %v8203_v15  ;;  %v8931_v4 = vor.u32 %v9568_v25, %v8928_v30  ;;  %v9358_v15 = vld [vmem:[%s15016_s11 + $0x554] sm:$0xf]  ;;  %v8816_v30 = vld [vmem:[%s15016_s11 + $0xb1c] sm:$0xf0] }
 0x54e   :  { %6214 = vmatmul.bf16.vlgmr.msra.gmra.mxu2 %v13083_v36  ;;  %v8091_v33 = vor.u32 %v9358_v15, %v8088_v21  ;;  %v9519_v21 = vld [vmem:[%s15016_s11 + $0xa5c] sm:$0xf] }
 0x54f   :  { %6258 = vmatpush.bf16.msrb.mxu2 %v7839_v27  ;;  %6251 = vmatpush.bf16.msra.mxu1 %v7447_v41  ;;  %v7724_v27 = vld [vmem:[%s15016_s11 + $0x294] sm:$0xf0]  ;;  %v9442_v41 = vld [vmem:[%s15016_s11 + $0x7f4] sm:$0xf] }
 0x550   :  { %v7727_v32 = vor.u32 %v9267_v38, %v7724_v27 }
 0x551   :  { %6277 = vmatpush.bf16.msra.mxu3 %v7895_v14  ;;  %6288 = vmatpush.bf16.msra.mxu0 %v8175_v58  ;;  %v8903_v14 = vor.u32 %v9561_v60, %v8900_v0  ;;  %v7619_v58 = vor.u32 %v9243_v29, %v7618_v10  ;;  %v6007_v37 = vpop.f32.mrf.mxu2  ;;  %v8732_v60 = vld [vmem:[%s15016_s11 + $0xa74] sm:$0xf0]  ;;  %v9533_v0 = vld [vmem:[%s15016_s11 + $0xacc] sm:$0xf]  ;;  %v7506_v10 = vld [vmem:[%s15016_s11 + $0xc0] sm:$0xf] }
 0x552   :  { %v6008_v1 = vadd.f32 %v6007_v37, %v14346_v51  ;;  %v9222_v51 = vld [vmem:[%s15016_s11 + $0x110] sm:$0xf0]  ;;  %v9215_v29 = vld [vmem:[%s15016_s11 + $0xd8] sm:$0xf0]  ;;  %v8735_v27 = vor.u32 %v9519_v21, %v8732_v60  ;;  %v9397_v21 = vld [vmem:[%s15016_s11 + $0x688] sm:$0xf0] }
 0x553   :  { %6259 = vmatpush.bf16.msrb.mxu2 %v7811_v48  ;;  %6252 = vmatpush.bf16.msra.mxu1 %v7419_v26  ;;  %v8844_v48 = vld [vmem:[%s15016_s11 + $0xb54] sm:$0xf0]  ;;  %v9540_v26 = vld [vmem:[%s15016_s11 + $0xb04] sm:$0xf]  ;;  %v14544_v25 = vpop.f32.mrf.mxu1  ;;  %v7507_v63 = vor.u32 %v9215_v29, %v7506_v10  ;;  %v9299_v37 = vld [vmem:[%s15016_s11 + $0x378] sm:$0xf0] }
 0x554   :  { %v8847_v11 = vor.u32 %v9547_v42, %v8844_v48  ;;  %v9414_v42 = vld [vmem:[%s15016_s11 + $0x714] sm:$0xf]  ;;  %v8312_v48 = vld [vmem:[%s15016_s11 + $0x72c] sm:$0xf0]  ;;  %v8514_v60 = vld [vmem:[%s15016_s11 + $0x8a0] sm:$0xf] }
 0x555   :  { %6278 = vmatpush.bf16.msra.mxu3 %v7867_v43  ;;  %6289 = vmatpush.bf16.msra.mxu0 %v8147_v57  ;;  %v8427_v43 = vor.u32 %v9442_v41, %v8424_v28  ;;  %v9253_v57 = vld [vmem:[%s15016_s11 + $0x20c] sm:$0xf]  ;;  %v8343_v41 = vor.u32 %v9421_v9, %v8340_v55  ;;  %v8290_v28 = vld [vmem:[%s15016_s11 + $0x6e0] sm:$0xf]  ;;  %v9491_v29 = vld [vmem:[%s15016_s11 + $0x97c] sm:$0xf] }
 0x556   :  { %6253 = vmatmul.bf16.vlgmr.msra.gmra.mxu1 %v12962_v39  ;;  %v7671_v61 = vor.u32 %v9253_v57, %v7668_v53  ;;  %v7842_v57 = vld [vmem:[%s15016_s11 + $0x360] sm:$0xf] }
 0x557   :  { %6260 = vmatpush.bf16.msrb.mxu2 %v7783_v35  ;;  %6297 = vmatpush.bf16.msrb.mxu1 %v8511_v17  ;;  %v7534_v35 = vld [vmem:[%s15016_s11 + $0xf8] sm:$0xf]  ;;  %v6021_v17 = vadd.f32 %v14379_v52, %v6008_v1  ;;  %v8368_v52 = vld [vmem:[%s15016_s11 + $0x79c] sm:$0xf0] }
 0x558   :  { %6279 = vmatmul.bf16.vlgmr.msra.gmra.mxu3 %v12903_v13  ;;  %v7535_v15 = vor.u32 %v9222_v51, %v7534_v35  ;;  %v8371_v38 = vor.u32 %v9428_v59, %v8368_v52  ;;  %v7843_v35 = vor.u32 %v9299_v37, %v7842_v57  ;;  %v9498_v51 = vld [vmem:[%s15016_s11 + $0x9b4] sm:$0xf]  ;;  %v7422_v52 = vld [vmem:[%s15016_s11 + $0x18] sm:$0xf]  ;;  %v8564_v37 = vld [vmem:[%s15016_s11 + $0x924] sm:$0xf0] }
 0x559   :  { %6323 = vmatpush.bf16.msrb.mxu3 %v8959_v2  ;;  %6290 = vmatpush.bf16.msra.mxu0 %v8119_v22  ;;  %v8396_v2 = vld [vmem:[%s15016_s11 + $0x7d4] sm:$0xf0]  ;;  %v9246_v22 = vld [vmem:[%s15016_s11 + $0x1d4] sm:$0xf]  ;;  %v14569_v23 = vadd.f32 %v14387_v56, %v6021_v17  ;;  %v8788_v56 = vld [vmem:[%s15016_s11 + $0xae4] sm:$0xf0] }
 0x55a   :  { %v8399_v16 = vor.u32 %v9435_v50, %v8396_v2  ;;  %v7450_v50 = vld [vmem:[%s15016_s11 + $0x50] sm:$0xf]  ;;  %v9201_v2 = vld [vmem:[%s15016_s11 + $0x68] sm:$0xf0] }
 0x55b   :  { %6261 = vmatpush.bf16.msrb.mxu2 %v7755_v5  ;;  %6298 = vmatpush.bf16.msrb.mxu1 %v8483_v46  ;;  %v14589_v5 = vpop.f32.mrf.mxu3  ;;  %v7643_v46 = vor.u32 %v9246_v22, %v7640_v18  ;;  %v7814_v22 = vld [vmem:[%s15016_s11 + $0x328] sm:$0xf]  ;;  %v9292_v18 = vld [vmem:[%s15016_s11 + $0x340] sm:$0xf0] }
 0x55c   :  { %v7815_v10 = vor.u32 %v9292_v18, %v7814_v22  ;;  %v9264_v22 = vld [vmem:[%s15016_s11 + $0x260] sm:$0xf0] }
 0x55d   :  { %6324 = vmatpush.bf16.msrb.mxu3 %v8931_v4  ;;  %6291 = vmatpush.bf16.msra.mxu0 %v8091_v33  ;;  %v8819_v4 = vor.u32 %v9540_v26, %v8816_v30  ;;  %v6009_v33 = vpop.f32.mrf.mxu2  ;;  %v9404_v26 = vld [vmem:[%s15016_s11 + $0x6c0] sm:$0xf0] }
 0x55e   :  { %v7786_v33 = vld [vmem:[%s15016_s11 + $0x2f0] sm:$0xf] }
 0x55f   :  { %6262 = vmatpush.bf16.msrb.mxu2 %v7727_v32  ;;  %6299 = vmatpush.bf16.msrb.mxu1 %v8455_v20  ;;  %v6048_v32 = vpop.f32.mrf.mxu1  ;;  %v8760_v20 = vld [vmem:[%s15016_s11 + $0xaac] sm:$0xf0] }
 0x560   :  { %6292 = vmatmul.bf16.vlgmr.msra.gmra.mxu0 %v13022_v7  ;;  %v8763_v49 = vor.u32 %v9526_v45, %v8760_v20  ;;  %v9484_v20 = vld [vmem:[%s15016_s11 + $0x944] sm:$0xf] }
 0x561   :  { %6325 = vmatpush.bf16.msrb.mxu3 %v8903_v14  ;;  %6336 = vmatpush.bf16.msrb.mxu0 %v7619_v58  ;;  %v14597_v14 = vpop.f32.mrf.mxu0  ;;  %v8791_v58 = vor.u32 %v9533_v0, %v8788_v56  ;;  %v9467_v0 = vld [vmem:[%s15016_s11 + $0x8b8] sm:$0xf0] }
 0x562   :  { %v8515_v55 = vor.u32 %v9467_v0, %v8514_v60  ;;  %v8402_v60 = vld [vmem:[%s15016_s11 + $0x7c0] sm:$0xf]  ;;  %v9439_v0 = vld [vmem:[%s15016_s11 + $0x7d8] sm:$0xf0] }
 0x563   :  { %6263 = vmatpush.bf16.msrb.mxu2 %v7699_v47  ;;  %6300 = vmatpush.bf16.msrb.mxu1 %v8427_v43  ;;  %v7479_v47 = vor.u32 %v9208_v62, %v7478_v6  ;;  %v8676_v43 = vld [vmem:[%s15016_s11 + $0xa04] sm:$0xf0]  ;;  %v6074_v1 = vpop.f32.mrf.mxu3  ;;  %v8592_v6 = vld [vmem:[%s15016_s11 + $0x95c] sm:$0xf0]  ;;  %v7758_v62 = vld [vmem:[%s15016_s11 + $0x2b8] sm:$0xf] }
 0x564   :  { %v8679_v30 = vor.u32 %v9505_v24, %v8676_v43  ;;  %v9453_v24 = vld [vmem:[%s15016_s11 + $0x848] sm:$0xf0] }
 0x565   :  { %6326 = vmatpush.bf16.msrb.mxu3 %v8875_v8  ;;  %6337 = vmatpush.bf16.msrb.mxu0 %v7591_v31  ;;  %v9411_v8 = vld [vmem:[%s15016_s11 + $0x6f8] sm:$0xf0]  ;;  %v8707_v31 = vor.u32 %v9512_v12, %v8704_v40  ;;  %v8486_v12 = vld [vmem:[%s15016_s11 + $0x868] sm:$0xf]  ;;  %v9460_v40 = vld [vmem:[%s15016_s11 + $0x880] sm:$0xf0] }
 0x566   :  { %v8291_v53 = vor.u32 %v9411_v8, %v8290_v28  ;;  %v8487_v8 = vor.u32 %v9460_v40, %v8486_v12  ;;  %v9477_v43 = vld [vmem:[%s15016_s11 + $0x90c] sm:$0xf]  ;;  %v9348_v12 = vld [vmem:[%s15016_s11 + $0x500] sm:$0xf0]  ;;  %v8094_v40 = vld [vmem:[%s15016_s11 + $0x558] sm:$0xf] }
 0x567   :  { %6264 = vmatpush.bf16.msrb.mxu2 %v7671_v61  ;;  %6301 = vmatpush.bf16.msrb.mxu1 %v8399_v16  ;;  %v7451_v61 = vor.u32 %v9201_v2, %v7450_v50  ;;  %v8648_v16 = vld [vmem:[%s15016_s11 + $0x9cc] sm:$0xf0]  ;;  %v9271_v50 = vld [vmem:[%s15016_s11 + $0x298] sm:$0xf0] }
 0x568   :  { %v8651_v56 = vor.u32 %v9498_v51, %v8648_v16  ;;  %v7702_v16 = vld [vmem:[%s15016_s11 + $0x248] sm:$0xf] }
 0x569   :  { %6327 = vmatpush.bf16.msrb.mxu3 %v8847_v11  ;;  %6338 = vmatpush.bf16.msrb.mxu0 %v7563_v19  ;;  %v8315_v11 = vor.u32 %v9414_v42, %v8312_v48  ;;  %v8262_v19 = vld [vmem:[%s15016_s11 + $0x6a8] sm:$0xf]  ;;  %v6087_v17 = vpop.f32.mrf.mxu0  ;;  %v9383_v42 = vld [vmem:[%s15016_s11 + $0x618] sm:$0xf0]  ;;  %v8458_v48 = vld [vmem:[%s15016_s11 + $0x830] sm:$0xf] }
 0x56a   :  { %v8263_v59 = vor.u32 %v9404_v26, %v8262_v19  ;;  %v8459_v1 = vor.u32 %v9453_v24, %v8458_v48  ;;  %v9376_v19 = vld [vmem:[%s15016_s11 + $0x5e0] sm:$0xf0]  ;;  %v8430_v26 = vld [vmem:[%s15016_s11 + $0x7f8] sm:$0xf]  ;;  %v9470_v17 = vld [vmem:[%s15016_s11 + $0x8d4] sm:$0xf] }
 0x56b   :  { %6265 = vmatpush.bf16.msrb.mxu2 %v7643_v46  ;;  %6302 = vmatpush.bf16.msrb.mxu1 %v8371_v38  ;;  %v8620_v38 = vld [vmem:[%s15016_s11 + $0x994] sm:$0xf0]  ;;  %v9341_v24 = vld [vmem:[%s15016_s11 + $0x4c8] sm:$0xf0] }
 0x56c   :  { %v8623_v45 = vor.u32 %v9491_v29, %v8620_v38  ;;  %v7703_v29 = vor.u32 %v9264_v22, %v7702_v16  ;;  %v8318_v16 = vld [vmem:[%s15016_s11 + $0x718] sm:$0xf]  ;;  %v9418_v22 = vld [vmem:[%s15016_s11 + $0x730] sm:$0xf0] }
 0x56d   :  { %6328 = vmatpush.bf16.msrb.mxu3 %v8819_v4  ;;  %6339 = vmatpush.bf16.msrb.mxu0 %v7535_v15  ;;  %v9194_v4 = vld [vmem:[%s15016_s11 + $0x30] sm:$0xf0]  ;;  %v8234_v15 = vld [vmem:[%s15016_s11 + $0x670] sm:$0xf] }
 0x56e   :  { %6266 = vmatmul.bf16.vlgmr.msrb.gmra.mxu2 %v12873_v54  ;;  %v7423_v46 = vor.u32 %v9194_v4, %v7422_v52  ;;  %v8235_v9 = vor.u32 %v9397_v21, %v8234_v15  ;;  %v8066_v52 = vld [vmem:[%s15016_s11 + $0x520] sm:$0xf]  ;;  %v9355_v4 = vld [vmem:[%s15016_s11 + $0x538] sm:$0xf0]  ;;  %v8122_v15 = vld [vmem:[%s15016_s11 + $0x590] sm:$0xf] }
 0x56f   :  { %6310 = vmatpush.bf16.msra.mxu2 %v8735_v27  ;;  %6303 = vmatpush.bf16.msrb.mxu1 %v8343_v41  ;;  %v9285_v27 = vld [vmem:[%s15016_s11 + $0x308] sm:$0xf0]  ;;  %v9278_v41 = vld [vmem:[%s15016_s11 + $0x2d0] sm:$0xf0]  ;;  %v8067_v38 = vor.u32 %v9355_v4, %v8066_v52  ;;  %v7954_v52 = vld [vmem:[%s15016_s11 + $0x440] sm:$0xf]  ;;  %v8319_v4 = vor.u32 %v9418_v22, %v8318_v16 }
 0x570   :  { %v7787_v32 = vor.u32 %v9285_v27, %v7786_v33  ;;  %v9369_v21 = vld [vmem:[%s15016_s11 + $0x5a8] sm:$0xf0]  ;;  %v7674_v33 = vld [vmem:[%s15016_s11 + $0x210] sm:$0xf] }
 0x571   :  { %6329 = vmatpush.bf16.msrb.mxu3 %v8791_v58  ;;  %6340 = vmatpush.bf16.msrb.mxu0 %v7507_v63  ;;  %v8206_v58 = vld [vmem:[%s15016_s11 + $0x638] sm:$0xf]  ;;  %v9390_v63 = vld [vmem:[%s15016_s11 + $0x650] sm:$0xf0]  ;;  %v14737_v57 = vpop.f32.mrf.mxu2  ;;  %v9257_v27 = vld [vmem:[%s15016_s11 + $0x228] sm:$0xf0] }
 0x572   :  { %v8207_v28 = vor.u32 %v9390_v63, %v8206_v58  ;;  %v8403_v58 = vor.u32 %v9439_v0, %v8402_v60  ;;  %v8038_v63 = vld [vmem:[%s15016_s11 + $0x4e8] sm:$0xf]  ;;  %v9509_v60 = vld [vmem:[%s15016_s11 + $0xa08] sm:$0xf0] }
 0x573   :  { %6311 = vmatpush.bf16.msra.mxu2 %v8707_v31  ;;  %6304 = vmatpush.bf16.msrb.mxu1 %v8315_v11  ;;  %v8178_v31 = vld [vmem:[%s15016_s11 + $0x600] sm:$0xf]  ;;  %v14752_v11 = vpop.f32.mrf.mxu1 }
 0x574   :  { %v8179_v2 = vor.u32 %v9383_v42, %v8178_v31  ;;  %v8010_v31 = vld [vmem:[%s15016_s11 + $0x4b0] sm:$0xf] }
 0x575   :  { %6330 = vmatpush.bf16.msrb.mxu3 %v8763_v49  ;;  %6341 = vmatpush.bf16.msrb.mxu0 %v7479_v47  ;;  %v8595_v49 = vor.u32 %v9484_v20, %v8592_v6  ;;  %v7759_v47 = vor.u32 %v9278_v41, %v7758_v62  ;;  %v8374_v20 = vld [vmem:[%s15016_s11 + $0x788] sm:$0xf]  ;;  %v9432_v6 = vld [vmem:[%s15016_s11 + $0x7a0] sm:$0xf0]  ;;  %v7675_v62 = vor.u32 %v9257_v27, %v7674_v33 }
 0x576   :  { %6305 = vmatmul.bf16.vlgmr.msrb.gmra.mxu1 %v13083_v36  ;;  %v8039_v41 = vor.u32 %v9348_v12, %v8038_v63  ;;  %v8375_v48 = vor.u32 %v9432_v6, %v8374_v20  ;;  %v6047_v63 = vadd.f32 %v14544_v25, %v14569_v23  ;;  %v7870_v6 = vld [vmem:[%s15016_s11 + $0x398] sm:$0xf] }
 0x577   :  { %6312 = vmatpush.bf16.msra.mxu2 %v8679_v30  ;;  %6349 = vmatpush.bf16.msra.mxu1 %v7843_v35  ;;  %v9446_v30 = vld [vmem:[%s15016_s11 + $0x810] sm:$0xf0]  ;;  %v8567_v35 = vor.u32 %v9477_v43, %v8564_v37  ;;  %v8346_v43 = vld [vmem:[%s15016_s11 + $0x750] sm:$0xf]  ;;  %v9425_v37 = vld [vmem:[%s15016_s11 + $0x768] sm:$0xf0] }
 0x578   :  { %6331 = vmatmul.bf16.vlgmr.msrb.gmra.mxu3 %v12980_v3 }
 0x579   :  { %6375 = vmatpush.bf16.msra.mxu3 %v8291_v53  ;;  %6342 = vmatpush.bf16.msrb.mxu0 %v7451_v61  ;;  %v7730_v53 = vld [vmem:[%s15016_s11 + $0x280] sm:$0xf]  ;;  %v8536_v61 = vld [vmem:[%s15016_s11 + $0x8ec] sm:$0xf0] }
 0x57a   :  { %v7731_v51 = vor.u32 %v9271_v50, %v7730_v53 }
 0x57b   :  { %6313 = vmatpush.bf16.msra.mxu2 %v8651_v56  ;;  %6350 = vmatpush.bf16.msra.mxu1 %v7815_v10  ;;  %v14793_v56 = vpop.f32.mrf.mxu3  ;;  %v8539_v10 = vor.u32 %v9470_v17, %v8536_v61  ;;  %v14861_v17 = vld [vmem:[%s15017_s12] sm:$0xff] }
 0x57c   :  { %v3763_v61 = vperm.slane %v14861_v17, 3 }
 0x57d   :  { %6376 = vmatpush.bf16.msra.mxu3 %v8263_v59  ;;  %6343 = vmatpush.bf16.msrb.mxu0 %v7423_v46  ;;  %v8431_v59 = vor.u32 %v9446_v30, %v8430_v26  ;;  %v6061_v46 = vpop.f32.mrf.mxu2  ;;  %v8347_v26 = vor.u32 %v9425_v37, %v8346_v43  ;;  %v9334_v30 = vld [vmem:[%s15016_s11 + $0x490] sm:$0xf0]  ;;  %v9481_v43 = vld [vmem:[%s15016_s11 + $0x928] sm:$0xf0] }
 0x57e   :  { %v6073_v0 = vadd.f32 %v14589_v5, %v3763_v61  ;;  %v9320_v46 = vld [vmem:[%s15016_s11 + $0x420] sm:$0xf0] }
 0x57f   :  { %6314 = vmatpush.bf16.msra.mxu2 %v8623_v45  ;;  %6351 = vmatpush.bf16.msra.mxu1 %v7787_v32  ;;  %v6100_v45 = vpop.f32.mrf.mxu1  ;;  %v9362_v32 = vld [vmem:[%s15016_s11 + $0x570] sm:$0xf0] }
 0x580   :  { %6344 = vmatmul.bf16.vlgmr.msrb.gmra.mxu0 %v12962_v39  ;;  %v8150_v39 = vld [vmem:[%s15016_s11 + $0x5c8] sm:$0xf]  ;;  %v8095_v42 = vor.u32 %v9362_v32, %v8094_v40  ;;  %v6086_v5 = vadd.f32 %v14597_v14, %v6073_v0  ;;  %v9313_v14 = vld [vmem:[%s15016_s11 + $0x3e8] sm:$0xf0]  ;;  %v9495_v40 = vld [vmem:[%s15016_s11 + $0x998] sm:$0xf0]  ;;  %v6060_v32 = vadd.f32 %v14737_v57, %v6047_v63 }
 0x581   :  { %6377 = vmatpush.bf16.msra.mxu3 %v8235_v9  ;;  %6388 = vmatpush.bf16.msra.mxu0 %v8515_v55  ;;  %v8151_v18 = vor.u32 %v9376_v19, %v8150_v39  ;;  %v14801_v9 = vpop.f32.mrf.mxu0  ;;  %v8123_v55 = vor.u32 %v9369_v21, %v8122_v15  ;;  %v7982_v39 = vld [vmem:[%s15016_s11 + $0x478] sm:$0xf]  ;;  %v9327_v15 = vld [vmem:[%s15016_s11 + $0x458] sm:$0xf0]  ;;  %v8682_v21 = vld [vmem:[%s15016_s11 + $0x9f0] sm:$0xf] }
 0x582   :  { %v6099_v33 = vadd.f32 %v14752_v11, %v6086_v5  ;;  %v8626_v11 = vld [vmem:[%s15016_s11 + $0x980] sm:$0xf]  ;;  %v9488_v57 = vld [vmem:[%s15016_s11 + $0x960] sm:$0xf0]  ;;  %9588 = vtanh.f32 %v6060_v32 }
 0x583   :  { %6315 = vmatpush.bf16.msra.mxu2 %v8595_v49  ;;  %6352 = vmatpush.bf16.msra.mxu1 %v7759_v47  ;;  %v8738_v49 = vld [vmem:[%s15016_s11 + $0xa60] sm:$0xf]  ;;  %v9523_v47 = vld [vmem:[%s15016_s11 + $0xa78] sm:$0xf0]  ;;  %v6126_v53 = vpop.f32.mrf.mxu3  ;;  %v8627_v23 = vor.u32 %v9495_v40, %v8626_v11 }
 0x584   :  { %v8934_v53 = vld [vmem:[%s15016_s11 + $0xbe8] sm:$0xf] }
 0x585   :  { %6378 = vmatpush.bf16.msra.mxu3 %v8207_v28  ;;  %6389 = vmatpush.bf16.msra.mxu0 %v8487_v8  ;;  %v7646_v28 = vld [vmem:[%s15016_s11 + $0x1d8] sm:$0xf]  ;;  %v9250_v8 = vld [vmem:[%s15016_s11 + $0x1f0] sm:$0xf0] }
 0x586   :  { %v7647_v50 = vor.u32 %v9250_v8, %v7646_v28  ;;  %v8962_v28 = vld [vmem:[%s15016_s11 + $0xc20] sm:$0xf]  ;;  %v9579_v8 = vld [vmem:[%s15016_s11 + $0xc38] sm:$0xf0] }
 0x587   :  { %6316 = vmatpush.bf16.msra.mxu2 %v8567_v35  ;;  %6353 = vmatpush.bf16.msra.mxu1 %v7731_v51  ;;  %v8710_v35 = vld [vmem:[%s15016_s11 + $0xa28] sm:$0xf]  ;;  %v9516_v51 = vld [vmem:[%s15016_s11 + $0xa40] sm:$0xf0] }
 0x589   :  { %6379 = vmatpush.bf16.msra.mxu3 %v8179_v2  ;;  %6390 = vmatpush.bf16.msra.mxu0 %v8459_v1  ;;  %v8011_v2 = vor.u32 %v9341_v24, %v8010_v31  ;;  %v8739_v1 = vor.u32 %v9523_v47, %v8738_v49  ;;  %v6139_v19 = vpop.f32.mrf.mxu0  ;;  %v8963_v47 = vor.u32 %v9579_v8, %v8962_v28 }
 0x58a   :  { %v8542_v19 = vld [vmem:[%s15016_s11 + $0x8d8] sm:$0xf] }
 0x58b   :  { %6317 = vmatpush.bf16.msra.mxu2 %v8539_v10  ;;  %6354 = vmatpush.bf16.msra.mxu1 %v7703_v29  ;;  %v8683_v10 = vor.u32 %v9509_v60, %v8682_v21  ;;  %v7926_v29 = vld [vmem:[%s15016_s11 + $0x408] sm:$0xf]  ;;  %v9558_v21 = vld [vmem:[%s15016_s11 + $0xb90] sm:$0xf0] }
 0x58c   :  { %v7927_v27 = vor.u32 %v9320_v46, %v7926_v29  ;;  %v9544_v46 = vld [vmem:[%s15016_s11 + $0xb20] sm:$0xf0] }
 0x58d   :  { %6380 = vmatpush.bf16.msra.mxu3 %v8151_v18  ;;  %6391 = vmatpush.bf16.msra.mxu0 %v8431_v59  ;;  %v7983_v18 = vor.u32 %v9334_v30, %v7982_v39  ;;  %v8711_v59 = vor.u32 %v9516_v51, %v8710_v35  ;;  %v9589_v30 = vpop.eup %9588  ;;  %v8906_v35 = vld [vmem:[%s15016_s11 + $0xbb0] sm:$0xf]  ;;  %v9565_v51 = vld [vmem:[%s15016_s11 + $0xbc8] sm:$0xf0] }
 0x58e   :  { %6318 = vmatmul.bf16.vlgmr.msra.gmra.mxu2 %v12933_v44 }
 0x58f   :  { %6362 = vmatpush.bf16.msrb.mxu2 %v8067_v38  ;;  %6355 = vmatpush.bf16.msra.mxu1 %v7675_v62  ;;  %v8654_v38 = vld [vmem:[%s15016_s11 + $0x9b8] sm:$0xf]  ;;  %v9306_v62 = vld [vmem:[%s15016_s11 + $0x3b0] sm:$0xf0] }
 0x591   :  { %6381 = vmatpush.bf16.msra.mxu3 %v8123_v55  ;;  %6392 = vmatpush.bf16.msra.mxu0 %v8403_v58  ;;  %v7898_v58 = vld [vmem:[%s15016_s11 + $0x3d0] sm:$0xf]  ;;  %v6111_v12 = vpop.f32.mrf.mxu2 }
 0x592   :  { %v6112_v45 = vadd.f32 %v6111_v12, %v6099_v33  ;;  %v8794_v33 = vld [vmem:[%s15016_s11 + $0xad0] sm:$0xf]  ;;  %v8766_v12 = vld [vmem:[%s15016_s11 + $0xa98] sm:$0xf] }
 0x593   :  { %6363 = vmatpush.bf16.msrb.mxu2 %v8039_v41  ;;  %6356 = vmatpush.bf16.msra.mxu1 %v7647_v50  ;;  %v6150_v20 = vpop.f32.mrf.mxu1  ;;  %v8598_v41 = vld [vmem:[%s15016_s11 + $0x948] sm:$0xf]  ;;  %v9572_v50 = vld [vmem:[%s15016_s11 + $0xc00] sm:$0xf0] }
 0x594   :  { %v6125_v25 = vadd.f32 %v14793_v56, %v6112_v45  ;;  %v8599_v24 = vor.u32 %v9488_v57, %v8598_v41  ;;  %v8935_v39 = vor.u32 %v9572_v50, %v8934_v53 }
 0x595   :  { %6382 = vmatpush.bf16.msra.mxu3 %v8095_v42  ;;  %6393 = vmatpush.bf16.msra.mxu0 %v8375_v48  ;;  %v7871_v48 = vor.u32 %v9306_v62, %v7870_v6 }
 0x596   :  { %6357 = vmatmul.bf16.vlgmr.msra.gmra.mxu1 %v12873_v54  ;;  %v9502_v54 = vld [vmem:[%s15016_s11 + $0x9d0] sm:$0xf0]  ;;  %v6138_v56 = vadd.f32 %v14801_v9, %v6125_v25  ;;  %v8570_v9 = vld [vmem:[%s15016_s11 + $0x910] sm:$0xf] }
 0x597   :  { %6364 = vmatpush.bf16.msrb.mxu2 %v8011_v2  ;;  %6401 = vmatpush.bf16.msrb.mxu1 %v8739_v1  ;;  %v8655_v55 = vor.u32 %v9502_v54, %v8654_v38  ;;  %v8571_v1 = vor.u32 %v9481_v43, %v8570_v9  ;;  %v3764_v38 = vperm.slane %v14861_v17, 4 }
 0x598   :  { %6383 = vmatmul.bf16.vlgmr.msra.gmra.mxu3 %v13022_v7  ;;  %v7955_v7 = vor.u32 %v9327_v15, %v7954_v52  ;;  %v6151_v31 = vadd.f32 %v6150_v20, %v6138_v56  ;;  %v8907_v52 = vor.u32 %v9565_v51, %v8906_v35  ;;  %v8878_v15 = vld [vmem:[%s15016_s11 + $0xb78] sm:$0xf] }
 0x599   :  { %6394 = vmatpush.bf16.msra.mxu0 %v8347_v26  ;;  %v6113_v49 = vpop.f32.mrf.mxu2  ;;  %v9474_v26 = vld [vmem:[%s15016_s11 + $0x8f0] sm:$0xf0]  ;;  %v8879_v0 = vor.u32 %v9558_v21, %v8878_v15 }
 0x59a   :  { %9590 = vtanh.f32 %v6151_v31  ;;  %v8543_v22 = vor.u32 %v9474_v26, %v8542_v19 }
 0x59b   :  { %6365 = vmatpush.bf16.msrb.mxu2 %v7983_v18  ;;  %6402 = vmatpush.bf16.msrb.mxu1 %v8711_v59  ;;  %v6176_v42 = vpop.f32.mrf.mxu3  ;;  %v6152_v2 = vpop.f32.mrf.mxu1  ;;  %v6442_v18 = vrot.slane %v9589_v30, 4 }
 0x59d   :  { %6395 = vmatpush.bf16.msra.mxu0 %v8319_v4  ;;  %v6189_v37 = vpop.f32.mrf.mxu0 }
 0x59f   :  { %6366 = vmatpush.bf16.msrb.mxu2 %v7955_v7  ;;  %6403 = vmatpush.bf16.msrb.mxu1 %v8683_v10  ;;  %v8850_v7 = vld [vmem:[%s15016_s11 + $0xb40] sm:$0xf]  ;;  %v9551_v10 = vld [vmem:[%s15016_s11 + $0xb58] sm:$0xf0] }
 0x5a0   :  { %6396 = vmatmul.bf16.vlgmr.msra.gmra.mxu0 %v13083_v36  ;;  %v7899_v36 = vor.u32 %v9313_v14, %v7898_v58  ;;  %v9591_v61 = vpop.eup %9590  ;;  %v8851_v29 = vor.u32 %v9551_v10, %v8850_v7  ;;  %v9530_v14 = vld [vmem:[%s15016_s11 + $0xab0] sm:$0xf0] }
 0x5a1   :  { %v6443_v59 = vrot.slane %v9591_v61, 2  ;;  %v8767_v32 = vor.u32 %v9530_v14, %v8766_v12 }
 0x5a3   :  { %6367 = vmatpush.bf16.msrb.mxu2 %v7927_v27  ;;  %6404 = vmatpush.bf16.msrb.mxu1 %v8655_v55  ;;  %v6178_v16 = vpop.f32.mrf.mxu3  ;;  %v6448_v60 = vsel %vm6447_vm10, %v6442_v18, %v6443_v59 }
 0x5a5   :  { %v6191_v4 = vpop.f32.mrf.mxu0 }
 0x5a7   :  { %6368 = vmatpush.bf16.msrb.mxu2 %v7899_v36  ;;  %6405 = vmatpush.bf16.msrb.mxu1 %v8627_v23 }
 0x5ab   :  { %6369 = vmatpush.bf16.msrb.mxu2 %v7871_v48  ;;  %6406 = vmatpush.bf16.msrb.mxu1 %v8599_v24 }
 0x5ae   :  { %6370 = vmatmul.bf16.vlgmr.msrb.gmra.mxu2 %v12903_v13  ;;  %v6449_v13 = vsel %vm62_vm0, %v14432_v34, %v6448_v60  ;;  %v8822_v34 = vld [vmem:[%s15016_s11 + $0xb08] sm:$0xf] }
 0x5af   :  { %6414 = vmatpush.bf16.msra.mxu2 %v8963_v47  ;;  %6407 = vmatpush.bf16.msrb.mxu1 %v8571_v1  ;;  %6454 = vst [vmem:[%s15018_s13] sm:$0xff] %v6449_v13  ;;  %v8823_v54 = vor.u32 %v9544_v46, %v8822_v34  ;;  %v3765_v47 = vperm.slane %v14861_v17, 5  ;;  %v3766_v34 = vperm.slane %v14861_v17, 6 }
 0x5b1   :  { %v6163_v5 = vpop.f32.mrf.mxu2 }
 0x5b2   :  { %v6164_v27 = vadd.f32 %v6163_v5, %v3764_v38 }
 0x5b3   :  { %6415 = vmatpush.bf16.msra.mxu2 %v8935_v39  ;;  %6408 = vmatpush.bf16.msrb.mxu1 %v8543_v22  ;;  %v6202_v55 = vpop.f32.mrf.mxu1 }
 0x5b4   :  { %v6177_v58 = vadd.f32 %v6176_v42, %v6164_v27 }
 0x5b6   :  { %6409 = vmatmul.bf16.vlgmr.msrb.gmra.mxu1 %v12933_v44  ;;  %v9537_v44 = vld [vmem:[%s15016_s11 + $0xae8] sm:$0xf0]  ;;  %v6190_v11 = vadd.f32 %v6189_v37, %v6177_v58 }
 0x5b7   :  { %6416 = vmatpush.bf16.msra.mxu2 %v8907_v52  ;;  %v8795_v63 = vor.u32 %v9537_v44, %v8794_v33 }
 0x5b8   :  { %v6203_v40 = vadd.f32 %v6202_v55, %v6190_v11 }
 0x5b9   :  { %v6165_v20 = vpop.f32.mrf.mxu2 }
 0x5bb   :  { %6417 = vmatpush.bf16.msra.mxu2 %v8879_v0  ;;  %v6228_v45 = vpop.f32.mrf.mxu3  ;;  %v6204_v36 = vpop.f32.mrf.mxu1 }
 0x5bd   :  { %v6241_v25 = vpop.f32.mrf.mxu0 }
 0x5bf   :  { %6418 = vmatpush.bf16.msra.mxu2 %v8851_v29 }
 0x5c3   :  { %6419 = vmatpush.bf16.msra.mxu2 %v8823_v54  ;;  %v6230_v23 = vpop.f32.mrf.mxu3 }
 0x5c5   :  { %v6243_v6 = vpop.f32.mrf.mxu0 }
 0x5c7   :  { %6420 = vmatpush.bf16.msra.mxu2 %v8795_v63 }
 0x5cb   :  { %6421 = vmatpush.bf16.msra.mxu2 %v8767_v32 }
 0x5ce   :  { %6422 = vmatmul.bf16.vlgmr.msra.gmra.mxu2 %v12980_v3 }
 0x5d1   :  { %v6215_v62 = vpop.f32.mrf.mxu2 }
 0x5d2   :  { %v6216_v41 = vadd.f32 %v6215_v62, %v6203_v40 }
 0x5d3   :  { %v6254_v57 = vpop.f32.mrf.mxu1 }
 0x5d4   :  { %v6229_v56 = vadd.f32 %v6228_v45, %v6216_v41  ;;  %v6255_v9 = vadd.f32 %v6254_v57, %v3765_v47 }
 0x5d6   :  { %v6242_v28 = vadd.f32 %v6241_v25, %v6229_v56 }
 0x5d9   :  { %v6217_v31 = vpop.f32.mrf.mxu2 }
 0x5db   :  { %v6280_v8 = vpop.f32.mrf.mxu3  ;;  %v6256_v48 = vpop.f32.mrf.mxu1 }
 0x5dd   :  { %v6293_v42 = vpop.f32.mrf.mxu0 }
 0x5e3   :  { %v6282_v24 = vpop.f32.mrf.mxu3 }
 0x5e5   :  { %v6295_v49 = vpop.f32.mrf.mxu0 }
 0x5f1   :  { %v6267_v43 = vpop.f32.mrf.mxu2 }
 0x5f2   :  { %v6268_v37 = vadd.f32 %v6267_v43, %v6255_v9 }
 0x5f3   :  { %v6306_v53 = vpop.f32.mrf.mxu1 }
 0x5f4   :  { %v6281_v3 = vadd.f32 %v6280_v8, %v6268_v37 }
 0x5f6   :  { %v6294_v50 = vadd.f32 %v6293_v42, %v6281_v3 }
 0x5f8   :  { %v6307_v2 = vadd.f32 %v6306_v53, %v6294_v50 }
 0x5f9   :  { %v6269_v39 = vpop.f32.mrf.mxu2 }
 0x5fb   :  { %v6332_v1 = vpop.f32.mrf.mxu3  ;;  %v6308_v26 = vpop.f32.mrf.mxu1 }
 0x5fd   :  { %v6345_v19 = vpop.f32.mrf.mxu0 }
 0x5fe   :  { %v6346_v54 = vadd.f32 %v6345_v19, %v3766_v34 }
 0x603   :  { %v6334_v30 = vpop.f32.mrf.mxu3 }
 0x605   :  { %v6347_v35 = vpop.f32.mrf.mxu0 }
 0x611   :  { %v6319_v51 = vpop.f32.mrf.mxu2 }
 0x612   :  { %v6320_v61 = vadd.f32 %v6319_v51, %v6307_v2 }
 0x613   :  { %v6358_v16 = vpop.f32.mrf.mxu1 }
 0x614   :  { %v6333_v22 = vadd.f32 %v6332_v1, %v6320_v61  ;;  %v6359_v5 = vadd.f32 %v6358_v16, %v6346_v54 }
 0x616   :  { %9592 = vtanh.f32 %v6333_v22 }
 0x617   :  { %9594 = vtanh.f32 %v6242_v28 }
 0x619   :  { %v6321_v59 = vpop.f32.mrf.mxu2 }
 0x61b   :  { %v6384_v18 = vpop.f32.mrf.mxu3  ;;  %v6360_v4 = vpop.f32.mrf.mxu1 }
 0x61c   :  { %v9593_v15 = vpop.eup %9592 }
 0x61d   :  { %v6397_v52 = vpop.f32.mrf.mxu0  ;;  %v6444_v21 = vrot.slane %v9593_v15, 6  ;;  %v9595_v60 = vpop.eup %9594 }
 0x61f   :  { %v6450_v13 = vsel %vm197_vm2, %v9595_v60, %v6444_v21 }
 0x623   :  { %v6386_v0 = vpop.f32.mrf.mxu3 }
 0x625   :  { %v6399_v7 = vpop.f32.mrf.mxu0 }
 0x631   :  { %v6371_v10 = vpop.f32.mrf.mxu2 }
 0x632   :  { %v6372_v33 = vadd.f32 %v6371_v10, %v6359_v5 }
 0x633   :  { %v6410_v29 = vpop.f32.mrf.mxu1 }
 0x634   :  { %v6385_v44 = vadd.f32 %v6384_v18, %v6372_v33 }
 0x636   :  { %v6398_v27 = vadd.f32 %v6397_v52, %v6385_v44 }
 0x638   :  { %v6411_v55 = vadd.f32 %v6410_v29, %v6398_v27 }
 0x639   :  { %v6373_v46 = vpop.f32.mrf.mxu2 }
 0x63b   :  { %v6412_v38 = vpop.f32.mrf.mxu1 }
 0x651   :  { %v6423_v58 = vpop.f32.mrf.mxu2 }
 0x652   :  { %v6424_v63 = vadd.f32 %v6423_v58, %v6411_v55 }
 0x654   :  { %9596 = vtanh.f32 %v6424_v63 }
 0x659   :  { %v6425_v12 = vpop.f32.mrf.mxu2 }
 0x65a   :  { %v9597_v14 = vpop.eup %9596 }
 0x65b   :  { %v6445_v11 = vrot.slane %v9597_v14, 4 }
 0x65d   :  { %v6451_v40 = vsel %vm62_vm0, %v6450_v13, %v6445_v11 }
 0x65e   :  { %6455 = vst [vmem:[%s15018_s13 + $0x8] sm:$0x3f] %v6451_v40 }

</bundles_post_ra>
